<compile_context>
chip_gen: v7x
topology: tpu7x:2x2x1
jax: 0.10.0
libtpu: 0.0.40
codegen_flags: <defaults>
</compile_context>

<pallas_src>
import math
from functools import partial

import jax
import jax.numpy as jnp
from jax.experimental import pallas as pl
from jax.experimental.pallas import tpu as pltpu

# ----------------------------- small synthetic config -----------------------------
EMBED_DIM = 32

# vision cfg (VisionTransformer path: eva_model_name=None, layers is int)
V_IMAGE = 16
V_PATCH = 8
V_WIDTH = 32
V_LAYERS = 2
V_HEAD_WIDTH = 16
V_HEADS = V_WIDTH // V_HEAD_WIDTH
V_MLP_RATIO = 4

# text cfg (TextTransformer path: hf_model_name=None)
T_CTX = 8
T_VOCAB = 64
T_WIDTH = 32
T_HEADS = 2
T_LAYERS = 2
T_MLP_RATIO = 4

LN_EPS = 1e-5        # default nn.LayerNorm eps (non-EVA path)
NEG_INF = -1e30      # finite mask value (no exp(-inf - -inf) NaN edge case)
BF16 = jnp.bfloat16


# ----------------------------- in-kernel helpers -----------------------------
def _ln(x, g, b, eps):
    mu = jnp.mean(x, axis=-1, keepdims=True)
    var = jnp.mean(jnp.square(x - mu), axis=-1, keepdims=True)
    return (x - mu) * jax.lax.rsqrt(var + eps) * g + b


def _full_spec(shape):
    # full-array block (satisfies the (8,128) rule via "equal the full array dims")
    if len(shape) == 2:
        return pl.BlockSpec(shape, lambda i: (0, 0))
    return pl.BlockSpec(shape, lambda i: (0, 0, 0))


# ----------------------------- patch-embed conv as im2col matmul -----------------------------
def _matmul_kernel(x_ref, w_ref, o_ref):
    # bias-less matmul (conv1 has bias=False); bf16 operands, f32 accumulate
    o_ref[...] = jnp.dot(x_ref[...], w_ref[...], preferred_element_type=jnp.float32)


def pallas_matmul(x, w):
    M, K = x.shape
    N = w.shape[1]
    return pl.pallas_call(
        _matmul_kernel,
        grid=(1,),
        out_shape=jax.ShapeDtypeStruct((M, N), jnp.float32),
        in_specs=[_full_spec((M, K)), _full_spec((K, N))],
        out_specs=_full_spec((M, N)),
        compiler_params=pltpu.CompilerParams(dimension_semantics=("arbitrary",)),
    )(x, w)


# ----------------------------- fused residual-attention block -----------------------------
def _block_kernel(*refs, B, S, D, heads, causal, n_valid, eps, fuse_pre):
    if fuse_pre:
        x_ref, pos_ref, pre_g_ref, pre_b_ref = refs[:4]
        rest = refs[4:]
    else:
        x_ref = refs[0]
        rest = refs[1:]
    (ln1g_ref, ln1b_ref, qkvw_ref, qkvb_ref, outw_ref, outb_ref,
     ln2g_ref, ln2b_ref, fcw_ref, fcb_ref, pjw_ref, pjb_ref, o_ref) = rest

    dh = D // heads
    scale = 1.0 / math.sqrt(dh)

    x = x_ref[...]                                       # [B, S, D] f32
    if fuse_pre:
        # fused (x + positional_embedding) -> ln_pre for vision layer 0
        x = _ln(x + pos_ref[...], pre_g_ref[...], pre_b_ref[...], eps)
    xf = x.reshape(B * S, D)                             # layout-trivial (S % 8 == 0)

    # ---- LN1 + fused QKV projection (one bf16 MXU matmul over the whole batch) ----
    y = _ln(xf, ln1g_ref[...], ln1b_ref[...], eps)
    qkv = jnp.dot(y.astype(BF16), qkvw_ref[...],
                  preferred_element_type=jnp.float32) + qkvb_ref[...]      # [B*S, 3D]

    # ---- batched multi-head attention: (heads*B) batch dim, no per-head matmuls ----
    def as_heads(base):
        cols = [qkv[:, base + h * dh: base + (h + 1) * dh].reshape(B, S, dh)
                for h in range(heads)]
        return jnp.concatenate(cols, axis=0)             # [heads*B, S, dh], head-major

    q = as_heads(0) * scale
    k = as_heads(D)
    v = as_heads(2 * D)

    s = jnp.einsum('nqd,nkd->nqk', q.astype(BF16), k.astype(BF16),
                   preferred_element_type=jnp.float32)   # [heads*B, S, S]
    if causal or (n_valid < S):
        # masks built in-kernel from iota (no mask tensor DMA); finite fill avoids NaNs
        col = jax.lax.broadcasted_iota(jnp.int32, (S, S), 1)
        keep = col < n_valid
        if causal:
            row = jax.lax.broadcasted_iota(jnp.int32, (S, S), 0)
            keep = jnp.logical_and(keep, col <= row)
        s = jnp.where(keep[None], s, NEG_INF)
    m = jnp.max(s, axis=-1, keepdims=True)
    p = jnp.exp(s - m)
    l = jnp.sum(p, axis=-1, keepdims=True)
    o = jnp.einsum('nqk,nkd->nqd', p.astype(BF16), v.astype(BF16),
                   preferred_element_type=jnp.float32)   # [heads*B, S, dh]
    o = o * pl.reciprocal(l, approx=True)                # softmax denom on the EUP

    # out-projection: one batched per-head matmul + leading-axis head sum (no concat glue)
    oh = o.reshape(heads, B * S, dh)                     # layout-trivial regroup
    proj = jnp.einsum('hnd,hde->hne', oh.astype(BF16), outw_ref[...],
                      preferred_element_type=jnp.float32)  # [heads, B*S, D]
    x1 = xf + jnp.sum(proj, axis=0) + outb_ref[...]      # residual add fused in-kernel

    # ---- LN2 + MLP (fc -> exact-erf GELU -> proj) + residual ----
    y2 = _ln(x1, ln2g_ref[...], ln2b_ref[...], eps)
    h1 = jnp.dot(y2.astype(BF16), fcw_ref[...],
                 preferred_element_type=jnp.float32) + fcb_ref[...]
    h1 = 0.5 * h1 * (1.0 + jax.lax.erf(h1 * (1.0 / math.sqrt(2.0))))       # exact nn.GELU
    out = x1 + jnp.dot(h1.astype(BF16), pjw_ref[...],
                       preferred_element_type=jnp.float32) + pjb_ref[...]
    o_ref[...] = out.reshape(B, S, D)


def pallas_block(x, p, heads, causal, n_valid=None, pre=None):
    B, S, D = x.shape
    assert S % 8 == 0, "sequence dim must be padded to a sublane multiple"
    hidden = p["fc_w"].shape[1]
    dh = D // heads
    n_valid = S if n_valid is None else n_valid

    args = [x]
    if pre is not None:
        pos, g, b = pre
        args += [pos.reshape(1, S, D), g.reshape(1, D), b.reshape(1, D)]
    args += [
        p["ln1_g"].reshape(1, D), p["ln1_b"].reshape(1, D),
        p["qkv_w"].astype(BF16), p["qkv_b"].reshape(1, 3 * D),
        p["out_w"].reshape(heads, dh, D).astype(BF16), p["out_b"].reshape(1, D),
        p["ln2_g"].reshape(1, D), p["ln2_b"].reshape(1, D),
        p["fc_w"].astype(BF16), p["fc_b"].reshape(1, hidden),
        p["proj_w"].astype(BF16), p["proj_b"].reshape(1, D),
    ]
    in_specs = [_full_spec(a.shape) for a in args]

    return pl.pallas_call(
        partial(_block_kernel, B=B, S=S, D=D, heads=heads, causal=causal,
                n_valid=n_valid, eps=LN_EPS, fuse_pre=pre is not None),
        grid=(1,),
        out_shape=jax.ShapeDtypeStruct((B, S, D), jnp.float32),
        in_specs=in_specs,
        out_specs=_full_spec((B, S, D)),
        compiler_params=pltpu.CompilerParams(dimension_semantics=("arbitrary",)),
    )(*args)


# ----------------------------- fused tower epilogue -----------------------------
def _head_kernel(x_ref, g_ref, b_ref, w_ref, o_ref, *, eps):
    # fused final LayerNorm -> projection (bias-less, bf16 MXU) -> L2 normalize
    y = _ln(x_ref[...], g_ref[...], b_ref[...], eps)
    z = jnp.dot(y.astype(BF16), w_ref[...], preferred_element_type=jnp.float32)
    n = jnp.sqrt(jnp.sum(z * z, axis=-1, keepdims=True))
    o_ref[...] = z / jnp.maximum(n, 1e-12)               # matches F.normalize(dim=-1)


def pallas_head(x, g, b, w):
    # TODO(synk): at production sizes tile >=8 rows of B per step and keep E lane-dense
    # (128-multiple) so stores are unmasked vst rather than vst.msk.
    B, D = x.shape
    E = w.shape[1]
    return pl.pallas_call(
        partial(_head_kernel, eps=LN_EPS),
        grid=(1,),
        out_shape=jax.ShapeDtypeStruct((B, E), jnp.float32),
        in_specs=[_full_spec((B, D)), _full_spec((1, D)),
                  _full_spec((1, D)), _full_spec((D, E))],
        out_specs=_full_spec((B, E)),
        compiler_params=pltpu.CompilerParams(dimension_semantics=("arbitrary",)),
    )(x, g.reshape(1, D), b.reshape(1, D), w.astype(BF16))


# ----------------------------- model (glue around kernels) -----------------------------
def encode_image(params, image):
    # layout: image NCHW [B, C, H, W]
    B, C, H, W = image.shape
    P, G = V_PATCH, H // V_PATCH
    S_real = G * G + 1
    S = ((S_real + 7) // 8) * 8                          # pad seq to a sublane multiple

    # im2col for stride==kernel conv1 (bias=False); contraction dim zero-padded to 128-mult
    patches = image.reshape(B, C, G, P, G, P)
    patches = jnp.transpose(patches, (0, 2, 4, 1, 3, 5)).reshape(B * G * G, C * P * P)
    K = C * P * P
    Kp = ((K + 127) // 128) * 128
    patches = jnp.pad(patches, ((0, 0), (0, Kp - K))).astype(BF16)
    conv_w = jnp.pad(params["v_conv_w"].reshape(V_WIDTH, K).T,
                     ((0, Kp - K), (0, 0))).astype(BF16)
    x = pallas_matmul(patches, conv_w).reshape(B, G * G, V_WIDTH)

    cls = jnp.broadcast_to(params["v_cls"], (B, 1, V_WIDTH))
    x = jnp.concatenate([cls, x], axis=1)                # [B, S_real, width]
    x = jnp.pad(x, ((0, 0), (0, S - S_real), (0, 0)))    # zero rows; keys masked in-kernel
    pos = jnp.pad(params["v_pos"], ((0, S - S_real), (0, 0)))

    blocks = params["v_blocks"]
    # layer 0 fuses (x + positional_embedding) -> ln_pre; padded keys masked via n_valid
    x = pallas_block(x, blocks[0], V_HEADS, causal=False, n_valid=S_real,
                     pre=(pos, params["v_ln_pre_g"], params["v_ln_pre_b"]))
    for p in blocks[1:]:
        x = pallas_block(x, p, V_HEADS, causal=False, n_valid=S_real)

    pooled = x[:, 0]                                     # cls pooling (global_average_pool=False)
    # fused ln_post + visual projection + L2 normalize
    return pallas_head(pooled, params["v_ln_post_g"], params["v_ln_post_b"], params["v_proj"])


def encode_text(params, text):
    B, L = text.shape
    x = jnp.take(params["t_tok"], text, axis=0) + params["t_pos"][None]   # embedding gather (glue)
    for p in params["t_blocks"]:
        x = pallas_block(x, p, T_HEADS, causal=True)     # causal mask built in-kernel
    eot = jnp.argmax(text, axis=-1)                      # x[arange(B), text.argmax(-1)]
    pooled = x[jnp.arange(B), eot]
    # LayerNorm is per-token, so ln_final(pooled) == ln_final(x)[pooled]; fuse with proj + l2norm.
    return pallas_head(pooled, params["t_ln_g"], params["t_ln_b"], params["t_proj"])


def clip_forward(params, image, text):
    image_features = encode_image(params, image)         # already L2-normalized
    text_features = encode_text(params, text)            # already L2-normalized
    return image_features, text_features, jnp.exp(params["logit_scale"])


# ----------------------------- deterministic parameter init -----------------------------
def init_params(key):
    keys = iter(jax.random.split(key, 256))
    nk = lambda: next(keys)
    nrm = lambda k, shape: 0.02 * jax.random.normal(k, shape, dtype=jnp.float32)

    def block_params(width, mlp_ratio):
        hidden = int(width * mlp_ratio)
        return dict(
            ln1_g=jnp.ones((width,), jnp.float32), ln1_b=jnp.zeros((width,), jnp.float32),
            qkv_w=nrm(nk(), (width, 3 * width)), qkv_b=jnp.zeros((3 * width,), jnp.float32),
            out_w=nrm(nk(), (width, width)), out_b=jnp.zeros((width,), jnp.float32),
            ln2_g=jnp.ones((width,), jnp.float32), ln2_b=jnp.zeros((width,), jnp.float32),
            fc_w=nrm(nk(), (width, hidden)), fc_b=jnp.zeros((hidden,), jnp.float32),
            proj_w=nrm(nk(), (hidden, width)), proj_b=jnp.zeros((width,), jnp.float32),
        )

    G = V_IMAGE // V_PATCH
    return dict(
        v_conv_w=nrm(nk(), (V_WIDTH, 3, V_PATCH, V_PATCH)),
        v_cls=nrm(nk(), (V_WIDTH,)),
        v_pos=nrm(nk(), (G * G + 1, V_WIDTH)),
        v_ln_pre_g=jnp.ones((V_WIDTH,), jnp.float32), v_ln_pre_b=jnp.zeros((V_WIDTH,), jnp.float32),
        v_blocks=[block_params(V_WIDTH, V_MLP_RATIO) for _ in range(V_LAYERS)],
        v_ln_post_g=jnp.ones((V_WIDTH,), jnp.float32), v_ln_post_b=jnp.zeros((V_WIDTH,), jnp.float32),
        v_proj=nrm(nk(), (V_WIDTH, EMBED_DIM)),
        t_tok=nrm(nk(), (T_VOCAB, T_WIDTH)),
        t_pos=nrm(nk(), (T_CTX, T_WIDTH)),
        t_blocks=[block_params(T_WIDTH, T_MLP_RATIO) for _ in range(T_LAYERS)],
        t_ln_g=jnp.ones((T_WIDTH,), jnp.float32), t_ln_b=jnp.zeros((T_WIDTH,), jnp.float32),
        t_proj=nrm(nk(), (T_WIDTH, EMBED_DIM)),
        logit_scale=jnp.array(math.log(1.0 / 0.07), jnp.float32),
    )


if __name__ == "__main__":
    key = jax.random.PRNGKey(0)
    kp, ki, kt = jax.random.split(key, 3)
    params = init_params(kp)
    image = jax.random.normal(ki, (2, 3, V_IMAGE, V_IMAGE), dtype=jnp.float32)
    text = jax.random.randint(kt, (2, T_CTX), 0, T_VOCAB, dtype=jnp.int32)

    img_f, txt_f, scale = jax.jit(clip_forward)(params, image, text)
    jax.block_until_ready((img_f, txt_f, scale))

    assert img_f.shape == (2, EMBED_DIM) and txt_f.shape == (2, EMBED_DIM)
    assert bool(jnp.all(jnp.isfinite(img_f))) and bool(jnp.all(jnp.isfinite(txt_f)))
    print("KERNEL_OK")
</pallas_src>

<mosaic_0001>
module attributes {stable_mosaic.version = 11 : i64} {
  func.func @_matmul_kernel(%arg0: i32, %arg1: memref<8x256xbf16, #tpu.memory_space<vmem>>, %arg2: memref<256x32xbf16, #tpu.memory_space<vmem>>, %arg3: memref<8x32xf32, #tpu.memory_space<vmem>>) attributes {dimension_semantics = [#tpu.dimension_semantics<arbitrary>], iteration_bounds = array<i64: 1>, scalar_prefetch = 0 : i64, scratch_operands = 0 : i64, tpu.core_type = #tpu.core_type<tc>, window_params = [{pipeline_mode = #tpu.pipeline_mode<synchronous>, transform_indices = @transform_0, window_bounds = array<i64: 8, 256>}, {pipeline_mode = #tpu.pipeline_mode<synchronous>, transform_indices = @transform_1, window_bounds = array<i64: 256, 32>}, {pipeline_mode = #tpu.pipeline_mode<synchronous>, transform_indices = @transform_2, window_bounds = array<i64: 8, 32>}]} {
    %c0 = arith.constant 0 : index
    %c0_0 = arith.constant 0 : index
    %0 = vector.load %arg1[%c0, %c0_0] : memref<8x256xbf16, #tpu.memory_space<vmem>>, vector<8x256xbf16>
    %c0_1 = arith.constant 0 : index
    %c0_2 = arith.constant 0 : index
    %1 = vector.load %arg2[%c0_1, %c0_2] : memref<256x32xbf16, #tpu.memory_space<vmem>>, vector<256x32xbf16>
    %cst = arith.constant dense<0.000000e+00> : vector<8x32xf32>
    %2 = tpu.matmul %0, %1, %cst {dimension_numbers = #tpu.dot_dimension_numbers<[1], [0], [0], [1], [0, 0, 1, 1], [], []>} : vector<8x256xbf16>, vector<256x32xbf16>, vector<8x32xf32> -> vector<8x32xf32>
    %c0_3 = arith.constant 0 : index
    %c0_4 = arith.constant 0 : index
    %3 = vector.load %arg3[%c0_3, %c0_4] : memref<8x32xf32, #tpu.memory_space<vmem>>, vector<8x32xf32>
    tpu.vector_store %arg3[%c0_3, %c0_4], %2 {strides = array<i32>} : memref<8x32xf32, #tpu.memory_space<vmem>>, vector<8x32xf32>,
    return
  }
  func.func @transform_0(%arg0: i32) -> (i32, i32) {
    %c0_i32 = arith.constant 0 : i32
    %c0_i32_0 = arith.constant 0 : i32
    %c0_i32_1 = arith.constant 0 : i32
    return %c0_i32, %c0_i32_0 : i32, i32
  }
  func.func @transform_1(%arg0: i32) -> (i32, i32) {
    %c0_i32 = arith.constant 0 : i32
    %c0_i32_0 = arith.constant 0 : i32
    %c0_i32_1 = arith.constant 0 : i32
    return %c0_i32, %c0_i32_0 : i32, i32
  }
  func.func @transform_2(%arg0: i32) -> (i32, i32) {
    %c0_i32 = arith.constant 0 : i32
    %c0_i32_0 = arith.constant 0 : i32
    %c0_i32_1 = arith.constant 0 : i32
    return %c0_i32, %c0_i32_0 : i32, i32
  }
}

module attributes {stable_mosaic.version = 11 : i64} {
  func.func @_block_kernel(%arg0: i32, %arg1: memref<2x8x32xf32, #tpu.memory_space<vmem>>, %arg2: memref<1x32xf32, #tpu.memory_space<vmem>>, %arg3: memref<1x32xf32, #tpu.memory_space<vmem>>, %arg4: memref<32x96xbf16, #tpu.memory_space<vmem>>, %arg5: memref<1x96xf32, #tpu.memory_space<vmem>>, %arg6: memref<2x16x32xbf16, #tpu.memory_space<vmem>>, %arg7: memref<1x32xf32, #tpu.memory_space<vmem>>, %arg8: memref<1x32xf32, #tpu.memory_space<vmem>>, %arg9: memref<1x32xf32, #tpu.memory_space<vmem>>, %arg10: memref<32x128xbf16, #tpu.memory_space<vmem>>, %arg11: memref<1x128xf32, #tpu.memory_space<vmem>>, %arg12: memref<128x32xbf16, #tpu.memory_space<vmem>>, %arg13: memref<1x32xf32, #tpu.memory_space<vmem>>, %arg14: memref<2x8x32xf32, #tpu.memory_space<vmem>>) attributes {dimension_semantics = [#tpu.dimension_semantics<arbitrary>], iteration_bounds = array<i64: 1>, scalar_prefetch = 0 : i64, scratch_operands = 0 : i64, tpu.core_type = #tpu.core_type<tc>, window_params = [{pipeline_mode = #tpu.pipeline_mode<synchronous>, transform_indices = @transform_0, window_bounds = array<i64: 2, 8, 32>}, {pipeline_mode = #tpu.pipeline_mode<synchronous>, transform_indices = @transform_1, window_bounds = array<i64: 1, 32>}, {pipeline_mode = #tpu.pipeline_mode<synchronous>, transform_indices = @transform_2, window_bounds = array<i64: 1, 32>}, {pipeline_mode = #tpu.pipeline_mode<synchronous>, transform_indices = @transform_3, window_bounds = array<i64: 32, 96>}, {pipeline_mode = #tpu.pipeline_mode<synchronous>, transform_indices = @transform_4, window_bounds = array<i64: 1, 96>}, {pipeline_mode = #tpu.pipeline_mode<synchronous>, transform_indices = @transform_5, window_bounds = array<i64: 2, 16, 32>}, {pipeline_mode = #tpu.pipeline_mode<synchronous>, transform_indices = @transform_6, window_bounds = array<i64: 1, 32>}, {pipeline_mode = #tpu.pipeline_mode<synchronous>, transform_indices = @transform_7, window_bounds = array<i64: 1, 32>}, {pipeline_mode = #tpu.pipeline_mode<synchronous>, transform_indices = @transform_8, window_bounds = array<i64: 1, 32>}, {pipeline_mode = #tpu.pipeline_mode<synchronous>, transform_indices = @transform_9, window_bounds = array<i64: 32, 128>}, {pipeline_mode = #tpu.pipeline_mode<synchronous>, transform_indices = @transform_10, window_bounds = array<i64: 1, 128>}, {pipeline_mode = #tpu.pipeline_mode<synchronous>, transform_indices = @transform_11, window_bounds = array<i64: 128, 32>}, {pipeline_mode = #tpu.pipeline_mode<synchronous>, transform_indices = @transform_12, window_bounds = array<i64: 1, 32>}, {pipeline_mode = #tpu.pipeline_mode<synchronous>, transform_indices = @transform_13, window_bounds = array<i64: 2, 8, 32>}]} {
    %c0 = arith.constant 0 : index
    %c0_0 = arith.constant 0 : index
    %c0_1 = arith.constant 0 : index
    %0 = vector.load %arg1[%c0, %c0_0, %c0_1] : memref<2x8x32xf32, #tpu.memory_space<vmem>>, vector<2x8x32xf32>
    %1 = vector.shape_cast %0 : vector<2x8x32xf32> to vector<16x32xf32>
    %c0_2 = arith.constant 0 : index
    %c0_3 = arith.constant 0 : index
    %2 = vector.load %arg2[%c0_2, %c0_3] : memref<1x32xf32, #tpu.memory_space<vmem>>, vector<1x32xf32>
    %c0_4 = arith.constant 0 : index
    %c0_5 = arith.constant 0 : index
    %3 = vector.load %arg3[%c0_4, %c0_5] : memref<1x32xf32, #tpu.memory_space<vmem>>, vector<1x32xf32>
    %cst = arith.constant dense<0.000000e+00> : vector<16xf32>
    %4 = vector.multi_reduction <add>, %1, %cst [1] : vector<16x32xf32> to vector<16xf32>
    %5 = vector.shape_cast %4 : vector<16xf32> to vector<16x1xf32>
    %cst_6 = arith.constant 3.200000e+01 : f32
    %6 = vector.broadcast %cst_6 : f32 to vector<16x1xf32>
    %7 = arith.divf %5, %6 : vector<16x1xf32>
    %8 = vector.broadcast %7 : vector<16x1xf32> to vector<16x32xf32>
    %9 = arith.subf %1, %8 : vector<16x32xf32>
    %10 = arith.mulf %9, %9 : vector<16x32xf32>
    %cst_7 = arith.constant dense<0.000000e+00> : vector<16xf32>
    %11 = vector.multi_reduction <add>, %10, %cst_7 [1] : vector<16x32xf32> to vector<16xf32>
    %12 = vector.shape_cast %11 : vector<16xf32> to vector<16x1xf32>
    %cst_8 = arith.constant 3.200000e+01 : f32
    %13 = vector.broadcast %cst_8 : f32 to vector<16x1xf32>
    %14 = arith.divf %12, %13 : vector<16x1xf32>
    %15 = vector.broadcast %7 : vector<16x1xf32> to vector<16x32xf32>
    %16 = arith.subf %1, %15 : vector<16x32xf32>
    %cst_9 = arith.constant 9.99999974E-6 : f32
    %17 = vector.broadcast %cst_9 : f32 to vector<16x1xf32>
    %18 = arith.addf %14, %17 : vector<16x1xf32>
    %19 = math.rsqrt %18 : vector<16x1xf32>
    %20 = vector.broadcast %19 : vector<16x1xf32> to vector<16x32xf32>
    %21 = arith.mulf %16, %20 : vector<16x32xf32>
    %22 = vector.broadcast %2 : vector<1x32xf32> to vector<16x32xf32>
    %23 = arith.mulf %21, %22 : vector<16x32xf32>
    %24 = vector.broadcast %3 : vector<1x32xf32> to vector<16x32xf32>
    %25 = arith.addf %23, %24 : vector<16x32xf32>
    %26 = arith.truncf %25 : vector<16x32xf32> to vector<16x32xbf16>
    %c0_10 = arith.constant 0 : index
    %c0_11 = arith.constant 0 : index
    %27 = vector.load %arg4[%c0_10, %c0_11] : memref<32x96xbf16, #tpu.memory_space<vmem>>, vector<32x96xbf16>
    %cst_12 = arith.constant dense<0.000000e+00> : vector<16x96xf32>
    %28 = tpu.matmul %26, %27, %cst_12 {dimension_numbers = #tpu.dot_dimension_numbers<[1], [0], [0], [1], [0, 0, 1, 1], [], []>} : vector<16x32xbf16>, vector<32x96xbf16>, vector<16x96xf32> -> vector<16x96xf32>
    %c0_13 = arith.constant 0 : index
    %c0_14 = arith.constant 0 : index
    %29 = vector.load %arg5[%c0_13, %c0_14] : memref<1x96xf32, #tpu.memory_space<vmem>>, vector<1x96xf32>
    %30 = vector.broadcast %29 : vector<1x96xf32> to vector<16x96xf32>
    %31 = arith.addf %28, %30 : vector<16x96xf32>
    %32 = vector.extract_strided_slice %31 {offsets = [0, 0], sizes = [16, 16], strides = [1, 1]} : vector<16x96xf32> to vector<16x16xf32>
    %33 = vector.shape_cast %32 : vector<16x16xf32> to vector<2x8x16xf32>
    %34 = vector.extract_strided_slice %31 {offsets = [0, 16], sizes = [16, 16], strides = [1, 1]} : vector<16x96xf32> to vector<16x16xf32>
    %35 = vector.shape_cast %34 : vector<16x16xf32> to vector<2x8x16xf32>
    %36 = tpu.concatenate %33, %35 in 0 : vector<2x8x16xf32>, vector<2x8x16xf32> -> vector<4x8x16xf32>
    %cst_15 = arith.constant 2.500000e-01 : f32
    %37 = vector.broadcast %cst_15 : f32 to vector<4x8x16xf32>
    %38 = arith.mulf %36, %37 : vector<4x8x16xf32>
    %39 = vector.extract_strided_slice %31 {offsets = [0, 32], sizes = [16, 16], strides = [1, 1]} : vector<16x96xf32> to vector<16x16xf32>
    %40 = vector.shape_cast %39 : vector<16x16xf32> to vector<2x8x16xf32>
    %41 = vector.extract_strided_slice %31 {offsets = [0, 48], sizes = [16, 16], strides = [1, 1]} : vector<16x96xf32> to vector<16x16xf32>
    %42 = vector.shape_cast %41 : vector<16x16xf32> to vector<2x8x16xf32>
    %43 = tpu.concatenate %40, %42 in 0 : vector<2x8x16xf32>, vector<2x8x16xf32> -> vector<4x8x16xf32>
    %44 = vector.extract_strided_slice %31 {offsets = [0, 64], sizes = [16, 16], strides = [1, 1]} : vector<16x96xf32> to vector<16x16xf32>
    %45 = vector.shape_cast %44 : vector<16x16xf32> to vector<2x8x16xf32>
    %46 = vector.extract_strided_slice %31 {offsets = [0, 80], sizes = [16, 16], strides = [1, 1]} : vector<16x96xf32> to vector<16x16xf32>
    %47 = vector.shape_cast %46 : vector<16x16xf32> to vector<2x8x16xf32>
    %48 = tpu.concatenate %45, %47 in 0 : vector<2x8x16xf32>, vector<2x8x16xf32> -> vector<4x8x16xf32>
    %49 = arith.truncf %38 : vector<4x8x16xf32> to vector<4x8x16xbf16>
    %50 = arith.truncf %43 : vector<4x8x16xf32> to vector<4x8x16xbf16>
    "tpu.trace_start"() <{level = 10 : i32, message = "nqd,nkd->nqk"}> : () -> ()
    %cst_16 = arith.constant dense<0.000000e+00> : vector<4x8x8xf32>
    %51 = tpu.matmul %49, %50, %cst_16 {dimension_numbers = #tpu.dot_dimension_numbers<[2], [2], [1], [1], [0, 0, 0, 1, 1, 1], [0], [0]>} : vector<4x8x16xbf16>, vector<4x8x16xbf16>, vector<4x8x8xf32> -> vector<4x8x8xf32>
    "tpu.trace_stop"() : () -> ()
    %52 = tpu.iota {dimensions = array<i32: 1>} : vector<8x8xi32>
    %c5_i32 = arith.constant 5 : i32
    %53 = vector.broadcast %c5_i32 : i32 to vector<8x8xi32>
    %54 = arith.cmpi slt, %52, %53 : vector<8x8xi32>
    %55 = vector.shape_cast %54 : vector<8x8xi1> to vector<1x8x8xi1>
    %cst_17 = arith.constant -1.000000e+30 : f32
    %56 = vector.shape_cast %55 : vector<1x8x8xi1> to vector<1x8x8xi1>
    %57 = vector.broadcast %56 : vector<1x8x8xi1> to vector<4x8x8xi1>
    %58 = vector.broadcast %cst_17 : f32 to vector<4x8x8xf32>
    %59 = arith.select %57, %51, %58 : vector<4x8x8xi1>, vector<4x8x8xf32>
    %cst_18 = arith.constant dense<0xFF800000> : vector<4x8xf32>
    %60 = vector.multi_reduction <maximumf>, %59, %cst_18 [2] : vector<4x8x8xf32> to vector<4x8xf32>
    %61 = vector.shape_cast %60 : vector<4x8xf32> to vector<4x8x1xf32>
    %62 = vector.broadcast %61 : vector<4x8x1xf32> to vector<4x8x8xf32>
    %63 = arith.subf %59, %62 : vector<4x8x8xf32>
    %64 = math.exp %63 : vector<4x8x8xf32>
    %cst_19 = arith.constant dense<0.000000e+00> : vector<4x8xf32>
    %65 = vector.multi_reduction <add>, %64, %cst_19 [2] : vector<4x8x8xf32> to vector<4x8xf32>
    %66 = vector.shape_cast %65 : vector<4x8xf32> to vector<4x8x1xf32>
    %67 = arith.truncf %64 : vector<4x8x8xf32> to vector<4x8x8xbf16>
    %68 = arith.truncf %48 : vector<4x8x16xf32> to vector<4x8x16xbf16>
    "tpu.trace_start"() <{level = 10 : i32, message = "nqk,nkd->nqd"}> : () -> ()
    %cst_20 = arith.constant dense<0.000000e+00> : vector<4x8x16xf32>
    %69 = tpu.matmul %67, %68, %cst_20 {dimension_numbers = #tpu.dot_dimension_numbers<[2], [1], [1], [2], [0, 0, 0, 1, 1, 2], [0], [0]>} : vector<4x8x8xbf16>, vector<4x8x16xbf16>, vector<4x8x16xf32> -> vector<4x8x16xf32>
    "tpu.trace_stop"() : () -> ()
    %70 = tpu.reciprocal %66 {approx = true} : vector<4x8x1xf32> -> vector<4x8x1xf32>
    %71 = vector.broadcast %70 : vector<4x8x1xf32> to vector<4x8x16xf32>
    %72 = arith.mulf %69, %71 : vector<4x8x16xf32>
    %73 = vector.shape_cast %72 : vector<4x8x16xf32> to vector<2x16x16xf32>
    %74 = arith.truncf %73 : vector<2x16x16xf32> to vector<2x16x16xbf16>
    %c0_21 = arith.constant 0 : index
    %c0_22 = arith.constant 0 : index
    %c0_23 = arith.constant 0 : index
    %75 = vector.load %arg6[%c0_21, %c0_22, %c0_23] : memref<2x16x32xbf16, #tpu.memory_space<vmem>>, vector<2x16x32xbf16>
    "tpu.trace_start"() <{level = 10 : i32, message = "hnd,hde->hne"}> : () -> ()
    %cst_24 = arith.constant dense<0.000000e+00> : vector<2x16x32xf32>
    %76 = tpu.matmul %74, %75, %cst_24 {dimension_numbers = #tpu.dot_dimension_numbers<[2], [1], [1], [2], [0, 0, 0, 1, 1, 2], [0], [0]>} : vector<2x16x16xbf16>, vector<2x16x32xbf16>, vector<2x16x32xf32> -> vector<2x16x32xf32>
    "tpu.trace_stop"() : () -> ()
    %cst_25 = arith.constant dense<0.000000e+00> : vector<16x32xf32>
    %77 = vector.multi_reduction <add>, %76, %cst_25 [0] : vector<2x16x32xf32> to vector<16x32xf32>
    %78 = arith.addf %1, %77 : vector<16x32xf32>
    %c0_26 = arith.constant 0 : index
    %c0_27 = arith.constant 0 : index
    %79 = vector.load %arg7[%c0_26, %c0_27] : memref<1x32xf32, #tpu.memory_space<vmem>>, vector<1x32xf32>
    %80 = vector.broadcast %79 : vector<1x32xf32> to vector<16x32xf32>
    %81 = arith.addf %78, %80 : vector<16x32xf32>
    %c0_28 = arith.constant 0 : index
    %c0_29 = arith.constant 0 : index
    %82 = vector.load %arg8[%c0_28, %c0_29] : memref<1x32xf32, #tpu.memory_space<vmem>>, vector<1x32xf32>
    %c0_30 = arith.constant 0 : index
    %c0_31 = arith.constant 0 : index
    %83 = vector.load %arg9[%c0_30, %c0_31] : memref<1x32xf32, #tpu.memory_space<vmem>>, vector<1x32xf32>
    %cst_32 = arith.constant dense<0.000000e+00> : vector<16xf32>
    %84 = vector.multi_reduction <add>, %81, %cst_32 [1] : vector<16x32xf32> to vector<16xf32>
    %85 = vector.shape_cast %84 : vector<16xf32> to vector<16x1xf32>
    %cst_33 = arith.constant 3.200000e+01 : f32
    %86 = vector.broadcast %cst_33 : f32 to vector<16x1xf32>
    %87 = arith.divf %85, %86 : vector<16x1xf32>
    %88 = vector.broadcast %87 : vector<16x1xf32> to vector<16x32xf32>
    %89 = arith.subf %81, %88 : vector<16x32xf32>
    %90 = arith.mulf %89, %89 : vector<16x32xf32>
    %cst_34 = arith.constant dense<0.000000e+00> : vector<16xf32>
    %91 = vector.multi_reduction <add>, %90, %cst_34 [1] : vector<16x32xf32> to vector<16xf32>
    %92 = vector.shape_cast %91 : vector<16xf32> to vector<16x1xf32>
    %cst_35 = arith.constant 3.200000e+01 : f32
    %93 = vector.broadcast %cst_35 : f32 to vector<16x1xf32>
    %94 = arith.divf %92, %93 : vector<16x1xf32>
    %95 = vector.broadcast %87 : vector<16x1xf32> to vector<16x32xf32>
    %96 = arith.subf %81, %95 : vector<16x32xf32>
    %cst_36 = arith.constant 9.99999974E-6 : f32
    %97 = vector.broadcast %cst_36 : f32 to vector<16x1xf32>
    %98 = arith.addf %94, %97 : vector<16x1xf32>
    %99 = math.rsqrt %98 : vector<16x1xf32>
    %100 = vector.broadcast %99 : vector<16x1xf32> to vector<16x32xf32>
    %101 = arith.mulf %96, %100 : vector<16x32xf32>
    %102 = vector.broadcast %82 : vector<1x32xf32> to vector<16x32xf32>
    %103 = arith.mulf %101, %102 : vector<16x32xf32>
    %104 = vector.broadcast %83 : vector<1x32xf32> to vector<16x32xf32>
    %105 = arith.addf %103, %104 : vector<16x32xf32>
    %106 = arith.truncf %105 : vector<16x32xf32> to vector<16x32xbf16>
    %c0_37 = arith.constant 0 : index
    %c0_38 = arith.constant 0 : index
    %107 = vector.load %arg10[%c0_37, %c0_38] : memref<32x128xbf16, #tpu.memory_space<vmem>>, vector<32x128xbf16>
    %cst_39 = arith.constant dense<0.000000e+00> : vector<16x128xf32>
    %108 = tpu.matmul %106, %107, %cst_39 {dimension_numbers = #tpu.dot_dimension_numbers<[1], [0], [0], [1], [0, 0, 1, 1], [], []>} : vector<16x32xbf16>, vector<32x128xbf16>, vector<16x128xf32> -> vector<16x128xf32>
    %c0_40 = arith.constant 0 : index
    %c0_41 = arith.constant 0 : index
    %109 = vector.load %arg11[%c0_40, %c0_41] : memref<1x128xf32, #tpu.memory_space<vmem>>, vector<1x128xf32>
    %110 = vector.broadcast %109 : vector<1x128xf32> to vector<16x128xf32>
    %111 = arith.addf %108, %110 : vector<16x128xf32>
    %cst_42 = arith.constant 5.000000e-01 : f32
    %112 = vector.broadcast %cst_42 : f32 to vector<16x128xf32>
    %113 = arith.mulf %112, %111 : vector<16x128xf32>
    %cst_43 = arith.constant 0.707106769 : f32
    %114 = vector.broadcast %cst_43 : f32 to vector<16x128xf32>
    %115 = arith.mulf %111, %114 : vector<16x128xf32>
    %116 = math.erf %115 : vector<16x128xf32>
    %cst_44 = arith.constant 1.000000e+00 : f32
    %117 = vector.broadcast %cst_44 : f32 to vector<16x128xf32>
    %118 = arith.addf %117, %116 : vector<16x128xf32>
    %119 = arith.mulf %113, %118 : vector<16x128xf32>
    %120 = arith.truncf %119 : vector<16x128xf32> to vector<16x128xbf16>
    %c0_45 = arith.constant 0 : index
    %c0_46 = arith.constant 0 : index
    %121 = vector.load %arg12[%c0_45, %c0_46] : memref<128x32xbf16, #tpu.memory_space<vmem>>, vector<128x32xbf16>
    %cst_47 = arith.constant dense<0.000000e+00> : vector<16x32xf32>
    %122 = tpu.matmul %120, %121, %cst_47 {dimension_numbers = #tpu.dot_dimension_numbers<[1], [0], [0], [1], [0, 0, 1, 1], [], []>} : vector<16x128xbf16>, vector<128x32xbf16>, vector<16x32xf32> -> vector<16x32xf32>
    %123 = arith.addf %81, %122 : vector<16x32xf32>
    %c0_48 = arith.constant 0 : index
    %c0_49 = arith.constant 0 : index
    %124 = vector.load %arg13[%c0_48, %c0_49] : memref<1x32xf32, #tpu.memory_space<vmem>>, vector<1x32xf32>
    %125 = vector.broadcast %124 : vector<1x32xf32> to vector<16x32xf32>
    %126 = arith.addf %123, %125 : vector<16x32xf32>
    %127 = vector.shape_cast %126 : vector<16x32xf32> to vector<2x8x32xf32>
    %c0_50 = arith.constant 0 : index
    %c0_51 = arith.constant 0 : index
    %c0_52 = arith.constant 0 : index
    %128 = vector.load %arg14[%c0_50, %c0_51, %c0_52] : memref<2x8x32xf32, #tpu.memory_space<vmem>>, vector<2x8x32xf32>
    tpu.vector_store %arg14[%c0_50, %c0_51, %c0_52], %127 {strides = array<i32>} : memref<2x8x32xf32, #tpu.memory_space<vmem>>, vector<2x8x32xf32>,
    return
  }
  func.func @transform_0(%arg0: i32) -> (i32, i32, i32) {
    %c0_i32 = arith.constant 0 : i32
    %c0_i32_0 = arith.constant 0 : i32
    %c0_i32_1 = arith.constant 0 : i32
    %c0_i32_2 = arith.constant 0 : i32
    return %c0_i32, %c0_i32_0, %c0_i32_1 : i32, i32, i32
  }
  func.func @transform_1(%arg0: i32) -> (i32, i32) {
    %c0_i32 = arith.constant 0 : i32
    %c0_i32_0 = arith.constant 0 : i32
    %c0_i32_1 = arith.constant 0 : i32
    return %c0_i32, %c0_i32_0 : i32, i32
  }
  func.func @transform_2(%arg0: i32) -> (i32, i32) {
    %c0_i32 = arith.constant 0 : i32
    %c0_i32_0 = arith.constant 0 : i32
    %c0_i32_1 = arith.constant 0 : i32
    return %c0_i32, %c0_i32_0 : i32, i32
  }
  func.func @transform_3(%arg0: i32) -> (i32, i32) {
    %c0_i32 = arith.constant 0 : i32
    %c0_i32_0 = arith.constant 0 : i32
    %c0_i32_1 = arith.constant 0 : i32
    return %c0_i32, %c0_i32_0 : i32, i32
  }
  func.func @transform_4(%arg0: i32) -> (i32, i32) {
    %c0_i32 = arith.constant 0 : i32
    %c0_i32_0 = arith.constant 0 : i32
    %c0_i32_1 = arith.constant 0 : i32
    return %c0_i32, %c0_i32_0 : i32, i32
  }
  func.func @transform_5(%arg0: i32) -> (i32, i32, i32) {
    %c0_i32 = arith.constant 0 : i32
    %c0_i32_0 = arith.constant 0 : i32
    %c0_i32_1 = arith.constant 0 : i32
    %c0_i32_2 = arith.constant 0 : i32
    return %c0_i32, %c0_i32_0, %c0_i32_1 : i32, i32, i32
  }
  func.func @transform_6(%arg0: i32) -> (i32, i32) {
    %c0_i32 = arith.constant 0 : i32
    %c0_i32_0 = arith.constant 0 : i32
    %c0_i32_1 = arith.constant 0 : i32
    return %c0_i32, %c0_i32_0 : i32, i32
  }
  func.func @transform_7(%arg0: i32) -> (i32, i32) {
    %c0_i32 = arith.constant 0 : i32
    %c0_i32_0 = arith.constant 0 : i32
    %c0_i32_1 = arith.constant 0 : i32
    return %c0_i32, %c0_i32_0 : i32, i32
  }
  func.func @transform_8(%arg0: i32) -> (i32, i32) {
    %c0_i32 = arith.constant 0 : i32
    %c0_i32_0 = arith.constant 0 : i32
    %c0_i32_1 = arith.constant 0 : i32
    return %c0_i32, %c0_i32_0 : i32, i32
  }
  func.func @transform_9(%arg0: i32) -> (i32, i32) {
    %c0_i32 = arith.constant 0 : i32
    %c0_i32_0 = arith.constant 0 : i32
    %c0_i32_1 = arith.constant 0 : i32
    return %c0_i32, %c0_i32_0 : i32, i32
  }
  func.func @transform_10(%arg0: i32) -> (i32, i32) {
    %c0_i32 = arith.constant 0 : i32
    %c0_i32_0 = arith.constant 0 : i32
    %c0_i32_1 = arith.constant 0 : i32
    return %c0_i32, %c0_i32_0 : i32, i32
  }
  func.func @transform_11(%arg0: i32) -> (i32, i32) {
    %c0_i32 = arith.constant 0 : i32
    %c0_i32_0 = arith.constant 0 : i32
    %c0_i32_1 = arith.constant 0 : i32
    return %c0_i32, %c0_i32_0 : i32, i32
  }
  func.func @transform_12(%arg0: i32) -> (i32, i32) {
    %c0_i32 = arith.constant 0 : i32
    %c0_i32_0 = arith.constant 0 : i32
    %c0_i32_1 = arith.constant 0 : i32
    return %c0_i32, %c0_i32_0 : i32, i32
  }
  func.func @transform_13(%arg0: i32) -> (i32, i32, i32) {
    %c0_i32 = arith.constant 0 : i32
    %c0_i32_0 = arith.constant 0 : i32
    %c0_i32_1 = arith.constant 0 : i32
    %c0_i32_2 = arith.constant 0 : i32
    return %c0_i32, %c0_i32_0, %c0_i32_1 : i32, i32, i32
  }
}

module attributes {stable_mosaic.version = 11 : i64} {
  func.func @_head_kernel(%arg0: i32, %arg1: memref<2x32xf32, #tpu.memory_space<vmem>>, %arg2: memref<1x32xf32, #tpu.memory_space<vmem>>, %arg3: memref<1x32xf32, #tpu.memory_space<vmem>>, %arg4: memref<32x32xbf16, #tpu.memory_space<vmem>>, %arg5: memref<2x32xf32, #tpu.memory_space<vmem>>) attributes {dimension_semantics = [#tpu.dimension_semantics<arbitrary>], iteration_bounds = array<i64: 1>, scalar_prefetch = 0 : i64, scratch_operands = 0 : i64, tpu.core_type = #tpu.core_type<tc>, window_params = [{pipeline_mode = #tpu.pipeline_mode<synchronous>, transform_indices = @transform_0, window_bounds = array<i64: 2, 32>}, {pipeline_mode = #tpu.pipeline_mode<synchronous>, transform_indices = @transform_1, window_bounds = array<i64: 1, 32>}, {pipeline_mode = #tpu.pipeline_mode<synchronous>, transform_indices = @transform_2, window_bounds = array<i64: 1, 32>}, {pipeline_mode = #tpu.pipeline_mode<synchronous>, transform_indices = @transform_3, window_bounds = array<i64: 32, 32>}, {pipeline_mode = #tpu.pipeline_mode<synchronous>, transform_indices = @transform_4, window_bounds = array<i64: 2, 32>}]} {
    %c0 = arith.constant 0 : index
    %c0_0 = arith.constant 0 : index
    %0 = vector.load %arg1[%c0, %c0_0] : memref<2x32xf32, #tpu.memory_space<vmem>>, vector<2x32xf32>
    %c0_1 = arith.constant 0 : index
    %c0_2 = arith.constant 0 : index
    %1 = vector.load %arg2[%c0_1, %c0_2] : memref<1x32xf32, #tpu.memory_space<vmem>>, vector<1x32xf32>
    %c0_3 = arith.constant 0 : index
    %c0_4 = arith.constant 0 : index
    %2 = vector.load %arg3[%c0_3, %c0_4] : memref<1x32xf32, #tpu.memory_space<vmem>>, vector<1x32xf32>
    %cst = arith.constant dense<0.000000e+00> : vector<2xf32>
    %3 = vector.multi_reduction <add>, %0, %cst [1] : vector<2x32xf32> to vector<2xf32>
    %4 = vector.shape_cast %3 : vector<2xf32> to vector<2x1xf32>
    %cst_5 = arith.constant 3.200000e+01 : f32
    %5 = vector.broadcast %cst_5 : f32 to vector<2x1xf32>
    %6 = arith.divf %4, %5 : vector<2x1xf32>
    %7 = vector.broadcast %6 : vector<2x1xf32> to vector<2x32xf32>
    %8 = arith.subf %0, %7 : vector<2x32xf32>
    %9 = arith.mulf %8, %8 : vector<2x32xf32>
    %cst_6 = arith.constant dense<0.000000e+00> : vector<2xf32>
    %10 = vector.multi_reduction <add>, %9, %cst_6 [1] : vector<2x32xf32> to vector<2xf32>
    %11 = vector.shape_cast %10 : vector<2xf32> to vector<2x1xf32>
    %cst_7 = arith.constant 3.200000e+01 : f32
    %12 = vector.broadcast %cst_7 : f32 to vector<2x1xf32>
    %13 = arith.divf %11, %12 : vector<2x1xf32>
    %14 = vector.broadcast %6 : vector<2x1xf32> to vector<2x32xf32>
    %15 = arith.subf %0, %14 : vector<2x32xf32>
    %cst_8 = arith.constant 9.99999974E-6 : f32
    %16 = vector.broadcast %cst_8 : f32 to vector<2x1xf32>
    %17 = arith.addf %13, %16 : vector<2x1xf32>
    %18 = math.rsqrt %17 : vector<2x1xf32>
    %19 = vector.broadcast %18 : vector<2x1xf32> to vector<2x32xf32>
    %20 = arith.mulf %15, %19 : vector<2x32xf32>
    %21 = vector.broadcast %1 : vector<1x32xf32> to vector<2x32xf32>
    %22 = arith.mulf %20, %21 : vector<2x32xf32>
    %23 = vector.broadcast %2 : vector<1x32xf32> to vector<2x32xf32>
    %24 = arith.addf %22, %23 : vector<2x32xf32>
    %25 = arith.truncf %24 : vector<2x32xf32> to vector<2x32xbf16>
    %c0_9 = arith.constant 0 : index
    %c0_10 = arith.constant 0 : index
    %26 = vector.load %arg4[%c0_9, %c0_10] : memref<32x32xbf16, #tpu.memory_space<vmem>>, vector<32x32xbf16>
    %cst_11 = arith.constant dense<0.000000e+00> : vector<2x32xf32>
    %27 = tpu.matmul %25, %26, %cst_11 {dimension_numbers = #tpu.dot_dimension_numbers<[1], [0], [0], [1], [0, 0, 1, 1], [], []>} : vector<2x32xbf16>, vector<32x32xbf16>, vector<2x32xf32> -> vector<2x32xf32>
    %28 = arith.mulf %27, %27 : vector<2x32xf32>
    %cst_12 = arith.constant dense<0.000000e+00> : vector<2xf32>
    %29 = vector.multi_reduction <add>, %28, %cst_12 [1] : vector<2x32xf32> to vector<2xf32>
    %30 = vector.shape_cast %29 : vector<2xf32> to vector<2x1xf32>
    %31 = math.sqrt %30 : vector<2x1xf32>
    %cst_13 = arith.constant 9.99999996E-13 : f32
    %32 = vector.broadcast %cst_13 : f32 to vector<2x1xf32>
    %33 = arith.maximumf %31, %32 : vector<2x1xf32>
    %34 = vector.broadcast %33 : vector<2x1xf32> to vector<2x32xf32>
    %35 = arith.divf %27, %34 : vector<2x32xf32>
    %c0_14 = arith.constant 0 : index
    %c0_15 = arith.constant 0 : index
    %36 = vector.load %arg5[%c0_14, %c0_15] : memref<2x32xf32, #tpu.memory_space<vmem>>, vector<2x32xf32>
    tpu.vector_store %arg5[%c0_14, %c0_15], %35 {strides = array<i32>} : memref<2x32xf32, #tpu.memory_space<vmem>>, vector<2x32xf32>,
    return
  }
  func.func @transform_0(%arg0: i32) -> (i32, i32) {
    %c0_i32 = arith.constant 0 : i32
    %c0_i32_0 = arith.constant 0 : i32
    %c0_i32_1 = arith.constant 0 : i32
    return %c0_i32, %c0_i32_0 : i32, i32
  }
  func.func @transform_1(%arg0: i32) -> (i32, i32) {
    %c0_i32 = arith.constant 0 : i32
    %c0_i32_0 = arith.constant 0 : i32
    %c0_i32_1 = arith.constant 0 : i32
    return %c0_i32, %c0_i32_0 : i32, i32
  }
  func.func @transform_2(%arg0: i32) -> (i32, i32) {
    %c0_i32 = arith.constant 0 : i32
    %c0_i32_0 = arith.constant 0 : i32
    %c0_i32_1 = arith.constant 0 : i32
    return %c0_i32, %c0_i32_0 : i32, i32
  }
  func.func @transform_3(%arg0: i32) -> (i32, i32) {
    %c0_i32 = arith.constant 0 : i32
    %c0_i32_0 = arith.constant 0 : i32
    %c0_i32_1 = arith.constant 0 : i32
    return %c0_i32, %c0_i32_0 : i32, i32
  }
  func.func @transform_4(%arg0: i32) -> (i32, i32) {
    %c0_i32 = arith.constant 0 : i32
    %c0_i32_0 = arith.constant 0 : i32
    %c0_i32_1 = arith.constant 0 : i32
    return %c0_i32, %c0_i32_0 : i32, i32
  }
}

module attributes {stable_mosaic.version = 11 : i64} {
  func.func @_block_kernel(%arg0: i32, %arg1: memref<2x8x32xf32, #tpu.memory_space<vmem>>, %arg2: memref<1x8x32xf32, #tpu.memory_space<vmem>>, %arg3: memref<1x32xf32, #tpu.memory_space<vmem>>, %arg4: memref<1x32xf32, #tpu.memory_space<vmem>>, %arg5: memref<1x32xf32, #tpu.memory_space<vmem>>, %arg6: memref<1x32xf32, #tpu.memory_space<vmem>>, %arg7: memref<32x96xbf16, #tpu.memory_space<vmem>>, %arg8: memref<1x96xf32, #tpu.memory_space<vmem>>, %arg9: memref<2x16x32xbf16, #tpu.memory_space<vmem>>, %arg10: memref<1x32xf32, #tpu.memory_space<vmem>>, %arg11: memref<1x32xf32, #tpu.memory_space<vmem>>, %arg12: memref<1x32xf32, #tpu.memory_space<vmem>>, %arg13: memref<32x128xbf16, #tpu.memory_space<vmem>>, %arg14: memref<1x128xf32, #tpu.memory_space<vmem>>, %arg15: memref<128x32xbf16, #tpu.memory_space<vmem>>, %arg16: memref<1x32xf32, #tpu.memory_space<vmem>>, %arg17: memref<2x8x32xf32, #tpu.memory_space<vmem>>) attributes {dimension_semantics = [#tpu.dimension_semantics<arbitrary>], iteration_bounds = array<i64: 1>, scalar_prefetch = 0 : i64, scratch_operands = 0 : i64, tpu.core_type = #tpu.core_type<tc>, window_params = [{pipeline_mode = #tpu.pipeline_mode<synchronous>, transform_indices = @transform_0, window_bounds = array<i64: 2, 8, 32>}, {pipeline_mode = #tpu.pipeline_mode<synchronous>, transform_indices = @transform_1, window_bounds = array<i64: 1, 8, 32>}, {pipeline_mode = #tpu.pipeline_mode<synchronous>, transform_indices = @transform_2, window_bounds = array<i64: 1, 32>}, {pipeline_mode = #tpu.pipeline_mode<synchronous>, transform_indices = @transform_3, window_bounds = array<i64: 1, 32>}, {pipeline_mode = #tpu.pipeline_mode<synchronous>, transform_indices = @transform_4, window_bounds = array<i64: 1, 32>}, {pipeline_mode = #tpu.pipeline_mode<synchronous>, transform_indices = @transform_5, window_bounds = array<i64: 1, 32>}, {pipeline_mode = #tpu.pipeline_mode<synchronous>, transform_indices = @transform_6, window_bounds = array<i64: 32, 96>}, {pipeline_mode = #tpu.pipeline_mode<synchronous>, transform_indices = @transform_7, window_bounds = array<i64: 1, 96>}, {pipeline_mode = #tpu.pipeline_mode<synchronous>, transform_indices = @transform_8, window_bounds = array<i64: 2, 16, 32>}, {pipeline_mode = #tpu.pipeline_mode<synchronous>, transform_indices = @transform_9, window_bounds = array<i64: 1, 32>}, {pipeline_mode = #tpu.pipeline_mode<synchronous>, transform_indices = @transform_10, window_bounds = array<i64: 1, 32>}, {pipeline_mode = #tpu.pipeline_mode<synchronous>, transform_indices = @transform_11, window_bounds = array<i64: 1, 32>}, {pipeline_mode = #tpu.pipeline_mode<synchronous>, transform_indices = @transform_12, window_bounds = array<i64: 32, 128>}, {pipeline_mode = #tpu.pipeline_mode<synchronous>, transform_indices = @transform_13, window_bounds = array<i64: 1, 128>}, {pipeline_mode = #tpu.pipeline_mode<synchronous>, transform_indices = @transform_14, window_bounds = array<i64: 128, 32>}, {pipeline_mode = #tpu.pipeline_mode<synchronous>, transform_indices = @transform_15, window_bounds = array<i64: 1, 32>}, {pipeline_mode = #tpu.pipeline_mode<synchronous>, transform_indices = @transform_16, window_bounds = array<i64: 2, 8, 32>}]} {
    %c0 = arith.constant 0 : index
    %c0_0 = arith.constant 0 : index
    %c0_1 = arith.constant 0 : index
    %0 = vector.load %arg1[%c0, %c0_0, %c0_1] : memref<2x8x32xf32, #tpu.memory_space<vmem>>, vector<2x8x32xf32>
    %c0_2 = arith.constant 0 : index
    %c0_3 = arith.constant 0 : index
    %c0_4 = arith.constant 0 : index
    %1 = vector.load %arg2[%c0_2, %c0_3, %c0_4] : memref<1x8x32xf32, #tpu.memory_space<vmem>>, vector<1x8x32xf32>
    %2 = vector.broadcast %1 : vector<1x8x32xf32> to vector<2x8x32xf32>
    %3 = arith.addf %0, %2 : vector<2x8x32xf32>
    %c0_5 = arith.constant 0 : index
    %c0_6 = arith.constant 0 : index
    %4 = vector.load %arg3[%c0_5, %c0_6] : memref<1x32xf32, #tpu.memory_space<vmem>>, vector<1x32xf32>
    %c0_7 = arith.constant 0 : index
    %c0_8 = arith.constant 0 : index
    %5 = vector.load %arg4[%c0_7, %c0_8] : memref<1x32xf32, #tpu.memory_space<vmem>>, vector<1x32xf32>
    %cst = arith.constant dense<0.000000e+00> : vector<2x8xf32>
    %6 = vector.multi_reduction <add>, %3, %cst [2] : vector<2x8x32xf32> to vector<2x8xf32>
    %7 = vector.shape_cast %6 : vector<2x8xf32> to vector<2x8x1xf32>
    %cst_9 = arith.constant 3.200000e+01 : f32
    %8 = vector.broadcast %cst_9 : f32 to vector<2x8x1xf32>
    %9 = arith.divf %7, %8 : vector<2x8x1xf32>
    %10 = vector.broadcast %9 : vector<2x8x1xf32> to vector<2x8x32xf32>
    %11 = arith.subf %3, %10 : vector<2x8x32xf32>
    %12 = arith.mulf %11, %11 : vector<2x8x32xf32>
    %cst_10 = arith.constant dense<0.000000e+00> : vector<2x8xf32>
    %13 = vector.multi_reduction <add>, %12, %cst_10 [2] : vector<2x8x32xf32> to vector<2x8xf32>
    %14 = vector.shape_cast %13 : vector<2x8xf32> to vector<2x8x1xf32>
    %cst_11 = arith.constant 3.200000e+01 : f32
    %15 = vector.broadcast %cst_11 : f32 to vector<2x8x1xf32>
    %16 = arith.divf %14, %15 : vector<2x8x1xf32>
    %17 = vector.broadcast %9 : vector<2x8x1xf32> to vector<2x8x32xf32>
    %18 = arith.subf %3, %17 : vector<2x8x32xf32>
    %cst_12 = arith.constant 9.99999974E-6 : f32
    %19 = vector.broadcast %cst_12 : f32 to vector<2x8x1xf32>
    %20 = arith.addf %16, %19 : vector<2x8x1xf32>
    %21 = math.rsqrt %20 : vector<2x8x1xf32>
    %22 = vector.broadcast %21 : vector<2x8x1xf32> to vector<2x8x32xf32>
    %23 = arith.mulf %18, %22 : vector<2x8x32xf32>
    %24 = vector.shape_cast %4 : vector<1x32xf32> to vector<1x1x32xf32>
    %25 = vector.broadcast %24 : vector<1x1x32xf32> to vector<2x8x32xf32>
    %26 = arith.mulf %23, %25 : vector<2x8x32xf32>
    %27 = vector.shape_cast %5 : vector<1x32xf32> to vector<1x1x32xf32>
    %28 = vector.broadcast %27 : vector<1x1x32xf32> to vector<2x8x32xf32>
    %29 = arith.addf %26, %28 : vector<2x8x32xf32>
    %30 = vector.shape_cast %29 : vector<2x8x32xf32> to vector<16x32xf32>
    %c0_13 = arith.constant 0 : index
    %c0_14 = arith.constant 0 : index
    %31 = vector.load %arg5[%c0_13, %c0_14] : memref<1x32xf32, #tpu.memory_space<vmem>>, vector<1x32xf32>
    %c0_15 = arith.constant 0 : index
    %c0_16 = arith.constant 0 : index
    %32 = vector.load %arg6[%c0_15, %c0_16] : memref<1x32xf32, #tpu.memory_space<vmem>>, vector<1x32xf32>
    %cst_17 = arith.constant dense<0.000000e+00> : vector<16xf32>
    %33 = vector.multi_reduction <add>, %30, %cst_17 [1] : vector<16x32xf32> to vector<16xf32>
    %34 = vector.shape_cast %33 : vector<16xf32> to vector<16x1xf32>
    %cst_18 = arith.constant 3.200000e+01 : f32
    %35 = vector.broadcast %cst_18 : f32 to vector<16x1xf32>
    %36 = arith.divf %34, %35 : vector<16x1xf32>
    %37 = vector.broadcast %36 : vector<16x1xf32> to vector<16x32xf32>
    %38 = arith.subf %30, %37 : vector<16x32xf32>
    %39 = arith.mulf %38, %38 : vector<16x32xf32>
    %cst_19 = arith.constant dense<0.000000e+00> : vector<16xf32>
    %40 = vector.multi_reduction <add>, %39, %cst_19 [1] : vector<16x32xf32> to vector<16xf32>
    %41 = vector.shape_cast %40 : vector<16xf32> to vector<16x1xf32>
    %cst_20 = arith.constant 3.200000e+01 : f32
    %42 = vector.broadcast %cst_20 : f32 to vector<16x1xf32>
    %43 = arith.divf %41, %42 : vector<16x1xf32>
    %44 = vector.broadcast %36 : vector<16x1xf32> to vector<16x32xf32>
    %45 = arith.subf %30, %44 : vector<16x32xf32>
    %cst_21 = arith.constant 9.99999974E-6 : f32
    %46 = vector.broadcast %cst_21 : f32 to vector<16x1xf32>
    %47 = arith.addf %43, %46 : vector<16x1xf32>
    %48 = math.rsqrt %47 : vector<16x1xf32>
    %49 = vector.broadcast %48 : vector<16x1xf32> to vector<16x32xf32>
    %50 = arith.mulf %45, %49 : vector<16x32xf32>
    %51 = vector.broadcast %31 : vector<1x32xf32> to vector<16x32xf32>
    %52 = arith.mulf %50, %51 : vector<16x32xf32>
    %53 = vector.broadcast %32 : vector<1x32xf32> to vector<16x32xf32>
    %54 = arith.addf %52, %53 : vector<16x32xf32>
    %55 = arith.truncf %54 : vector<16x32xf32> to vector<16x32xbf16>
    %c0_22 = arith.constant 0 : index
    %c0_23 = arith.constant 0 : index
    %56 = vector.load %arg7[%c0_22, %c0_23] : memref<32x96xbf16, #tpu.memory_space<vmem>>, vector<32x96xbf16>
    %cst_24 = arith.constant dense<0.000000e+00> : vector<16x96xf32>
    %57 = tpu.matmul %55, %56, %cst_24 {dimension_numbers = #tpu.dot_dimension_numbers<[1], [0], [0], [1], [0, 0, 1, 1], [], []>} : vector<16x32xbf16>, vector<32x96xbf16>, vector<16x96xf32> -> vector<16x96xf32>
    %c0_25 = arith.constant 0 : index
    %c0_26 = arith.constant 0 : index
    %58 = vector.load %arg8[%c0_25, %c0_26] : memref<1x96xf32, #tpu.memory_space<vmem>>, vector<1x96xf32>
    %59 = vector.broadcast %58 : vector<1x96xf32> to vector<16x96xf32>
    %60 = arith.addf %57, %59 : vector<16x96xf32>
    %61 = vector.extract_strided_slice %60 {offsets = [0, 0], sizes = [16, 16], strides = [1, 1]} : vector<16x96xf32> to vector<16x16xf32>
    %62 = vector.shape_cast %61 : vector<16x16xf32> to vector<2x8x16xf32>
    %63 = vector.extract_strided_slice %60 {offsets = [0, 16], sizes = [16, 16], strides = [1, 1]} : vector<16x96xf32> to vector<16x16xf32>
    %64 = vector.shape_cast %63 : vector<16x16xf32> to vector<2x8x16xf32>
    %65 = tpu.concatenate %62, %64 in 0 : vector<2x8x16xf32>, vector<2x8x16xf32> -> vector<4x8x16xf32>
    %cst_27 = arith.constant 2.500000e-01 : f32
    %66 = vector.broadcast %cst_27 : f32 to vector<4x8x16xf32>
    %67 = arith.mulf %65, %66 : vector<4x8x16xf32>
    %68 = vector.extract_strided_slice %60 {offsets = [0, 32], sizes = [16, 16], strides = [1, 1]} : vector<16x96xf32> to vector<16x16xf32>
    %69 = vector.shape_cast %68 : vector<16x16xf32> to vector<2x8x16xf32>
    %70 = vector.extract_strided_slice %60 {offsets = [0, 48], sizes = [16, 16], strides = [1, 1]} : vector<16x96xf32> to vector<16x16xf32>
    %71 = vector.shape_cast %70 : vector<16x16xf32> to vector<2x8x16xf32>
    %72 = tpu.concatenate %69, %71 in 0 : vector<2x8x16xf32>, vector<2x8x16xf32> -> vector<4x8x16xf32>
    %73 = vector.extract_strided_slice %60 {offsets = [0, 64], sizes = [16, 16], strides = [1, 1]} : vector<16x96xf32> to vector<16x16xf32>
    %74 = vector.shape_cast %73 : vector<16x16xf32> to vector<2x8x16xf32>
    %75 = vector.extract_strided_slice %60 {offsets = [0, 80], sizes = [16, 16], strides = [1, 1]} : vector<16x96xf32> to vector<16x16xf32>
    %76 = vector.shape_cast %75 : vector<16x16xf32> to vector<2x8x16xf32>
    %77 = tpu.concatenate %74, %76 in 0 : vector<2x8x16xf32>, vector<2x8x16xf32> -> vector<4x8x16xf32>
    %78 = arith.truncf %67 : vector<4x8x16xf32> to vector<4x8x16xbf16>
    %79 = arith.truncf %72 : vector<4x8x16xf32> to vector<4x8x16xbf16>
    "tpu.trace_start"() <{level = 10 : i32, message = "nqd,nkd->nqk"}> : () -> ()
    %cst_28 = arith.constant dense<0.000000e+00> : vector<4x8x8xf32>
    %80 = tpu.matmul %78, %79, %cst_28 {dimension_numbers = #tpu.dot_dimension_numbers<[2], [2], [1], [1], [0, 0, 0, 1, 1, 1], [0], [0]>} : vector<4x8x16xbf16>, vector<4x8x16xbf16>, vector<4x8x8xf32> -> vector<4x8x8xf32>
    "tpu.trace_stop"() : () -> ()
    %81 = tpu.iota {dimensions = array<i32: 1>} : vector<8x8xi32>
    %c5_i32 = arith.constant 5 : i32
    %82 = vector.broadcast %c5_i32 : i32 to vector<8x8xi32>
    %83 = arith.cmpi slt, %81, %82 : vector<8x8xi32>
    %84 = vector.shape_cast %83 : vector<8x8xi1> to vector<1x8x8xi1>
    %cst_29 = arith.constant -1.000000e+30 : f32
    %85 = vector.shape_cast %84 : vector<1x8x8xi1> to vector<1x8x8xi1>
    %86 = vector.broadcast %85 : vector<1x8x8xi1> to vector<4x8x8xi1>
    %87 = vector.broadcast %cst_29 : f32 to vector<4x8x8xf32>
    %88 = arith.select %86, %80, %87 : vector<4x8x8xi1>, vector<4x8x8xf32>
    %cst_30 = arith.constant dense<0xFF800000> : vector<4x8xf32>
    %89 = vector.multi_reduction <maximumf>, %88, %cst_30 [2] : vector<4x8x8xf32> to vector<4x8xf32>
    %90 = vector.shape_cast %89 : vector<4x8xf32> to vector<4x8x1xf32>
    %91 = vector.broadcast %90 : vector<4x8x1xf32> to vector<4x8x8xf32>
    %92 = arith.subf %88, %91 : vector<4x8x8xf32>
    %93 = math.exp %92 : vector<4x8x8xf32>
    %cst_31 = arith.constant dense<0.000000e+00> : vector<4x8xf32>
    %94 = vector.multi_reduction <add>, %93, %cst_31 [2] : vector<4x8x8xf32> to vector<4x8xf32>
    %95 = vector.shape_cast %94 : vector<4x8xf32> to vector<4x8x1xf32>
    %96 = arith.truncf %93 : vector<4x8x8xf32> to vector<4x8x8xbf16>
    %97 = arith.truncf %77 : vector<4x8x16xf32> to vector<4x8x16xbf16>
    "tpu.trace_start"() <{level = 10 : i32, message = "nqk,nkd->nqd"}> : () -> ()
    %cst_32 = arith.constant dense<0.000000e+00> : vector<4x8x16xf32>
    %98 = tpu.matmul %96, %97, %cst_32 {dimension_numbers = #tpu.dot_dimension_numbers<[2], [1], [1], [2], [0, 0, 0, 1, 1, 2], [0], [0]>} : vector<4x8x8xbf16>, vector<4x8x16xbf16>, vector<4x8x16xf32> -> vector<4x8x16xf32>
    "tpu.trace_stop"() : () -> ()
    %99 = tpu.reciprocal %95 {approx = true} : vector<4x8x1xf32> -> vector<4x8x1xf32>
    %100 = vector.broadcast %99 : vector<4x8x1xf32> to vector<4x8x16xf32>
    %101 = arith.mulf %98, %100 : vector<4x8x16xf32>
    %102 = vector.shape_cast %101 : vector<4x8x16xf32> to vector<2x16x16xf32>
    %103 = arith.truncf %102 : vector<2x16x16xf32> to vector<2x16x16xbf16>
    %c0_33 = arith.constant 0 : index
    %c0_34 = arith.constant 0 : index
    %c0_35 = arith.constant 0 : index
    %104 = vector.load %arg9[%c0_33, %c0_34, %c0_35] : memref<2x16x32xbf16, #tpu.memory_space<vmem>>, vector<2x16x32xbf16>
    "tpu.trace_start"() <{level = 10 : i32, message = "hnd,hde->hne"}> : () -> ()
    %cst_36 = arith.constant dense<0.000000e+00> : vector<2x16x32xf32>
    %105 = tpu.matmul %103, %104, %cst_36 {dimension_numbers = #tpu.dot_dimension_numbers<[2], [1], [1], [2], [0, 0, 0, 1, 1, 2], [0], [0]>} : vector<2x16x16xbf16>, vector<2x16x32xbf16>, vector<2x16x32xf32> -> vector<2x16x32xf32>
    "tpu.trace_stop"() : () -> ()
    %cst_37 = arith.constant dense<0.000000e+00> : vector<16x32xf32>
    %106 = vector.multi_reduction <add>, %105, %cst_37 [0] : vector<2x16x32xf32> to vector<16x32xf32>
    %107 = arith.addf %30, %106 : vector<16x32xf32>
    %c0_38 = arith.constant 0 : index
    %c0_39 = arith.constant 0 : index
    %108 = vector.load %arg10[%c0_38, %c0_39] : memref<1x32xf32, #tpu.memory_space<vmem>>, vector<1x32xf32>
    %109 = vector.broadcast %108 : vector<1x32xf32> to vector<16x32xf32>
    %110 = arith.addf %107, %109 : vector<16x32xf32>
    %c0_40 = arith.constant 0 : index
    %c0_41 = arith.constant 0 : index
    %111 = vector.load %arg11[%c0_40, %c0_41] : memref<1x32xf32, #tpu.memory_space<vmem>>, vector<1x32xf32>
    %c0_42 = arith.constant 0 : index
    %c0_43 = arith.constant 0 : index
    %112 = vector.load %arg12[%c0_42, %c0_43] : memref<1x32xf32, #tpu.memory_space<vmem>>, vector<1x32xf32>
    %cst_44 = arith.constant dense<0.000000e+00> : vector<16xf32>
    %113 = vector.multi_reduction <add>, %110, %cst_44 [1] : vector<16x32xf32> to vector<16xf32>
    %114 = vector.shape_cast %113 : vector<16xf32> to vector<16x1xf32>
    %cst_45 = arith.constant 3.200000e+01 : f32
    %115 = vector.broadcast %cst_45 : f32 to vector<16x1xf32>
    %116 = arith.divf %114, %115 : vector<16x1xf32>
    %117 = vector.broadcast %116 : vector<16x1xf32> to vector<16x32xf32>
    %118 = arith.subf %110, %117 : vector<16x32xf32>
    %119 = arith.mulf %118, %118 : vector<16x32xf32>
    %cst_46 = arith.constant dense<0.000000e+00> : vector<16xf32>
    %120 = vector.multi_reduction <add>, %119, %cst_46 [1] : vector<16x32xf32> to vector<16xf32>
    %121 = vector.shape_cast %120 : vector<16xf32> to vector<16x1xf32>
    %cst_47 = arith.constant 3.200000e+01 : f32
    %122 = vector.broadcast %cst_47 : f32 to vector<16x1xf32>
    %123 = arith.divf %121, %122 : vector<16x1xf32>
    %124 = vector.broadcast %116 : vector<16x1xf32> to vector<16x32xf32>
    %125 = arith.subf %110, %124 : vector<16x32xf32>
    %cst_48 = arith.constant 9.99999974E-6 : f32
    %126 = vector.broadcast %cst_48 : f32 to vector<16x1xf32>
    %127 = arith.addf %123, %126 : vector<16x1xf32>
    %128 = math.rsqrt %127 : vector<16x1xf32>
    %129 = vector.broadcast %128 : vector<16x1xf32> to vector<16x32xf32>
    %130 = arith.mulf %125, %129 : vector<16x32xf32>
    %131 = vector.broadcast %111 : vector<1x32xf32> to vector<16x32xf32>
    %132 = arith.mulf %130, %131 : vector<16x32xf32>
    %133 = vector.broadcast %112 : vector<1x32xf32> to vector<16x32xf32>
    %134 = arith.addf %132, %133 : vector<16x32xf32>
    %135 = arith.truncf %134 : vector<16x32xf32> to vector<16x32xbf16>
    %c0_49 = arith.constant 0 : index
    %c0_50 = arith.constant 0 : index
    %136 = vector.load %arg13[%c0_49, %c0_50] : memref<32x128xbf16, #tpu.memory_space<vmem>>, vector<32x128xbf16>
    %cst_51 = arith.constant dense<0.000000e+00> : vector<16x128xf32>
    %137 = tpu.matmul %135, %136, %cst_51 {dimension_numbers = #tpu.dot_dimension_numbers<[1], [0], [0], [1], [0, 0, 1, 1], [], []>} : vector<16x32xbf16>, vector<32x128xbf16>, vector<16x128xf32> -> vector<16x128xf32>
    %c0_52 = arith.constant 0 : index
    %c0_53 = arith.constant 0 : index
    %138 = vector.load %arg14[%c0_52, %c0_53] : memref<1x128xf32, #tpu.memory_space<vmem>>, vector<1x128xf32>
    %139 = vector.broadcast %138 : vector<1x128xf32> to vector<16x128xf32>
    %140 = arith.addf %137, %139 : vector<16x128xf32>
    %cst_54 = arith.constant 5.000000e-01 : f32
    %141 = vector.broadcast %cst_54 : f32 to vector<16x128xf32>
    %142 = arith.mulf %141, %140 : vector<16x128xf32>
    %cst_55 = arith.constant 0.707106769 : f32
    %143 = vector.broadcast %cst_55 : f32 to vector<16x128xf32>
    %144 = arith.mulf %140, %143 : vector<16x128xf32>
    %145 = math.erf %144 : vector<16x128xf32>
    %cst_56 = arith.constant 1.000000e+00 : f32
    %146 = vector.broadcast %cst_56 : f32 to vector<16x128xf32>
    %147 = arith.addf %146, %145 : vector<16x128xf32>
    %148 = arith.mulf %142, %147 : vector<16x128xf32>
    %149 = arith.truncf %148 : vector<16x128xf32> to vector<16x128xbf16>
    %c0_57 = arith.constant 0 : index
    %c0_58 = arith.constant 0 : index
    %150 = vector.load %arg15[%c0_57, %c0_58] : memref<128x32xbf16, #tpu.memory_space<vmem>>, vector<128x32xbf16>
    %cst_59 = arith.constant dense<0.000000e+00> : vector<16x32xf32>
    %151 = tpu.matmul %149, %150, %cst_59 {dimension_numbers = #tpu.dot_dimension_numbers<[1], [0], [0], [1], [0, 0, 1, 1], [], []>} : vector<16x128xbf16>, vector<128x32xbf16>, vector<16x32xf32> -> vector<16x32xf32>
    %152 = arith.addf %110, %151 : vector<16x32xf32>
    %c0_60 = arith.constant 0 : index
    %c0_61 = arith.constant 0 : index
    %153 = vector.load %arg16[%c0_60, %c0_61] : memref<1x32xf32, #tpu.memory_space<vmem>>, vector<1x32xf32>
    %154 = vector.broadcast %153 : vector<1x32xf32> to vector<16x32xf32>
    %155 = arith.addf %152, %154 : vector<16x32xf32>
    %156 = vector.shape_cast %155 : vector<16x32xf32> to vector<2x8x32xf32>
    %c0_62 = arith.constant 0 : index
    %c0_63 = arith.constant 0 : index
    %c0_64 = arith.constant 0 : index
    %157 = vector.load %arg17[%c0_62, %c0_63, %c0_64] : memref<2x8x32xf32, #tpu.memory_space<vmem>>, vector<2x8x32xf32>
    tpu.vector_store %arg17[%c0_62, %c0_63, %c0_64], %156 {strides = array<i32>} : memref<2x8x32xf32, #tpu.memory_space<vmem>>, vector<2x8x32xf32>,
    return
  }
  func.func @transform_0(%arg0: i32) -> (i32, i32, i32) {
    %c0_i32 = arith.constant 0 : i32
    %c0_i32_0 = arith.constant 0 : i32
    %c0_i32_1 = arith.constant 0 : i32
    %c0_i32_2 = arith.constant 0 : i32
    return %c0_i32, %c0_i32_0, %c0_i32_1 : i32, i32, i32
  }
  func.func @transform_1(%arg0: i32) -> (i32, i32, i32) {
    %c0_i32 = arith.constant 0 : i32
    %c0_i32_0 = arith.constant 0 : i32
    %c0_i32_1 = arith.constant 0 : i32
    %c0_i32_2 = arith.constant 0 : i32
    return %c0_i32, %c0_i32_0, %c0_i32_1 : i32, i32, i32
  }
  func.func @transform_2(%arg0: i32) -> (i32, i32) {
    %c0_i32 = arith.constant 0 : i32
    %c0_i32_0 = arith.constant 0 : i32
    %c0_i32_1 = arith.constant 0 : i32
    return %c0_i32, %c0_i32_0 : i32, i32
  }
  func.func @transform_3(%arg0: i32) -> (i32, i32) {
    %c0_i32 = arith.constant 0 : i32
    %c0_i32_0 = arith.constant 0 : i32
    %c0_i32_1 = arith.constant 0 : i32
    return %c0_i32, %c0_i32_0 : i32, i32
  }
  func.func @transform_4(%arg0: i32) -> (i32, i32) {
    %c0_i32 = arith.constant 0 : i32
    %c0_i32_0 = arith.constant 0 : i32
    %c0_i32_1 = arith.constant 0 : i32
    return %c0_i32, %c0_i32_0 : i32, i32
  }
  func.func @transform_5(%arg0: i32) -> (i32, i32) {
    %c0_i32 = arith.constant 0 : i32
    %c0_i32_0 = arith.constant 0 : i32
    %c0_i32_1 = arith.constant 0 : i32
    return %c0_i32, %c0_i32_0 : i32, i32
  }
  func.func @transform_6(%arg0: i32) -> (i32, i32) {
    %c0_i32 = arith.constant 0 : i32
    %c0_i32_0 = arith.constant 0 : i32
    %c0_i32_1 = arith.constant 0 : i32
    return %c0_i32, %c0_i32_0 : i32, i32
  }
  func.func @transform_7(%arg0: i32) -> (i32, i32) {
    %c0_i32 = arith.constant 0 : i32
    %c0_i32_0 = arith.constant 0 : i32
    %c0_i32_1 = arith.constant 0 : i32
    return %c0_i32, %c0_i32_0 : i32, i32
  }
  func.func @transform_8(%arg0: i32) -> (i32, i32, i32) {
    %c0_i32 = arith.constant 0 : i32
    %c0_i32_0 = arith.constant 0 : i32
    %c0_i32_1 = arith.constant 0 : i32
    %c0_i32_2 = arith.constant 0 : i32
    return %c0_i32, %c0_i32_0, %c0_i32_1 : i32, i32, i32
  }
  func.func @transform_9(%arg0: i32) -> (i32, i32) {
    %c0_i32 = arith.constant 0 : i32
    %c0_i32_0 = arith.constant 0 : i32
    %c0_i32_1 = arith.constant 0 : i32
    return %c0_i32, %c0_i32_0 : i32, i32
  }
  func.func @transform_10(%arg0: i32) -> (i32, i32) {
    %c0_i32 = arith.constant 0 : i32
    %c0_i32_0 = arith.constant 0 : i32
    %c0_i32_1 = arith.constant 0 : i32
    return %c0_i32, %c0_i32_0 : i32, i32
  }
  func.func @transform_11(%arg0: i32) -> (i32, i32) {
    %c0_i32 = arith.constant 0 : i32
    %c0_i32_0 = arith.constant 0 : i32
    %c0_i32_1 = arith.constant 0 : i32
    return %c0_i32, %c0_i32_0 : i32, i32
  }
  func.func @transform_12(%arg0: i32) -> (i32, i32) {
    %c0_i32 = arith.constant 0 : i32
    %c0_i32_0 = arith.constant 0 : i32
    %c0_i32_1 = arith.constant 0 : i32
    return %c0_i32, %c0_i32_0 : i32, i32
  }
  func.func @transform_13(%arg0: i32) -> (i32, i32) {
    %c0_i32 = arith.constant 0 : i32
    %c0_i32_0 = arith.constant 0 : i32
    %c0_i32_1 = arith.constant 0 : i32
    return %c0_i32, %c0_i32_0 : i32, i32
  }
  func.func @transform_14(%arg0: i32) -> (i32, i32) {
    %c0_i32 = arith.constant 0 : i32
    %c0_i32_0 = arith.constant 0 : i32
    %c0_i32_1 = arith.constant 0 : i32
    return %c0_i32, %c0_i32_0 : i32, i32
  }
  func.func @transform_15(%arg0: i32) -> (i32, i32) {
    %c0_i32 = arith.constant 0 : i32
    %c0_i32_0 = arith.constant 0 : i32
    %c0_i32_1 = arith.constant 0 : i32
    return %c0_i32, %c0_i32_0 : i32, i32
  }
  func.func @transform_16(%arg0: i32) -> (i32, i32, i32) {
    %c0_i32 = arith.constant 0 : i32
    %c0_i32_0 = arith.constant 0 : i32
    %c0_i32_1 = arith.constant 0 : i32
    %c0_i32_2 = arith.constant 0 : i32
    return %c0_i32, %c0_i32_0, %c0_i32_1 : i32, i32, i32
  }
}

module attributes {stable_mosaic.version = 11 : i64} {
  func.func @_block_kernel(%arg0: i32, %arg1: memref<2x8x32xf32, #tpu.memory_space<vmem>>, %arg2: memref<1x32xf32, #tpu.memory_space<vmem>>, %arg3: memref<1x32xf32, #tpu.memory_space<vmem>>, %arg4: memref<32x96xbf16, #tpu.memory_space<vmem>>, %arg5: memref<1x96xf32, #tpu.memory_space<vmem>>, %arg6: memref<2x16x32xbf16, #tpu.memory_space<vmem>>, %arg7: memref<1x32xf32, #tpu.memory_space<vmem>>, %arg8: memref<1x32xf32, #tpu.memory_space<vmem>>, %arg9: memref<1x32xf32, #tpu.memory_space<vmem>>, %arg10: memref<32x128xbf16, #tpu.memory_space<vmem>>, %arg11: memref<1x128xf32, #tpu.memory_space<vmem>>, %arg12: memref<128x32xbf16, #tpu.memory_space<vmem>>, %arg13: memref<1x32xf32, #tpu.memory_space<vmem>>, %arg14: memref<2x8x32xf32, #tpu.memory_space<vmem>>) attributes {dimension_semantics = [#tpu.dimension_semantics<arbitrary>], iteration_bounds = array<i64: 1>, scalar_prefetch = 0 : i64, scratch_operands = 0 : i64, tpu.core_type = #tpu.core_type<tc>, window_params = [{pipeline_mode = #tpu.pipeline_mode<synchronous>, transform_indices = @transform_0, window_bounds = array<i64: 2, 8, 32>}, {pipeline_mode = #tpu.pipeline_mode<synchronous>, transform_indices = @transform_1, window_bounds = array<i64: 1, 32>}, {pipeline_mode = #tpu.pipeline_mode<synchronous>, transform_indices = @transform_2, window_bounds = array<i64: 1, 32>}, {pipeline_mode = #tpu.pipeline_mode<synchronous>, transform_indices = @transform_3, window_bounds = array<i64: 32, 96>}, {pipeline_mode = #tpu.pipeline_mode<synchronous>, transform_indices = @transform_4, window_bounds = array<i64: 1, 96>}, {pipeline_mode = #tpu.pipeline_mode<synchronous>, transform_indices = @transform_5, window_bounds = array<i64: 2, 16, 32>}, {pipeline_mode = #tpu.pipeline_mode<synchronous>, transform_indices = @transform_6, window_bounds = array<i64: 1, 32>}, {pipeline_mode = #tpu.pipeline_mode<synchronous>, transform_indices = @transform_7, window_bounds = array<i64: 1, 32>}, {pipeline_mode = #tpu.pipeline_mode<synchronous>, transform_indices = @transform_8, window_bounds = array<i64: 1, 32>}, {pipeline_mode = #tpu.pipeline_mode<synchronous>, transform_indices = @transform_9, window_bounds = array<i64: 32, 128>}, {pipeline_mode = #tpu.pipeline_mode<synchronous>, transform_indices = @transform_10, window_bounds = array<i64: 1, 128>}, {pipeline_mode = #tpu.pipeline_mode<synchronous>, transform_indices = @transform_11, window_bounds = array<i64: 128, 32>}, {pipeline_mode = #tpu.pipeline_mode<synchronous>, transform_indices = @transform_12, window_bounds = array<i64: 1, 32>}, {pipeline_mode = #tpu.pipeline_mode<synchronous>, transform_indices = @transform_13, window_bounds = array<i64: 2, 8, 32>}]} {
    %c0 = arith.constant 0 : index
    %c0_0 = arith.constant 0 : index
    %c0_1 = arith.constant 0 : index
    %0 = vector.load %arg1[%c0, %c0_0, %c0_1] : memref<2x8x32xf32, #tpu.memory_space<vmem>>, vector<2x8x32xf32>
    %1 = vector.shape_cast %0 : vector<2x8x32xf32> to vector<16x32xf32>
    %c0_2 = arith.constant 0 : index
    %c0_3 = arith.constant 0 : index
    %2 = vector.load %arg2[%c0_2, %c0_3] : memref<1x32xf32, #tpu.memory_space<vmem>>, vector<1x32xf32>
    %c0_4 = arith.constant 0 : index
    %c0_5 = arith.constant 0 : index
    %3 = vector.load %arg3[%c0_4, %c0_5] : memref<1x32xf32, #tpu.memory_space<vmem>>, vector<1x32xf32>
    %cst = arith.constant dense<0.000000e+00> : vector<16xf32>
    %4 = vector.multi_reduction <add>, %1, %cst [1] : vector<16x32xf32> to vector<16xf32>
    %5 = vector.shape_cast %4 : vector<16xf32> to vector<16x1xf32>
    %cst_6 = arith.constant 3.200000e+01 : f32
    %6 = vector.broadcast %cst_6 : f32 to vector<16x1xf32>
    %7 = arith.divf %5, %6 : vector<16x1xf32>
    %8 = vector.broadcast %7 : vector<16x1xf32> to vector<16x32xf32>
    %9 = arith.subf %1, %8 : vector<16x32xf32>
    %10 = arith.mulf %9, %9 : vector<16x32xf32>
    %cst_7 = arith.constant dense<0.000000e+00> : vector<16xf32>
    %11 = vector.multi_reduction <add>, %10, %cst_7 [1] : vector<16x32xf32> to vector<16xf32>
    %12 = vector.shape_cast %11 : vector<16xf32> to vector<16x1xf32>
    %cst_8 = arith.constant 3.200000e+01 : f32
    %13 = vector.broadcast %cst_8 : f32 to vector<16x1xf32>
    %14 = arith.divf %12, %13 : vector<16x1xf32>
    %15 = vector.broadcast %7 : vector<16x1xf32> to vector<16x32xf32>
    %16 = arith.subf %1, %15 : vector<16x32xf32>
    %cst_9 = arith.constant 9.99999974E-6 : f32
    %17 = vector.broadcast %cst_9 : f32 to vector<16x1xf32>
    %18 = arith.addf %14, %17 : vector<16x1xf32>
    %19 = math.rsqrt %18 : vector<16x1xf32>
    %20 = vector.broadcast %19 : vector<16x1xf32> to vector<16x32xf32>
    %21 = arith.mulf %16, %20 : vector<16x32xf32>
    %22 = vector.broadcast %2 : vector<1x32xf32> to vector<16x32xf32>
    %23 = arith.mulf %21, %22 : vector<16x32xf32>
    %24 = vector.broadcast %3 : vector<1x32xf32> to vector<16x32xf32>
    %25 = arith.addf %23, %24 : vector<16x32xf32>
    %26 = arith.truncf %25 : vector<16x32xf32> to vector<16x32xbf16>
    %c0_10 = arith.constant 0 : index
    %c0_11 = arith.constant 0 : index
    %27 = vector.load %arg4[%c0_10, %c0_11] : memref<32x96xbf16, #tpu.memory_space<vmem>>, vector<32x96xbf16>
    %cst_12 = arith.constant dense<0.000000e+00> : vector<16x96xf32>
    %28 = tpu.matmul %26, %27, %cst_12 {dimension_numbers = #tpu.dot_dimension_numbers<[1], [0], [0], [1], [0, 0, 1, 1], [], []>} : vector<16x32xbf16>, vector<32x96xbf16>, vector<16x96xf32> -> vector<16x96xf32>
    %c0_13 = arith.constant 0 : index
    %c0_14 = arith.constant 0 : index
    %29 = vector.load %arg5[%c0_13, %c0_14] : memref<1x96xf32, #tpu.memory_space<vmem>>, vector<1x96xf32>
    %30 = vector.broadcast %29 : vector<1x96xf32> to vector<16x96xf32>
    %31 = arith.addf %28, %30 : vector<16x96xf32>
    %32 = vector.extract_strided_slice %31 {offsets = [0, 0], sizes = [16, 16], strides = [1, 1]} : vector<16x96xf32> to vector<16x16xf32>
    %33 = vector.shape_cast %32 : vector<16x16xf32> to vector<2x8x16xf32>
    %34 = vector.extract_strided_slice %31 {offsets = [0, 16], sizes = [16, 16], strides = [1, 1]} : vector<16x96xf32> to vector<16x16xf32>
    %35 = vector.shape_cast %34 : vector<16x16xf32> to vector<2x8x16xf32>
    %36 = tpu.concatenate %33, %35 in 0 : vector<2x8x16xf32>, vector<2x8x16xf32> -> vector<4x8x16xf32>
    %cst_15 = arith.constant 2.500000e-01 : f32
    %37 = vector.broadcast %cst_15 : f32 to vector<4x8x16xf32>
    %38 = arith.mulf %36, %37 : vector<4x8x16xf32>
    %39 = vector.extract_strided_slice %31 {offsets = [0, 32], sizes = [16, 16], strides = [1, 1]} : vector<16x96xf32> to vector<16x16xf32>
    %40 = vector.shape_cast %39 : vector<16x16xf32> to vector<2x8x16xf32>
    %41 = vector.extract_strided_slice %31 {offsets = [0, 48], sizes = [16, 16], strides = [1, 1]} : vector<16x96xf32> to vector<16x16xf32>
    %42 = vector.shape_cast %41 : vector<16x16xf32> to vector<2x8x16xf32>
    %43 = tpu.concatenate %40, %42 in 0 : vector<2x8x16xf32>, vector<2x8x16xf32> -> vector<4x8x16xf32>
    %44 = vector.extract_strided_slice %31 {offsets = [0, 64], sizes = [16, 16], strides = [1, 1]} : vector<16x96xf32> to vector<16x16xf32>
    %45 = vector.shape_cast %44 : vector<16x16xf32> to vector<2x8x16xf32>
    %46 = vector.extract_strided_slice %31 {offsets = [0, 80], sizes = [16, 16], strides = [1, 1]} : vector<16x96xf32> to vector<16x16xf32>
    %47 = vector.shape_cast %46 : vector<16x16xf32> to vector<2x8x16xf32>
    %48 = tpu.concatenate %45, %47 in 0 : vector<2x8x16xf32>, vector<2x8x16xf32> -> vector<4x8x16xf32>
    %49 = arith.truncf %38 : vector<4x8x16xf32> to vector<4x8x16xbf16>
    %50 = arith.truncf %43 : vector<4x8x16xf32> to vector<4x8x16xbf16>
    "tpu.trace_start"() <{level = 10 : i32, message = "nqd,nkd->nqk"}> : () -> ()
    %cst_16 = arith.constant dense<0.000000e+00> : vector<4x8x8xf32>
    %51 = tpu.matmul %49, %50, %cst_16 {dimension_numbers = #tpu.dot_dimension_numbers<[2], [2], [1], [1], [0, 0, 0, 1, 1, 1], [0], [0]>} : vector<4x8x16xbf16>, vector<4x8x16xbf16>, vector<4x8x8xf32> -> vector<4x8x8xf32>
    "tpu.trace_stop"() : () -> ()
    %52 = tpu.iota {dimensions = array<i32: 1>} : vector<8x8xi32>
    %c8_i32 = arith.constant 8 : i32
    %53 = vector.broadcast %c8_i32 : i32 to vector<8x8xi32>
    %54 = arith.cmpi slt, %52, %53 : vector<8x8xi32>
    %55 = tpu.iota {dimensions = array<i32: 0>} : vector<8x8xi32>
    %56 = arith.cmpi sle, %52, %55 : vector<8x8xi32>
    %57 = arith.andi %54, %56 : vector<8x8xi1>
    %58 = vector.shape_cast %57 : vector<8x8xi1> to vector<1x8x8xi1>
    %cst_17 = arith.constant -1.000000e+30 : f32
    %59 = vector.shape_cast %58 : vector<1x8x8xi1> to vector<1x8x8xi1>
    %60 = vector.broadcast %59 : vector<1x8x8xi1> to vector<4x8x8xi1>
    %61 = vector.broadcast %cst_17 : f32 to vector<4x8x8xf32>
    %62 = arith.select %60, %51, %61 : vector<4x8x8xi1>, vector<4x8x8xf32>
    %cst_18 = arith.constant dense<0xFF800000> : vector<4x8xf32>
    %63 = vector.multi_reduction <maximumf>, %62, %cst_18 [2] : vector<4x8x8xf32> to vector<4x8xf32>
    %64 = vector.shape_cast %63 : vector<4x8xf32> to vector<4x8x1xf32>
    %65 = vector.broadcast %64 : vector<4x8x1xf32> to vector<4x8x8xf32>
    %66 = arith.subf %62, %65 : vector<4x8x8xf32>
    %67 = math.exp %66 : vector<4x8x8xf32>
    %cst_19 = arith.constant dense<0.000000e+00> : vector<4x8xf32>
    %68 = vector.multi_reduction <add>, %67, %cst_19 [2] : vector<4x8x8xf32> to vector<4x8xf32>
    %69 = vector.shape_cast %68 : vector<4x8xf32> to vector<4x8x1xf32>
    %70 = arith.truncf %67 : vector<4x8x8xf32> to vector<4x8x8xbf16>
    %71 = arith.truncf %48 : vector<4x8x16xf32> to vector<4x8x16xbf16>
    "tpu.trace_start"() <{level = 10 : i32, message = "nqk,nkd->nqd"}> : () -> ()
    %cst_20 = arith.constant dense<0.000000e+00> : vector<4x8x16xf32>
    %72 = tpu.matmul %70, %71, %cst_20 {dimension_numbers = #tpu.dot_dimension_numbers<[2], [1], [1], [2], [0, 0, 0, 1, 1, 2], [0], [0]>} : vector<4x8x8xbf16>, vector<4x8x16xbf16>, vector<4x8x16xf32> -> vector<4x8x16xf32>
    "tpu.trace_stop"() : () -> ()
    %73 = tpu.reciprocal %69 {approx = true} : vector<4x8x1xf32> -> vector<4x8x1xf32>
    %74 = vector.broadcast %73 : vector<4x8x1xf32> to vector<4x8x16xf32>
    %75 = arith.mulf %72, %74 : vector<4x8x16xf32>
    %76 = vector.shape_cast %75 : vector<4x8x16xf32> to vector<2x16x16xf32>
    %77 = arith.truncf %76 : vector<2x16x16xf32> to vector<2x16x16xbf16>
    %c0_21 = arith.constant 0 : index
    %c0_22 = arith.constant 0 : index
    %c0_23 = arith.constant 0 : index
    %78 = vector.load %arg6[%c0_21, %c0_22, %c0_23] : memref<2x16x32xbf16, #tpu.memory_space<vmem>>, vector<2x16x32xbf16>
    "tpu.trace_start"() <{level = 10 : i32, message = "hnd,hde->hne"}> : () -> ()
    %cst_24 = arith.constant dense<0.000000e+00> : vector<2x16x32xf32>
    %79 = tpu.matmul %77, %78, %cst_24 {dimension_numbers = #tpu.dot_dimension_numbers<[2], [1], [1], [2], [0, 0, 0, 1, 1, 2], [0], [0]>} : vector<2x16x16xbf16>, vector<2x16x32xbf16>, vector<2x16x32xf32> -> vector<2x16x32xf32>
    "tpu.trace_stop"() : () -> ()
    %cst_25 = arith.constant dense<0.000000e+00> : vector<16x32xf32>
    %80 = vector.multi_reduction <add>, %79, %cst_25 [0] : vector<2x16x32xf32> to vector<16x32xf32>
    %81 = arith.addf %1, %80 : vector<16x32xf32>
    %c0_26 = arith.constant 0 : index
    %c0_27 = arith.constant 0 : index
    %82 = vector.load %arg7[%c0_26, %c0_27] : memref<1x32xf32, #tpu.memory_space<vmem>>, vector<1x32xf32>
    %83 = vector.broadcast %82 : vector<1x32xf32> to vector<16x32xf32>
    %84 = arith.addf %81, %83 : vector<16x32xf32>
    %c0_28 = arith.constant 0 : index
    %c0_29 = arith.constant 0 : index
    %85 = vector.load %arg8[%c0_28, %c0_29] : memref<1x32xf32, #tpu.memory_space<vmem>>, vector<1x32xf32>
    %c0_30 = arith.constant 0 : index
    %c0_31 = arith.constant 0 : index
    %86 = vector.load %arg9[%c0_30, %c0_31] : memref<1x32xf32, #tpu.memory_space<vmem>>, vector<1x32xf32>
    %cst_32 = arith.constant dense<0.000000e+00> : vector<16xf32>
    %87 = vector.multi_reduction <add>, %84, %cst_32 [1] : vector<16x32xf32> to vector<16xf32>
    %88 = vector.shape_cast %87 : vector<16xf32> to vector<16x1xf32>
    %cst_33 = arith.constant 3.200000e+01 : f32
    %89 = vector.broadcast %cst_33 : f32 to vector<16x1xf32>
    %90 = arith.divf %88, %89 : vector<16x1xf32>
    %91 = vector.broadcast %90 : vector<16x1xf32> to vector<16x32xf32>
    %92 = arith.subf %84, %91 : vector<16x32xf32>
    %93 = arith.mulf %92, %92 : vector<16x32xf32>
    %cst_34 = arith.constant dense<0.000000e+00> : vector<16xf32>
    %94 = vector.multi_reduction <add>, %93, %cst_34 [1] : vector<16x32xf32> to vector<16xf32>
    %95 = vector.shape_cast %94 : vector<16xf32> to vector<16x1xf32>
    %cst_35 = arith.constant 3.200000e+01 : f32
    %96 = vector.broadcast %cst_35 : f32 to vector<16x1xf32>
    %97 = arith.divf %95, %96 : vector<16x1xf32>
    %98 = vector.broadcast %90 : vector<16x1xf32> to vector<16x32xf32>
    %99 = arith.subf %84, %98 : vector<16x32xf32>
    %cst_36 = arith.constant 9.99999974E-6 : f32
    %100 = vector.broadcast %cst_36 : f32 to vector<16x1xf32>
    %101 = arith.addf %97, %100 : vector<16x1xf32>
    %102 = math.rsqrt %101 : vector<16x1xf32>
    %103 = vector.broadcast %102 : vector<16x1xf32> to vector<16x32xf32>
    %104 = arith.mulf %99, %103 : vector<16x32xf32>
    %105 = vector.broadcast %85 : vector<1x32xf32> to vector<16x32xf32>
    %106 = arith.mulf %104, %105 : vector<16x32xf32>
    %107 = vector.broadcast %86 : vector<1x32xf32> to vector<16x32xf32>
    %108 = arith.addf %106, %107 : vector<16x32xf32>
    %109 = arith.truncf %108 : vector<16x32xf32> to vector<16x32xbf16>
    %c0_37 = arith.constant 0 : index
    %c0_38 = arith.constant 0 : index
    %110 = vector.load %arg10[%c0_37, %c0_38] : memref<32x128xbf16, #tpu.memory_space<vmem>>, vector<32x128xbf16>
    %cst_39 = arith.constant dense<0.000000e+00> : vector<16x128xf32>
    %111 = tpu.matmul %109, %110, %cst_39 {dimension_numbers = #tpu.dot_dimension_numbers<[1], [0], [0], [1], [0, 0, 1, 1], [], []>} : vector<16x32xbf16>, vector<32x128xbf16>, vector<16x128xf32> -> vector<16x128xf32>
    %c0_40 = arith.constant 0 : index
    %c0_41 = arith.constant 0 : index
    %112 = vector.load %arg11[%c0_40, %c0_41] : memref<1x128xf32, #tpu.memory_space<vmem>>, vector<1x128xf32>
    %113 = vector.broadcast %112 : vector<1x128xf32> to vector<16x128xf32>
    %114 = arith.addf %111, %113 : vector<16x128xf32>
    %cst_42 = arith.constant 5.000000e-01 : f32
    %115 = vector.broadcast %cst_42 : f32 to vector<16x128xf32>
    %116 = arith.mulf %115, %114 : vector<16x128xf32>
    %cst_43 = arith.constant 0.707106769 : f32
    %117 = vector.broadcast %cst_43 : f32 to vector<16x128xf32>
    %118 = arith.mulf %114, %117 : vector<16x128xf32>
    %119 = math.erf %118 : vector<16x128xf32>
    %cst_44 = arith.constant 1.000000e+00 : f32
    %120 = vector.broadcast %cst_44 : f32 to vector<16x128xf32>
    %121 = arith.addf %120, %119 : vector<16x128xf32>
    %122 = arith.mulf %116, %121 : vector<16x128xf32>
    %123 = arith.truncf %122 : vector<16x128xf32> to vector<16x128xbf16>
    %c0_45 = arith.constant 0 : index
    %c0_46 = arith.constant 0 : index
    %124 = vector.load %arg12[%c0_45, %c0_46] : memref<128x32xbf16, #tpu.memory_space<vmem>>, vector<128x32xbf16>
    %cst_47 = arith.constant dense<0.000000e+00> : vector<16x32xf32>
    %125 = tpu.matmul %123, %124, %cst_47 {dimension_numbers = #tpu.dot_dimension_numbers<[1], [0], [0], [1], [0, 0, 1, 1], [], []>} : vector<16x128xbf16>, vector<128x32xbf16>, vector<16x32xf32> -> vector<16x32xf32>
    %126 = arith.addf %84, %125 : vector<16x32xf32>
    %c0_48 = arith.constant 0 : index
    %c0_49 = arith.constant 0 : index
    %127 = vector.load %arg13[%c0_48, %c0_49] : memref<1x32xf32, #tpu.memory_space<vmem>>, vector<1x32xf32>
    %128 = vector.broadcast %127 : vector<1x32xf32> to vector<16x32xf32>
    %129 = arith.addf %126, %128 : vector<16x32xf32>
    %130 = vector.shape_cast %129 : vector<16x32xf32> to vector<2x8x32xf32>
    %c0_50 = arith.constant 0 : index
    %c0_51 = arith.constant 0 : index
    %c0_52 = arith.constant 0 : index
    %131 = vector.load %arg14[%c0_50, %c0_51, %c0_52] : memref<2x8x32xf32, #tpu.memory_space<vmem>>, vector<2x8x32xf32>
    tpu.vector_store %arg14[%c0_50, %c0_51, %c0_52], %130 {strides = array<i32>} : memref<2x8x32xf32, #tpu.memory_space<vmem>>, vector<2x8x32xf32>,
    return
  }
  func.func @transform_0(%arg0: i32) -> (i32, i32, i32) {
    %c0_i32 = arith.constant 0 : i32
    %c0_i32_0 = arith.constant 0 : i32
    %c0_i32_1 = arith.constant 0 : i32
    %c0_i32_2 = arith.constant 0 : i32
    return %c0_i32, %c0_i32_0, %c0_i32_1 : i32, i32, i32
  }
  func.func @transform_1(%arg0: i32) -> (i32, i32) {
    %c0_i32 = arith.constant 0 : i32
    %c0_i32_0 = arith.constant 0 : i32
    %c0_i32_1 = arith.constant 0 : i32
    return %c0_i32, %c0_i32_0 : i32, i32
  }
  func.func @transform_2(%arg0: i32) -> (i32, i32) {
    %c0_i32 = arith.constant 0 : i32
    %c0_i32_0 = arith.constant 0 : i32
    %c0_i32_1 = arith.constant 0 : i32
    return %c0_i32, %c0_i32_0 : i32, i32
  }
  func.func @transform_3(%arg0: i32) -> (i32, i32) {
    %c0_i32 = arith.constant 0 : i32
    %c0_i32_0 = arith.constant 0 : i32
    %c0_i32_1 = arith.constant 0 : i32
    return %c0_i32, %c0_i32_0 : i32, i32
  }
  func.func @transform_4(%arg0: i32) -> (i32, i32) {
    %c0_i32 = arith.constant 0 : i32
    %c0_i32_0 = arith.constant 0 : i32
    %c0_i32_1 = arith.constant 0 : i32
    return %c0_i32, %c0_i32_0 : i32, i32
  }
  func.func @transform_5(%arg0: i32) -> (i32, i32, i32) {
    %c0_i32 = arith.constant 0 : i32
    %c0_i32_0 = arith.constant 0 : i32
    %c0_i32_1 = arith.constant 0 : i32
    %c0_i32_2 = arith.constant 0 : i32
    return %c0_i32, %c0_i32_0, %c0_i32_1 : i32, i32, i32
  }
  func.func @transform_6(%arg0: i32) -> (i32, i32) {
    %c0_i32 = arith.constant 0 : i32
    %c0_i32_0 = arith.constant 0 : i32
    %c0_i32_1 = arith.constant 0 : i32
    return %c0_i32, %c0_i32_0 : i32, i32
  }
  func.func @transform_7(%arg0: i32) -> (i32, i32) {
    %c0_i32 = arith.constant 0 : i32
    %c0_i32_0 = arith.constant 0 : i32
    %c0_i32_1 = arith.constant 0 : i32
    return %c0_i32, %c0_i32_0 : i32, i32
  }
  func.func @transform_8(%arg0: i32) -> (i32, i32) {
    %c0_i32 = arith.constant 0 : i32
    %c0_i32_0 = arith.constant 0 : i32
    %c0_i32_1 = arith.constant 0 : i32
    return %c0_i32, %c0_i32_0 : i32, i32
  }
  func.func @transform_9(%arg0: i32) -> (i32, i32) {
    %c0_i32 = arith.constant 0 : i32
    %c0_i32_0 = arith.constant 0 : i32
    %c0_i32_1 = arith.constant 0 : i32
    return %c0_i32, %c0_i32_0 : i32, i32
  }
  func.func @transform_10(%arg0: i32) -> (i32, i32) {
    %c0_i32 = arith.constant 0 : i32
    %c0_i32_0 = arith.constant 0 : i32
    %c0_i32_1 = arith.constant 0 : i32
    return %c0_i32, %c0_i32_0 : i32, i32
  }
  func.func @transform_11(%arg0: i32) -> (i32, i32) {
    %c0_i32 = arith.constant 0 : i32
    %c0_i32_0 = arith.constant 0 : i32
    %c0_i32_1 = arith.constant 0 : i32
    return %c0_i32, %c0_i32_0 : i32, i32
  }
  func.func @transform_12(%arg0: i32) -> (i32, i32) {
    %c0_i32 = arith.constant 0 : i32
    %c0_i32_0 = arith.constant 0 : i32
    %c0_i32_1 = arith.constant 0 : i32
    return %c0_i32, %c0_i32_0 : i32, i32
  }
  func.func @transform_13(%arg0: i32) -> (i32, i32, i32) {
    %c0_i32 = arith.constant 0 : i32
    %c0_i32_0 = arith.constant 0 : i32
    %c0_i32_1 = arith.constant 0 : i32
    %c0_i32_2 = arith.constant 0 : i32
    return %c0_i32, %c0_i32_0, %c0_i32_1 : i32, i32, i32
  }
}

</mosaic_0001>

<bundles_post_ra>
// kernel: clip_forward.10
= control target key start
LH: loop header
LB: loop body
LE: loop exit
PB: predicated region body
PF: predicated region fallthrough
CT: control target
= control target key end

     0   :  { %vm22_vm0 = vcmask 254976   ;;  %s251_s0 = inlined_call_operand.vmem [shape: f32[2,32], index: 0, kind: input, shape index: {}]   ;;  %s252_s1 = inlined_call_operand.vmem [shape: f32[1,32], index: 1, kind: input, shape index: {}]   ;;  %s253_s2 = inlined_call_operand.vmem [shape: f32[1,32], index: 2, kind: input, shape index: {}]   ;;  %s254_s3 = inlined_call_operand.vmem [shape: bf16[32,32], index: 3, kind: input, shape index: {}]   ;;  %s255_s4 = inlined_call_operand.hbm [shape: f32[2,32], index: 4, kind: output, shape index: {}]  }
   0x1   :  { %v19_v0 = vld [vmem:[%s251_s0] sm:$0x3] }
   0x2   :  { %v23_v1 = vsel %vm22_vm0, %v19_v0, 0.0 }
   0x3   :  { %24 = vadd.xlane.f32.xlu0 %v23_v1 }
   0x4   :  { %9 = vsyncpa [#allocation3], 0  ;;  %v160_v7 = vld [vmem:[%s254_s3] sm:$0xff]   ;;  %v192_v8 = vmov 0.0   ;;  %v161_v9 = vld [vmem:[%s254_s3 + $0x8] sm:$0xff]   ;;  %vm193_vm1 = vmmov 0  }
   0x5   :  { %149 = vmatprep.subr.bf16.mxu0 %v192_v8  ;;  %153 = vmatprep.mubr.msk.bf16.mxu0 %vm193_vm1, %v192_v8  ;;  %v141_v14 = vld [vmem:[%s252_s1] ss:$0 sm:$0xff]  ;;  %vm68_vm2 = vcmask 261120   ;;  %s194_s1 = smov [#allocation2]  }
   0x6   :  { %150 = vmatpush3.bf16.msra.mxu0 %v160_v7  ;;  %v142_v16 = vld [vmem:[%s253_s2] ss:$0 sm:$0xff]  ;;  %s133_s2 = sshll.u32 %s194_s1, 4  ;;  %s134_s2 = int_to_ptr.vmem [resolvable:$true] %s133_s2 }
   0x7   :  { %151 = vmatprep.subr.bf16.mxu0 %v192_v8  ;;  %s168_s3 = scalar_lea.vmem %s134_s2, 32  ;;  %p173_p1 = scmp.lt.s32.totalorder %s134_s2, %s134_s2 }
   0x8   :  { %p169_p0 = scmp.ne.s32.totalorder %s134_s2, %s168_s3  ;;  %p174_p2 = scmp.lt.s32.totalorder %s168_s3, %s168_s3 }
   0xa   :  { %152 = vmatpush3.bf16.msra.mxu0 %v161_v9  ;;  %p175_p3 = por %p174_p2, %p173_p1 }
   0xc   :  { %p176_p4 = pnand %p175_p3, %p169_p0 }
  0x90   :  { %v25_v2 = vpop.xlane.xlu0 %24 }
  0x91   :  { %v27_v3 = vmul.f32 0.03125, %v25_v2 }
  0x93   :  { %v28_v4 = vsub.f32 %v19_v0, %v27_v3 }
  0x95   :  { %v29_v5 = vmul.f32 %v28_v4, %v28_v4 }
  0x97   :  { %v30_v6 = vsel %vm22_vm0, %v29_v5, 0.0 }
  0x98   :  { %31 = vadd.xlane.f32.xlu0 %v30_v6 }
 0x125   :  { %v32_v10 = vpop.xlane.xlu0 %31 }
 0x126   :  { %v33_v11 = vmul.f32 0.03125, %v32_v10 }
 0x128   :  { %v34_v12 = vadd.f32 1e-05, %v33_v11 }
 0x12a   :  { %162 = vrsqrt.f32 %v34_v12 }
 0x134   :  { %v163_v13 = vpop.eup %162 }
 0x135   :  { %v36_v15 = vmul.f32 %v163_v13, %v28_v4 }
 0x137   :  { %v43_v17 = vmul.f32 %v141_v14, %v36_v15 }
 0x139   :  { %v50_v18 = vadd.f32 %v142_v16, %v43_v17 }
 0x13b   :  { %v51_v19 = vpack.c.bf16 %v50_v18, %v50_v18 }
 0x13d   :  { %154 = vmatmul.mubr.msk.bf16.vlgmr.msra.gmra.mrb[0].mxu0 %vm68_vm2, %v51_v19 }
 0x210   :  { %v106_v20 = vpop.f32.mrb[0].mxu0 }
 0x211   :  { %v155_v21 = vpop.f32.mrb[1].mxu0  ;;  %v112_v22 = vmul.f32 %v106_v20, %v106_v20 }
 0x212   :  { %v109_v23 = vpop.f32.mrb[2].mxu0 }
 0x213   :  { %v156_v24 = vpop.f32.mrb[3].mxu0  ;;  %v113_v25 = vsel %vm22_vm0, %v112_v22, 0.0 }
 0x214   :  { %114 = vadd.xlane.f32.xlu1 %v113_v25 }
 0x2a1   :  { %v115_v26 = vpop.xlane.xlu1 %114 }
 0x2a2   :  { %164 = vrsqrt.f32 %v115_v26  ;;  %vm118_vm3 = vcmp.eq.f32.partialorder %v115_v26, inf  ;;  %v121_v29 = vand.u32 2147483648, %v115_v26  ;;  %vm120_vm4 = vcmp.eq.f32.partialorder %v115_v26, 0.0 }
 0x2ac   :  { %v165_v27 = vpop.eup %164 }
 0x2ad   :  { %v117_v28 = vmul.f32 %v165_v27, %v115_v26 }
 0x2af   :  { %v119_v30 = vsel %vm118_vm3, %v115_v26, %v117_v28 }
 0x2b0   :  { %v122_v31 = vsel %vm120_vm4, %v121_v29, %v119_v30 }
 0x2b1   :  { %v123_v32 = vmax.f32 %v122_v31, 1e-12 }
 0x2b3   :  { %166 = vrcp.f32 %v123_v32 }
 0x2bd   :  { %v167_v33 = vpop.eup %166 }
 0x2be   :  { %v125_v34 = vmul.f32 %v167_v33, %v106_v20 }
 0x2c0   :  { %126 = vst.msk [vmem:[#allocation2] sm:$0x3] %vm22_vm0, %v125_v34 }
 0x2c1   :  { %179 = shalt.err (!%p176_p4)
}
 0x2c2   :  { %s180_s26 = scalar_lea.hbm %s255_s4, 32 }
 0x2c3   :  { %p181_p5 = scmp.ne.s32.totalorder %s255_s4, %s180_s26  ;;  %p184_p6 = scmp.lt.u32.totalorder %s180_s26, %s255_s4 }
 0x2c5   :  { %p186_p7 = pnand %p184_p6, %p181_p5 }
 0x2c7   :  { %189 = shalt.err (!%p186_p7)
}
 0x2c8   :  { %136 = dma.vmem_to_hbm [thread:$0]  %s134_s2, 32, %s255_s4, [#allocation3]  }
 0x2c9   :  { %190 = dma.done.wait [#allocation3], 32  }
 0x2ca   :  { %191 = vsyncadd [#allocation3], 4294967264 }
 0x2cb   :  { %140 = vsyncpa [#allocation3], 1 }

// kernel: clip_forward.7
= control target key start
LH: loop header
LB: loop body
LE: loop exit
PB: predicated region body
PF: predicated region fallthrough
CT: control target
= control target key end

     0   :  { %vm188_vm0 = vcmask 261120   ;;  %s321_s1 = inlined_call_operand.vmem [shape: bf16[256,32], index: 1, kind: input, shape index: {}]   ;;  %s322_s0 = inlined_call_operand.vmem [shape: bf16[8,256], index: 0, kind: input, shape index: {}]   ;;  %s323_s2 = inlined_call_operand.vmem [shape: f32[8,32], index: 2, kind: output, shape index: {}]  }
   0x1   :  { %v234_v0 = vld [vmem:[%s321_s1 + $0x40] sm:$0xff]   ;;  %v236_v2 = vld [vmem:[%s321_s1 + $0x48] sm:$0xff]   ;;  %v238_v4 = vld [vmem:[%s321_s1 + $0x50] sm:$0xff]  }
   0x2   :  { %v235_v1 = vld [vmem:[%s321_s1] sm:$0xff]   ;;  %212 = vmatprep.subr.bf16.mxu0 %v234_v0  ;;  %v237_v3 = vld [vmem:[%s321_s1 + $0x8] sm:$0xff]   ;;  %v239_v5 = vld [vmem:[%s321_s1 + $0x10] sm:$0xff]  }
   0x3   :  { %213 = vmatpush3.bf16.msra.mxu0 %v235_v1  ;;  %v240_v6 = vld [vmem:[%s321_s1 + $0x58] sm:$0xff]   ;;  %v242_v8 = vld [vmem:[%s321_s1 + $0x60] sm:$0xff]   ;;  %v244_v10 = vld [vmem:[%s321_s1 + $0x68] sm:$0xff]  }
   0x4   :  { %214 = vmatprep.subr.bf16.mxu0 %v236_v2  ;;  %v241_v7 = vld [vmem:[%s321_s1 + $0x18] sm:$0xff]   ;;  %v243_v9 = vld [vmem:[%s321_s1 + $0x20] sm:$0xff]   ;;  %v245_v13 = vld [vmem:[%s321_s1 + $0x28] sm:$0xff]  }
   0x5   :  { %v12_v11 = vld [vmem:[%s322_s0] sm:$0xff]  ;;  %v246_v14 = vld [vmem:[%s321_s1 + $0x70] sm:$0xff]   ;;  %v248_v16 = vld [vmem:[%s321_s1 + $0x78] sm:$0xff]  }
   0x6   :  { %v195_v12 = vcombine.high %v12_v11, %v12_v11  ;;  %v247_v15 = vld [vmem:[%s321_s1 + $0x30] sm:$0xff]   ;;  %v249_v17 = vld [vmem:[%s321_s1 + $0x38] sm:$0xff]   ;;  %v194_v18 = vcombine.low %v12_v11, %v12_v11 }
   0x7   :  { %215 = vmatpush3.bf16.msra.mxu0 %v237_v3 }
   0x8   :  { %216 = vmatprep.subr.bf16.mxu0 %v238_v4  ;;  %180 = vmatprep.mubr.bf16.mxu0 %v195_v12 }
   0xb   :  { %217 = vmatpush3.bf16.msra.mxu0 %v239_v5 }
   0xc   :  { %218 = vmatprep.subr.bf16.mxu0 %v240_v6 }
   0xf   :  { %219 = vmatpush3.bf16.msra.mxu0 %v241_v7 }
  0x10   :  { %220 = vmatprep.subr.bf16.mxu0 %v242_v8 }
  0x13   :  { %221 = vmatpush3.bf16.msra.mxu0 %v243_v9 }
  0x14   :  { %222 = vmatprep.subr.bf16.mxu0 %v244_v10 }
  0x17   :  { %223 = vmatpush3.bf16.msra.mxu0 %v245_v13 }
  0x18   :  { %224 = vmatprep.subr.bf16.mxu0 %v246_v14 }
  0x1b   :  { %225 = vmatpush3.bf16.msra.mxu0 %v247_v15 }
  0x1c   :  { %226 = vmatprep.subr.bf16.mxu0 %v248_v16 }
  0x1f   :  { %227 = vmatpush3.bf16.msra.mxu0 %v249_v17 }
  0x22   :  { %181 = vmatmul.mubr.bf16.vlgmr.msra.gmra.mrb[0].mxu0 %v194_v18 }
  0xf5   :  { %v228_v19 = vpop.f32.mrb[0].mxu0 }
  0xf6   :  { %v229_v20 = vpop.f32.mrb[1].mxu0 }
  0xf7   :  { %v230_v21 = vadd.f32 %v229_v20, %v228_v19  ;;  %v231_v22 = vpop.f32.mrb[2].mxu0 }
  0xf8   :  { %v232_v23 = vpop.f32.mrb[3].mxu0 }
  0xf9   :  { %189 = vst.msk [vmem:[%s323_s2] sm:$0xff] %vm188_vm0, %v230_v21 }

// kernel: clip_forward.9
= control target key start
LH: loop header
LB: loop body
LE: loop exit
PB: predicated region body
PF: predicated region fallthrough
CT: control target
= control target key end

     0   :  { %vm49_vm0 = vcmask 261120   ;;  %v1209_v15 = vmov 0.0   ;;  %vm1210_vm1 = vmmov 0   ;;  %vm184_vm2 = vcmask 130048   ;;  %s1480_s0 = inlined_call_operand.vmem [shape: f32[2,8,32], index: 0, kind: input, shape index: {}]   ;;  %s1481_s3 = inlined_call_operand.vmem [shape: bf16[32,96], index: 3, kind: input, shape index: {}]   ;;  %s1482_s1 = inlined_call_operand.vmem [shape: f32[1,32], index: 1, kind: input, shape index: {}]   ;;  %s1483_s2 = inlined_call_operand.vmem [shape: f32[1,32], index: 2, kind: input, shape index: {}]   ;;  %s1484_s4 = inlined_call_operand.vmem [shape: f32[1,96], index: 4, kind: input, shape index: {}]   ;;  %s1485_s5 = inlined_call_operand.vmem [shape: bf16[2,16,32], index: 5, kind: input, shape index: {}]   ;;  %s1486_s6 = inlined_call_operand.vmem [shape: f32[1,32], index: 6, kind: input, shape index: {}]   ;;  %s1487_s9 = inlined_call_operand.vmem [shape: bf16[32,128], index: 9, kind: input, shape index: {}]   ;;  %s1488_s11 = inlined_call_operand.vmem [shape: bf16[128,32], index: 11, kind: input, shape index: {}]   ;;  %s1489_s7 = inlined_call_operand.vmem [shape: f32[1,32], index: 7, kind: input, shape index: {}]   ;;  %s1490_s8 = inlined_call_operand.vmem [shape: f32[1,32], index: 8, kind: input, shape index: {}]   ;;  %s1491_s10 = inlined_call_operand.vmem [shape: f32[1,128], index: 10, kind: input, shape index: {}]   ;;  %s1492_s12 = inlined_call_operand.vmem [shape: f32[1,32], index: 12, kind: input, shape index: {}]   ;;  %s1493_s13 = inlined_call_operand.vmem [shape: f32[2,8,32], index: 13, kind: output, shape index: {}]  }
   0x1   :  { %v1287_v0 = vld [vmem:[%s1480_s0] sm:$0xff]  ;;  %v1292_v1 = vld [vmem:[%s1480_s0 + $0x8] sm:$0xff]  ;;  %1066 = vmatprep.subr.bf16.mxu1 %v1209_v15  ;;  %1092 = vmatprep.subr.bf16.mxu0 %v1209_v15  ;;  %v378_v63 = vlaneseq  ;;  %vm387_vm4 = vcmask 64512   ;;  %vm433_vm5 = vcmask 1043456  }
   0x2   :  { %v50_v2 = vsel %vm49_vm0, %v1287_v0, 0.0  ;;  %v53_v3 = vsel %vm49_vm0, %v1292_v1, 0.0  ;;  %v1167_v14 = vld [vmem:[%s1481_s3] sm:$0xff]   ;;  %v1168_v16 = vld [vmem:[%s1481_s3 + $0x8] sm:$0xff]   ;;  %1070 = vmatprep.mubr.msk.bf16.mxu1 %vm1210_vm1, %v1209_v15  ;;  %1094 = vmatprep.mubr.msk.bf16.mxu0 %vm1210_vm1, %v1209_v15 }
   0x3   :  { %51 = vadd.xlane.f32.xlu0 %v50_v2  ;;  %1067 = vmatpush3.bf16.msra.mxu1 %v1167_v14  ;;  %v997_v25 = vld [vmem:[%s1482_s1] ss:$0 sm:$0xff]  ;;  %s1211_s1 = smov 112   ;;  %v379_v2 = vand.u32 127, %v378_v63 }
   0x4   :  { %1068 = vmatprep.subr.bf16.mxu1 %v1209_v15  ;;  %v998_v29 = vld [vmem:[%s1483_s2] ss:$0 sm:$0xff]  ;;  %s1212_s2 = smov 96  }
   0x5   :  { %v999_v34 = vld [vmem:[%s1484_s4] ss:$0 sm:$0xff]  ;;  %vm380_vm3 = vcmp.lt.s32.totalorder %v379_v2, 5  ;;  %s1213_s4 = smov 64  }
   0x7   :  { %54 = vadd.xlane.f32.xlu0 %v53_v3  ;;  %1069 = vmatpush3.bf16.msra.mxu1 %v1168_v16 }
   0x8   :  { %1074 = vmatprep.subr.bf16.mxu1 %v1209_v15 }
  0x90   :  { %v52_v4 = vpop.xlane.xlu0 %51 }
  0x91   :  { %v57_v5 = vmul.f32 0.03125, %v52_v4 }
  0x93   :  { %v59_v6 = vsub.f32 %v1287_v0, %v57_v5 }
  0x94   :  { %v55_v7 = vpop.xlane.xlu0 %54 }
  0x95   :  { %v58_v8 = vmul.f32 0.03125, %v55_v7  ;;  %v61_v9 = vmul.f32 %v59_v6, %v59_v6 }
  0x97   :  { %v60_v10 = vsub.f32 %v1292_v1, %v58_v8  ;;  %v63_v11 = vsel %vm49_vm0, %v61_v9, 0.0 }
  0x98   :  { %64 = vadd.xlane.f32.xlu1 %v63_v11 }
  0x99   :  { %v62_v12 = vmul.f32 %v60_v10, %v60_v10 }
  0x9b   :  { %v66_v13 = vsel %vm49_vm0, %v62_v12, 0.0 }
  0x9c   :  { %67 = vadd.xlane.f32.xlu1 %v66_v13 }
 0x125   :  { %v65_v17 = vpop.xlane.xlu1 %64 }
 0x126   :  { %v69_v18 = vmul.f32 0.03125, %v65_v17 }
 0x128   :  { %v71_v19 = vadd.f32 1e-05, %v69_v18 }
 0x129   :  { %v68_v20 = vpop.xlane.xlu1 %67 }
 0x12a   :  { %1181 = vrsqrt.f32 %v71_v19  ;;  %v70_v21 = vmul.f32 0.03125, %v68_v20 }
 0x12c   :  { %v72_v22 = vadd.f32 1e-05, %v70_v21 }
 0x12e   :  { %1183 = vrsqrt.f32 %v72_v22 }
 0x134   :  { %v1182_v23 = vpop.eup %1181 }
 0x135   :  { %v75_v24 = vmul.f32 %v1182_v23, %v59_v6 }
 0x137   :  { %v83_v28 = vmul.f32 %v997_v25, %v75_v24 }
 0x138   :  { %v1184_v26 = vpop.eup %1183 }
 0x139   :  { %v76_v27 = vmul.f32 %v1184_v26, %v60_v10  ;;  %v91_v31 = vadd.f32 %v998_v29, %v83_v28 }
 0x13b   :  { %v84_v30 = vmul.f32 %v997_v25, %v76_v27 }
 0x13d   :  { %v92_v32 = vadd.f32 %v998_v29, %v84_v30 }
 0x13f   :  { %v93_v33 = vpack.c.bf16 %v92_v32, %v91_v31 }
 0x141   :  { %1071 = vmatmul.mubr.msk.bf16.vlgmr.msra.gmra.mrb[0].mxu1 %vm49_vm0, %v93_v33 }
 0x142   :  { %1076 = vmatprep.mubr.msk.bf16.mxu1 %vm1210_vm1, %v1209_v15 }
 0x214   :  { %v154_v35 = vpop.f32.mrb[0].mxu1 }
 0x215   :  { %v155_v36 = vadd.f32 %v999_v34, %v154_v35  ;;  %v1072_v37 = vpop.f32.mrb[1].mxu1 }
 0x216   :  { %v157_v38 = vpop.f32.mrb[2].mxu1 }
 0x217   :  { %v158_v39 = vadd.f32 %v999_v34, %v157_v38  ;;  %163 = vrot.lane.b32.xlu0 %v155_v36, %s1211_s1  ;;  %v1073_v40 = vpop.f32.mrb[3].mxu1  ;;  %v1328_v41 = vpack.c.bf16 %v155_v36, %v155_v36  ;;  %v169_v49 = vmul.f32 0.25, %v155_v36 }
 0x219   :  { %165 = vrot.lane.b32.xlu1 %v158_v39, %s1211_s1  ;;  %v178_v42 = vpack.c.bf16 %v158_v39, %v158_v39  ;;  %v173_v51 = vpack.c.bf16 %v169_v49, %v169_v49  ;;  %v170_v53 = vmul.f32 0.25, %v158_v39 }
 0x21b   :  { %v174_v54 = vpack.c.bf16 %v170_v53, %v170_v53 }
 0x21d   :  { %182 = vrot.lane.b32.xlu1 %v1328_v41, %s1212_s2 }
 0x221   :  { %232 = vrot.lane.b32.xlu1 %v178_v42, %s1212_s2 }
 0x289   :  { %v164_v43 = vpop.permute.xlu0 %163 }
 0x28a   :  { %v179_v44 = vpack.c.bf16 %v164_v43, %v164_v43  ;;  %v171_v58 = vmul.f32 0.25, %v164_v43 }
 0x28b   :  { %v166_v45 = vpop.permute.xlu1 %165 }
 0x28c   :  { %v180_v46 = vpack.c.bf16 %v166_v45, %v166_v45  ;;  %281 = vrot.lane.b32.xlu0 %v179_v44, %s1212_s2  ;;  %v172_v60 = vmul.f32 0.25, %v166_v45  ;;  %v175_v61 = vpack.c.bf16 %v171_v58, %v171_v58 }
 0x28e   :  { %330 = vrot.lane.b32.xlu1 %v180_v46, %s1212_s2  ;;  %v176_v62 = vpack.c.bf16 %v172_v60, %v172_v60  ;;  %v1169_v60 = vld [vmem:[%s1485_s5] sm:$0xff]  }
 0x28f   :  { %v183_v47 = vpop.permute.xlu1 %182 }
 0x290   :  { %v189_v48 = vsel %vm184_vm2, %v183_v47, 0 }
 0x291   :  { %1075 = vmatpush3.bf16.xpose.msra.mxu1 %v189_v48 }
 0x292   :  { %1080 = vmatprep.subr.bf16.mxu1 %v1209_v15 }
 0x293   :  { %v233_v50 = vpop.permute.xlu1 %232 }
 0x294   :  { %v238_v52 = vsel %vm184_vm2, %v233_v50, 0 }
 0x298   :  { %1077 = vmatmul.mubr.msk.bf16.vlgmr.msra.gmra.mrb[4].mxu1 %vm184_vm2, %v173_v51 }
 0x299   :  { %1081 = vmatpush3.bf16.xpose.msra.mxu1 %v238_v52  ;;  %1082 = vmatprep.mubr.msk.bf16.mxu1 %vm1210_vm1, %v1209_v15 }
 0x29a   :  { %1086 = vmatprep.subr.bf16.mxu1 %v1209_v15 }
 0x2a0   :  { %1083 = vmatmul.mubr.msk.bf16.vlgmr.msra.gmra.mrb[8].mxu1 %vm184_vm2, %v174_v54 }
 0x2a1   :  { %1088 = vmatprep.mubr.msk.bf16.mxu1 %vm1210_vm1, %v1209_v15 }
 0x2fe   :  { %v282_v55 = vpop.permute.xlu0 %281 }
 0x2ff   :  { %v287_v56 = vsel %vm184_vm2, %v282_v55, 0 }
 0x300   :  { %v331_v57 = vpop.permute.xlu1 %330  ;;  %1087 = vmatpush3.bf16.xpose.msra.mxu1 %v287_v56 }
 0x301   :  { %v336_v59 = vsel %vm184_vm2, %v331_v57, 0  ;;  %1098 = vmatprep.subr.bf16.mxu1 %v1209_v15 }
 0x302   :  { %1093 = vmatpush3.bf16.xpose.msra.mxu0 %v336_v59 }
 0x303   :  { %1104 = vmatprep.subr.bf16.mxu0 %v1209_v15 }
 0x307   :  { %1089 = vmatmul.mubr.msk.bf16.vlgmr.msra.gmra.mrb[12].mxu1 %vm184_vm2, %v175_v61  ;;  %v1170_v61 = vld [vmem:[%s1485_s5 + $0x8] sm:$0xff]  }
 0x308   :  { %1100 = vmatprep.mubr.msk.bf16.mxu1 %vm1210_vm1, %v1209_v15 }
 0x309   :  { %1095 = vmatmul.mubr.msk.bf16.vlgmr.msra.gmra.mrb[0].mxu0 %vm184_vm2, %v176_v62 }
 0x30a   :  { %1106 = vmatprep.mubr.msk.bf16.mxu0 %vm1210_vm1, %v1209_v15 }
 0x36b   :  { %v225_v3 = vpop.f32.mrb[4].mxu1 }
 0x36c   :  { %v383_v4 = vsel %vm380_vm3, %v225_v3, -1e+30  ;;  %v1078_v5 = vpop.f32.mrb[5].mxu1 }
 0x36d   :  { %v228_v6 = vpop.f32.mrb[6].mxu1  ;;  %v388_v7 = vsel %vm387_vm4, %v383_v4, -inf }
 0x36e   :  { %389 = vmax.xlane.f32.xlu0 %v388_v7  ;;  %v1079_v8 = vpop.f32.mrb[7].mxu1 }
 0x373   :  { %v274_v9 = vpop.f32.mrb[8].mxu1 }
 0x374   :  { %v384_v10 = vsel %vm380_vm3, %v274_v9, -1e+30  ;;  %v1084_v11 = vpop.f32.mrb[9].mxu1 }
 0x375   :  { %v277_v12 = vpop.f32.mrb[10].mxu1  ;;  %v391_v13 = vsel %vm387_vm4, %v384_v10, -inf }
 0x376   :  { %392 = vmax.xlane.f32.xlu1 %v391_v13  ;;  %v1085_v14 = vpop.f32.mrb[11].mxu1 }
 0x387   :  { %477 = vrot.lane.b32.xlu1 %v178_v42, %s1213_s4 }
 0x38b   :  { %525 = vrot.lane.b32.xlu1 %v179_v44, %s1213_s4 }
 0x38f   :  { %573 = vrot.lane.b32.xlu1 %v180_v46, %s1213_s4 }
 0x3da   :  { %v323_v16 = vpop.f32.mrb[12].mxu1 }
 0x3db   :  { %v385_v17 = vsel %vm380_vm3, %v323_v16, -1e+30  ;;  %v1090_v18 = vpop.f32.mrb[13].mxu1 }
 0x3dc   :  { %v326_v19 = vpop.f32.mrb[14].mxu1  ;;  %v372_v20 = vpop.f32.mrb[0].mxu0  ;;  %v394_v21 = vsel %vm387_vm4, %v385_v17, -inf }
 0x3dd   :  { %v386_v22 = vsel %vm380_vm3, %v372_v20, -1e+30  ;;  %v1096_v23 = vpop.f32.mrb[1].mxu0  ;;  %395 = vmax.xlane.f32.xlu0 %v394_v21  ;;  %v1091_v24 = vpop.f32.mrb[15].mxu1 }
 0x3de   :  { %v375_v25 = vpop.f32.mrb[2].mxu0  ;;  %v397_v27 = vsel %vm387_vm4, %v386_v22, -inf }
 0x3df   :  { %v1097_v26 = vpop.f32.mrb[3].mxu0 }
 0x3e1   :  { %398 = vmax.xlane.f32.xlu0 %v397_v27 }
 0x3f7   :  { %428 = vrot.lane.b32.xlu0 %v1328_v41, %s1213_s4 }
 0x3fb   :  { %v390_v28 = vpop.xlane.xlu0 %389 }
 0x3fc   :  { %v400_v29 = vsub.f32 %v383_v4, %v390_v28 }
 0x3fe   :  { %v404_v30 = vmul.f32 1.442695, %v400_v29 }
 0x400   :  { %1185 = vpow2.f32 %v404_v30 }
 0x403   :  { %v393_v31 = vpop.xlane.xlu1 %392 }
 0x404   :  { %v401_v32 = vsub.f32 %v384_v10, %v393_v31 }
 0x406   :  { %v406_v33 = vmul.f32 1.442695, %v401_v32 }
 0x407   :  { %v478_v34 = vpop.permute.xlu1 %477 }
 0x408   :  { %1187 = vpow2.f32 %v406_v33  ;;  %v483_v35 = vsel %vm433_vm5, %v478_v34, 0 }
 0x409   :  { %1105 = vmatpush3.bf16.msra.mxu0 %v483_v35 }
 0x40a   :  { %1116 = vmatprep.subr.bf16.mxu0 %v1209_v15  ;;  %v1186_v37 = vpop.eup %1185 }
 0x40b   :  { %v526_v36 = vpop.permute.xlu1 %525  ;;  %v412_v43 = vsel %vm387_vm4, %v1186_v37, 0.0  ;;  %v424_v52 = vpack.c.bf16 %v1186_v37, %v1186_v37 }
 0x40c   :  { %v531_v53 = vsel %vm433_vm5, %v526_v36, 0 }
 0x40f   :  { %v574_v39 = vpop.permute.xlu1 %573 }
 0x410   :  { %v579_v42 = vsel %vm433_vm5, %v574_v39, 0 }
 0x412   :  { %v1188_v38 = vpop.eup %1187 }
 0x413   :  { %v415_v40 = vsel %vm387_vm4, %v1188_v38, 0.0  ;;  %v425_v41 = vpack.c.bf16 %v1188_v38, %v1188_v38 }
 0x414   :  { %416 = vadd.xlane.f32.xlu1 %v415_v40 }
 0x415   :  { %1107 = vmatmul.mubr.msk.bf16.vlgmr.msra.gmra.mrb[4].mxu0 %vm387_vm4, %v425_v41 }
 0x416   :  { %1117 = vmatpush3.bf16.msra.mxu0 %v579_v42  ;;  %413 = vadd.xlane.f32.xlu0 %v412_v43 }
 0x417   :  { %1118 = vmatprep.mubr.msk.bf16.mxu0 %vm1210_vm1, %v1209_v15  ;;  %1128 = vmatprep.subr.bf16.mxu0 %v1209_v15 }
 0x46a   :  { %v396_v44 = vpop.xlane.xlu0 %395 }
 0x46b   :  { %v402_v45 = vsub.f32 %v385_v17, %v396_v44  ;;  %v1015_v44 = vld [vmem:[%s1486_s6] ss:$0 sm:$0xff] }
 0x46d   :  { %v408_v46 = vmul.f32 1.442695, %v402_v45 }
 0x46e   :  { %v399_v47 = vpop.xlane.xlu0 %398 }
 0x46f   :  { %1189 = vpow2.f32 %v408_v46  ;;  %v403_v48 = vsub.f32 %v386_v22, %v399_v47 }
 0x471   :  { %v410_v49 = vmul.f32 1.442695, %v403_v48 }
 0x472   :  { %v429_v50 = vpop.permute.xlu0 %428 }
 0x473   :  { %1191 = vpow2.f32 %v410_v49  ;;  %v435_v51 = vsel %vm433_vm5, %v429_v50, 0 }
 0x474   :  { %1099 = vmatpush3.bf16.msra.mxu1 %v435_v51 }
 0x475   :  { %1110 = vmatprep.subr.bf16.mxu1 %v1209_v15 }
 0x477   :  { %1101 = vmatmul.mubr.msk.bf16.vlgmr.msra.gmra.mrb[16].mxu1 %vm387_vm4, %v424_v52 }
 0x478   :  { %1111 = vmatpush3.bf16.msra.mxu1 %v531_v53  ;;  %1112 = vmatprep.mubr.msk.bf16.mxu1 %vm1210_vm1, %v1209_v15 }
 0x479   :  { %v1190_v54 = vpop.eup %1189  ;;  %1122 = vmatprep.subr.bf16.mxu1 %v1209_v15 }
 0x47a   :  { %v418_v55 = vsel %vm387_vm4, %v1190_v54, 0.0  ;;  %v426_v57 = vpack.c.bf16 %v1190_v54, %v1190_v54 }
 0x47b   :  { %419 = vadd.xlane.f32.xlu0 %v418_v55 }
 0x47d   :  { %v1192_v56 = vpop.eup %1191 }
 0x47e   :  { %v421_v58 = vsel %vm387_vm4, %v1192_v56, 0.0  ;;  %v427_v59 = vpack.c.bf16 %v1192_v56, %v1192_v56 }
 0x47f   :  { %422 = vadd.xlane.f32.xlu0 %v421_v58  ;;  %1113 = vmatmul.mubr.msk.bf16.vlgmr.msra.gmra.mrb[20].mxu1 %vm387_vm4, %v426_v57 }
 0x480   :  { %1119 = vmatmul.mubr.msk.bf16.vlgmr.msra.gmra.mrb[8].mxu0 %vm387_vm4, %v427_v59  ;;  %1124 = vmatprep.mubr.msk.bf16.mxu1 %vm1210_vm1, %v1209_v15 }
 0x481   :  { %1130 = vmatprep.mubr.msk.bf16.mxu0 %vm1210_vm1, %v1209_v15  ;;  %1123 = vmatpush3.bf16.msra.mxu1 %v1169_v60  ;;  %v1171_v60 = vld [vmem:[%s1487_s9] sm:$0xff]  }
 0x482   :  { %1134 = vmatprep.subr.bf16.mxu1 %v1209_v15  ;;  %1129 = vmatpush3.bf16.msra.mxu0 %v1170_v61  ;;  %v1172_v61 = vld [vmem:[%s1487_s9 + $0x8] sm:$0xff]  }
 0x483   :  { %1142 = vmatprep.subr.bf16.mxu0 %v1209_v15 }
 0x4a1   :  { %v417_v4 = vpop.xlane.xlu1 %416 }
 0x4a2   :  { %1193 = vrcp.f32 %v417_v4 }
 0x4a3   :  { %v414_v5 = vpop.xlane.xlu0 %413 }
 0x4a4   :  { %1195 = vrcp.f32 %v414_v5 }
 0x4ac   :  { %v1194_v8 = vpop.eup %1193 }
 0x4ae   :  { %v1196_v9 = vpop.eup %1195 }
 0x4e8   :  { %v519_v62 = vpop.f32.mrb[4].mxu0 }
 0x4e9   :  { %v1108_v63 = vpop.f32.mrb[5].mxu0  ;;  %v626_v11 = vmul.f32 %v1194_v8, %v519_v62  ;;  %v1173_v62 = vld [vmem:[%s1488_s11] sm:$0xff]  }
 0x4ea   :  { %v522_v2 = vpop.f32.mrb[6].mxu0  ;;  %v1174_v63 = vld [vmem:[%s1488_s11 + $0x8] sm:$0xff]  }
 0x4eb   :  { %v1109_v3 = vpop.f32.mrb[7].mxu0 }
 0x508   :  { %v420_v6 = vpop.xlane.xlu0 %419 }
 0x509   :  { %1197 = vrcp.f32 %v420_v6 }
 0x50c   :  { %v423_v7 = vpop.xlane.xlu0 %422 }
 0x50d   :  { %1199 = vrcp.f32 %v423_v7 }
 0x513   :  { %v1198_v18 = vpop.eup %1197 }
 0x517   :  { %v1200_v20 = vpop.eup %1199 }
 0x54a   :  { %v471_v10 = vpop.f32.mrb[16].mxu1 }
 0x54b   :  { %v625_v12 = vmul.f32 %v1196_v9, %v471_v10  ;;  %v1102_v13 = vpop.f32.mrb[17].mxu1  ;;  %v1016_v9 = vld [vmem:[%s1489_s7] ss:$0 sm:$0xff] }
 0x54c   :  { %v474_v14 = vpop.f32.mrb[18].mxu1 }
 0x54d   :  { %v629_v16 = vpack.c.bf16 %v626_v11, %v625_v12  ;;  %v1103_v17 = vpop.f32.mrb[19].mxu1  ;;  %v1017_v14 = vld [vmem:[%s1490_s8] ss:$0 sm:$0xff] }
 0x54f   :  { %1125 = vmatmul.mubr.msk.bf16.vlgmr.msra.gmra.mrb[24].mxu1 %vm184_vm2, %v629_v16 }
 0x550   :  { %1138 = vmatprep.mubr.msk.bf16.mxu1 %vm1210_vm1, %v1209_v15  ;;  %1135 = vmatpush3.bf16.msra.mxu1 %v1171_v60 }
 0x551   :  { %1136 = vmatprep.subr.bf16.mxu1 %v1209_v15 }
 0x552   :  { %v567_v19 = vpop.f32.mrb[20].mxu1 }
 0x553   :  { %v627_v21 = vmul.f32 %v1198_v18, %v567_v19  ;;  %v1114_v22 = vpop.f32.mrb[21].mxu1  ;;  %v615_v23 = vpop.f32.mrb[8].mxu0 }
 0x554   :  { %v628_v24 = vmul.f32 %v1200_v20, %v615_v23  ;;  %v570_v25 = vpop.f32.mrb[22].mxu1  ;;  %v1120_v26 = vpop.f32.mrb[9].mxu0  ;;  %1137 = vmatpush3.bf16.msra.mxu1 %v1172_v61  ;;  %v1175_v20 = vld [vmem:[%s1488_s11 + $0x10] sm:$0xff]   ;;  %v1177_v22 = vld [vmem:[%s1488_s11 + $0x20] sm:$0xff]   ;;  %v1178_v23 = vld [vmem:[%s1488_s11 + $0x28] sm:$0xff]  }
 0x555   :  { %v1115_v27 = vpop.f32.mrb[23].mxu1  ;;  %v618_v28 = vpop.f32.mrb[10].mxu0  ;;  %v1180_v25 = vld [vmem:[%s1488_s11 + $0x38] sm:$0xff]   ;;  %v1018_v26 = vld [vmem:[%s1491_s10] ss:$0 sm:$0xff] }
 0x556   :  { %v630_v29 = vpack.c.bf16 %v628_v24, %v627_v21  ;;  %v1121_v30 = vpop.f32.mrb[11].mxu0  ;;  %v1176_v21 = vld [vmem:[%s1488_s11 + $0x18] sm:$0xff]   ;;  %v1179_v24 = vld [vmem:[%s1488_s11 + $0x30] sm:$0xff]  }
 0x558   :  { %1131 = vmatmul.mubr.msk.bf16.vlgmr.msra.gmra.mrb[12].mxu0 %vm184_vm2, %v630_v29 }
 0x559   :  { %1158 = vmatprep.mubr.msk.bf16.mxu0 %vm1210_vm1, %v1209_v15  ;;  %1143 = vmatpush3.bf16.msra.mxu0 %v1173_v62 }
 0x55a   :  { %1144 = vmatprep.subr.bf16.mxu0 %v1209_v15 }
 0x55d   :  { %1145 = vmatpush3.bf16.msra.mxu0 %v1174_v63 }
 0x55e   :  { %1146 = vmatprep.subr.bf16.mxu0 %v1209_v15 }
 0x561   :  { %1147 = vmatpush3.bf16.msra.mxu0 %v1175_v20 }
 0x562   :  { %1148 = vmatprep.subr.bf16.mxu0 %v1209_v15 }
 0x565   :  { %1149 = vmatpush3.bf16.msra.mxu0 %v1176_v21 }
 0x566   :  { %1150 = vmatprep.subr.bf16.mxu0 %v1209_v15 }
 0x569   :  { %1151 = vmatpush3.bf16.msra.mxu0 %v1177_v22 }
 0x56a   :  { %1152 = vmatprep.subr.bf16.mxu0 %v1209_v15 }
 0x56d   :  { %1153 = vmatpush3.bf16.msra.mxu0 %v1178_v23 }
 0x56e   :  { %1154 = vmatprep.subr.bf16.mxu0 %v1209_v15 }
 0x571   :  { %1155 = vmatpush3.bf16.msra.mxu0 %v1179_v24 }
 0x572   :  { %1156 = vmatprep.subr.bf16.mxu0 %v1209_v15 }
 0x575   :  { %1157 = vmatpush3.bf16.msra.mxu0 %v1180_v25 }
 0x622   :  { %v678_v31 = vpop.f32.mrb[24].mxu1 }
 0x623   :  { %v1126_v32 = vpop.f32.mrb[25].mxu1  ;;  %v735_v36 = vsel %vm49_vm0, %v678_v31, 0.0 }
 0x624   :  { %v681_v33 = vpop.f32.mrb[26].mxu1 }
 0x625   :  { %v1127_v34 = vpop.f32.mrb[27].mxu1  ;;  %v738_v41 = vsel %vm49_vm0, %v681_v33, 0.0 }
 0x62b   :  { %v728_v35 = vpop.f32.mrb[12].mxu0 }
 0x62c   :  { %v736_v37 = vsel %vm49_vm0, %v728_v35, 0.0  ;;  %v1132_v38 = vpop.f32.mrb[13].mxu0 }
 0x62d   :  { %v737_v39 = vadd.f32 %v736_v37, %v735_v36  ;;  %v731_v40 = vpop.f32.mrb[14].mxu0 }
 0x62e   :  { %v739_v42 = vsel %vm49_vm0, %v731_v40, 0.0  ;;  %v1133_v43 = vpop.f32.mrb[15].mxu0 }
 0x62f   :  { %v741_v45 = vadd.f32 %v737_v39, %v1287_v0  ;;  %v740_v46 = vadd.f32 %v739_v42, %v738_v41 }
 0x631   :  { %v742_v47 = vadd.f32 %v740_v46, %v1292_v1  ;;  %v1407_v48 = vadd.f32 %v1015_v44, %v741_v45 }
 0x633   :  { %v754_v49 = vsel %vm49_vm0, %v1407_v48, 0.0  ;;  %v1411_v50 = vadd.f32 %v1015_v44, %v742_v47  ;;  %v1030_v44 = vld [vmem:[%s1492_s12] ss:$0 sm:$0xff] }
 0x634   :  { %755 = vadd.xlane.f32.xlu0 %v754_v49 }
 0x635   :  { %v757_v51 = vsel %vm49_vm0, %v1411_v50, 0.0 }
 0x636   :  { %758 = vadd.xlane.f32.xlu1 %v757_v51 }
 0x6c1   :  { %v756_v52 = vpop.xlane.xlu0 %755 }
 0x6c2   :  { %v760_v53 = vmul.f32 0.03125, %v756_v52 }
 0x6c3   :  { %v759_v54 = vpop.xlane.xlu1 %758 }
 0x6c4   :  { %v762_v0 = vsub.f32 %v1407_v48, %v760_v53  ;;  %v761_v55 = vmul.f32 0.03125, %v759_v54 }
 0x6c6   :  { %v763_v1 = vsub.f32 %v1411_v50, %v761_v55  ;;  %v764_v56 = vmul.f32 %v762_v0, %v762_v0 }
 0x6c8   :  { %v766_v57 = vsel %vm49_vm0, %v764_v56, 0.0  ;;  %v765_v58 = vmul.f32 %v763_v1, %v763_v1 }
 0x6c9   :  { %767 = vadd.xlane.f32.xlu0 %v766_v57 }
 0x6ca   :  { %v769_v59 = vsel %vm49_vm0, %v765_v58, 0.0 }
 0x6cb   :  { %770 = vadd.xlane.f32.xlu1 %v769_v59 }
 0x756   :  { %v768_v2 = vpop.xlane.xlu0 %767 }
 0x757   :  { %v772_v3 = vmul.f32 0.03125, %v768_v2 }
 0x758   :  { %v771_v4 = vpop.xlane.xlu1 %770 }
 0x759   :  { %v774_v5 = vadd.f32 1e-05, %v772_v3  ;;  %v773_v6 = vmul.f32 0.03125, %v771_v4 }
 0x75b   :  { %1201 = vrsqrt.f32 %v774_v5  ;;  %v775_v7 = vadd.f32 1e-05, %v773_v6 }
 0x75d   :  { %1203 = vrsqrt.f32 %v775_v7 }
 0x765   :  { %v1202_v8 = vpop.eup %1201 }
 0x766   :  { %v778_v10 = vmul.f32 %v1202_v8, %v762_v0 }
 0x767   :  { %v1204_v11 = vpop.eup %1203 }
 0x768   :  { %v786_v12 = vmul.f32 %v1016_v9, %v778_v10  ;;  %v779_v13 = vmul.f32 %v1204_v11, %v763_v1 }
 0x76a   :  { %v787_v16 = vmul.f32 %v1016_v9, %v779_v13  ;;  %v794_v17 = vadd.f32 %v1017_v14, %v786_v12 }
 0x76c   :  { %v795_v18 = vadd.f32 %v1017_v14, %v787_v16 }
 0x76e   :  { %v796_v19 = vpack.c.bf16 %v795_v18, %v794_v17 }
 0x770   :  { %1139 = vmatmul.mubr.msk.bf16.vlgmr.msra.gmra.mrb[28].mxu1 %vm49_vm0, %v796_v19 }
 0x843   :  { %v857_v27 = vpop.f32.mrb[28].mxu1 }
 0x844   :  { %v858_v28 = vadd.f32 %v1018_v26, %v857_v27  ;;  %v1140_v29 = vpop.f32.mrb[29].mxu1 }
 0x845   :  { %v860_v30 = vpop.f32.mrb[30].mxu1 }
 0x846   :  { %v866_v31 = vmul.f32 0.70710677, %v858_v28  ;;  %v861_v32 = vadd.f32 %v1018_v26, %v860_v30  ;;  %v1141_v33 = vpop.f32.mrb[31].mxu1  ;;  %v864_v37 = vmul.f32 0.5, %v858_v28 }
 0x848   :  { %1205 = verf.f32 %v866_v31  ;;  %v867_v34 = vmul.f32 0.70710677, %v861_v32  ;;  %v865_v38 = vmul.f32 0.5, %v861_v32 }
 0x84a   :  { %1207 = verf.f32 %v867_v34 }
 0x852   :  { %v1206_v15 = vpop.eup %1205 }
 0x853   :  { %v870_v35 = vadd.f32 1.0, %v1206_v15 }
 0x854   :  { %v1208_v36 = vpop.eup %1207 }
 0x855   :  { %v871_v39 = vadd.f32 1.0, %v1208_v36  ;;  %v872_v40 = vmul.f32 %v870_v35, %v864_v37 }
 0x857   :  { %v873_v41 = vmul.f32 %v871_v39, %v865_v38 }
 0x859   :  { %v874_v42 = vpack.c.bf16 %v873_v41, %v872_v40 }
 0x85b   :  { %1159 = vmatmul.mubr.bf16.vlgmr.msra.gmra.mrb[16].mxu0 %v874_v42 }
 0x92e   :  { %v973_v43 = vpop.f32.mrb[16].mxu0 }
 0x92f   :  { %v980_v45 = vadd.f32 %v973_v43, %v1407_v48  ;;  %v1160_v46 = vpop.f32.mrb[17].mxu0 }
 0x930   :  { %v976_v47 = vpop.f32.mrb[18].mxu0 }
 0x931   :  { %v989_v49 = vadd.f32 %v1030_v44, %v980_v45  ;;  %v981_v51 = vadd.f32 %v976_v47, %v1411_v50  ;;  %v1161_v52 = vpop.f32.mrb[19].mxu0 }
 0x933   :  { %991 = vst.msk [vmem:[%s1493_s13] sm:$0xff] %vm49_vm0, %v989_v49  ;;  %v990_v53 = vadd.f32 %v1030_v44, %v981_v51 }
 0x935   :  { %992 = vst.msk [vmem:[%s1493_s13 + $0x8] sm:$0xff] %vm49_vm0, %v990_v53 }

// kernel: clip_forward.8
= control target key start
LH: loop header
LB: loop body
LE: loop exit
PB: predicated region body
PF: predicated region fallthrough
CT: control target
= control target key end

     0   :  { %vm61_vm0 = vcmask 261120   ;;  %v1271_v46 = vmov 0.0   ;;  %vm1272_vm1 = vmmov 0   ;;  %vm240_vm2 = vcmask 130048   ;;  %s1570_s0 = inlined_call_operand.vmem [shape: f32[2,8,32], index: 0, kind: input, shape index: {}]   ;;  %s1571_s1 = inlined_call_operand.vmem [shape: f32[1,8,32], index: 1, kind: input, shape index: {}]   ;;  %s1572_s2 = inlined_call_operand.vmem [shape: f32[1,32], index: 2, kind: input, shape index: {}]   ;;  %s1573_s3 = inlined_call_operand.vmem [shape: f32[1,32], index: 3, kind: input, shape index: {}]   ;;  %s1574_s6 = inlined_call_operand.vmem [shape: bf16[32,96], index: 6, kind: input, shape index: {}]   ;;  %s1575_s4 = inlined_call_operand.vmem [shape: f32[1,32], index: 4, kind: input, shape index: {}]   ;;  %s1576_s5 = inlined_call_operand.vmem [shape: f32[1,32], index: 5, kind: input, shape index: {}]   ;;  %s1577_s7 = inlined_call_operand.vmem [shape: f32[1,96], index: 7, kind: input, shape index: {}]   ;;  %s1578_s8 = inlined_call_operand.vmem [shape: bf16[2,16,32], index: 8, kind: input, shape index: {}]   ;;  %s1579_s9 = inlined_call_operand.vmem [shape: f32[1,32], index: 9, kind: input, shape index: {}]   ;;  %s1580_s12 = inlined_call_operand.vmem [shape: bf16[32,128], index: 12, kind: input, shape index: {}]   ;;  %s1581_s14 = inlined_call_operand.vmem [shape: bf16[128,32], index: 14, kind: input, shape index: {}]   ;;  %s1582_s10 = inlined_call_operand.vmem [shape: f32[1,32], index: 10, kind: input, shape index: {}]   ;;  %s1583_s11 = inlined_call_operand.vmem [shape: f32[1,32], index: 11, kind: input, shape index: {}]   ;;  %s1584_s13 = inlined_call_operand.vmem [shape: f32[1,128], index: 13, kind: input, shape index: {}]   ;;  %s1585_s15 = inlined_call_operand.vmem [shape: f32[1,32], index: 15, kind: input, shape index: {}]   ;;  %s1586_s16 = inlined_call_operand.vmem [shape: f32[2,8,32], index: 16, kind: output, shape index: {}]  }
   0x1   :  { %1588 = sst [smem:[#allocation2_spill]] %s1570_s0  ;;  %v56_v1 = vld [vmem:[%s1571_s1] sm:$0xff]  ;;  %1124 = vmatprep.subr.bf16.mxu1 %v1271_v46  ;;  %1150 = vmatprep.subr.bf16.mxu0 %v1271_v46  ;;  %v1226_v47 = vld [vmem:[%s1574_s6 + $0x8] sm:$0xff]   ;;  %vm443_vm4 = vcmask 64512   ;;  %vm489_vm5 = vcmask 1043456  }
   0x2   :  { %s1589_s23 = sld [smem:[#allocation2_spill]]  ;;  %v1053_v24 = vld [vmem:[%s1572_s2] ss:$0 sm:$0xff]  ;;  %1128 = vmatprep.mubr.msk.bf16.mxu1 %vm1272_vm1, %v1271_v46  ;;  %1152 = vmatprep.mubr.msk.bf16.mxu0 %vm1272_vm1, %v1271_v46 }
   0x3   :  { %v1054_v26 = vld [vmem:[%s1573_s3] ss:$0 sm:$0xff] }
   0x4   :  { %v1225_v45 = vld [vmem:[%s1574_s6] sm:$0xff]  }
   0x5   :  { %1125 = vmatpush3.bf16.msra.mxu1 %v1225_v45  ;;  %v1055_v56 = vld [vmem:[%s1575_s4] ss:$0 sm:$0xff]  ;;  %s1273_s4 = smov 112  }
   0x6   :  { %1126 = vmatprep.subr.bf16.mxu1 %v1271_v46  ;;  %v1056_v60 = vld [vmem:[%s1576_s5] ss:$0 sm:$0xff]  ;;  %s1274_s5 = smov 96  }
   0x8   :  { %v54_v0 = vld [vmem:[%s1589_s23] sm:$0xff]  ;;  %v55_v2 = vld [vmem:[%s1589_s23 + $0x8] sm:$0xff] }
   0x9   :  { %v57_v3 = vadd.f32 %v56_v1, %v54_v0  ;;  %v58_v4 = vadd.f32 %v56_v1, %v55_v2  ;;  %1127 = vmatpush3.bf16.msra.mxu1 %v1226_v47  ;;  %v1057_v1 = vld [vmem:[%s1577_s7] ss:$0 sm:$0xff]  ;;  %s1275_s7 = smov 64  }
   0xa   :  { %1132 = vmatprep.subr.bf16.mxu1 %v1271_v46 }
   0xb   :  { %v62_v5 = vsel %vm61_vm0, %v57_v3, 0.0  ;;  %v65_v6 = vsel %vm61_vm0, %v58_v4, 0.0 }
   0xc   :  { %63 = vadd.xlane.f32.xlu0 %v62_v5 }
  0x10   :  { %66 = vadd.xlane.f32.xlu0 %v65_v6 }
  0x99   :  { %v64_v7 = vpop.xlane.xlu0 %63 }
  0x9a   :  { %v69_v8 = vmul.f32 0.03125, %v64_v7 }
  0x9c   :  { %v71_v9 = vsub.f32 %v57_v3, %v69_v8 }
  0x9d   :  { %v67_v10 = vpop.xlane.xlu0 %66 }
  0x9e   :  { %v70_v11 = vmul.f32 0.03125, %v67_v10  ;;  %v73_v12 = vmul.f32 %v71_v9, %v71_v9 }
  0xa0   :  { %v72_v13 = vsub.f32 %v58_v4, %v70_v11  ;;  %v75_v14 = vsel %vm61_vm0, %v73_v12, 0.0 }
  0xa1   :  { %76 = vadd.xlane.f32.xlu1 %v75_v14 }
  0xa2   :  { %v74_v15 = vmul.f32 %v72_v13, %v72_v13 }
  0xa4   :  { %v78_v16 = vsel %vm61_vm0, %v74_v15, 0.0 }
  0xa5   :  { %79 = vadd.xlane.f32.xlu1 %v78_v16 }
 0x12e   :  { %v77_v17 = vpop.xlane.xlu1 %76 }
 0x12f   :  { %v81_v18 = vmul.f32 0.03125, %v77_v17 }
 0x131   :  { %v83_v19 = vadd.f32 1e-05, %v81_v18 }
 0x132   :  { %v80_v20 = vpop.xlane.xlu1 %79 }
 0x133   :  { %1239 = vrsqrt.f32 %v83_v19  ;;  %v82_v21 = vmul.f32 0.03125, %v80_v20 }
 0x135   :  { %v84_v22 = vadd.f32 1e-05, %v82_v21 }
 0x137   :  { %1241 = vrsqrt.f32 %v84_v22 }
 0x13d   :  { %v1240_v23 = vpop.eup %1239 }
 0x13e   :  { %v87_v25 = vmul.f32 %v1240_v23, %v71_v9 }
 0x140   :  { %v95_v27 = vmul.f32 %v1053_v24, %v87_v25 }
 0x141   :  { %v1242_v28 = vpop.eup %1241 }
 0x142   :  { %v1380_v29 = vadd.f32 %v1054_v26, %v95_v27  ;;  %v88_v30 = vmul.f32 %v1242_v28, %v72_v13 }
 0x144   :  { %v107_v31 = vsel %vm61_vm0, %v1380_v29, 0.0  ;;  %v96_v32 = vmul.f32 %v1053_v24, %v88_v30 }
 0x145   :  { %108 = vadd.xlane.f32.xlu0 %v107_v31  ;;  %v434_v31 = vlaneseq }
 0x146   :  { %v1384_v33 = vadd.f32 %v1054_v26, %v96_v32 }
 0x147   :  { %v435_v32 = vand.u32 127, %v434_v31 }
 0x148   :  { %v110_v34 = vsel %vm61_vm0, %v1384_v33, 0.0 }
 0x149   :  { %111 = vadd.xlane.f32.xlu1 %v110_v34  ;;  %vm436_vm3 = vcmp.lt.s32.totalorder %v435_v32, 5 }
 0x1d2   :  { %v109_v35 = vpop.xlane.xlu0 %108 }
 0x1d3   :  { %v113_v36 = vmul.f32 0.03125, %v109_v35 }
 0x1d5   :  { %v115_v37 = vsub.f32 %v1380_v29, %v113_v36 }
 0x1d6   :  { %v112_v38 = vpop.xlane.xlu1 %111 }
 0x1d7   :  { %v114_v39 = vmul.f32 0.03125, %v112_v38  ;;  %v117_v40 = vmul.f32 %v115_v37, %v115_v37 }
 0x1d9   :  { %v116_v41 = vsub.f32 %v1384_v33, %v114_v39  ;;  %v119_v42 = vsel %vm61_vm0, %v117_v40, 0.0 }
 0x1da   :  { %120 = vadd.xlane.f32.xlu0 %v119_v42 }
 0x1db   :  { %v118_v43 = vmul.f32 %v116_v41, %v116_v41 }
 0x1dd   :  { %v122_v44 = vsel %vm61_vm0, %v118_v43, 0.0 }
 0x1de   :  { %123 = vadd.xlane.f32.xlu1 %v122_v44 }
 0x267   :  { %v121_v48 = vpop.xlane.xlu0 %120 }
 0x268   :  { %v125_v49 = vmul.f32 0.03125, %v121_v48 }
 0x26a   :  { %v127_v50 = vadd.f32 1e-05, %v125_v49 }
 0x26b   :  { %v124_v51 = vpop.xlane.xlu1 %123 }
 0x26c   :  { %1243 = vrsqrt.f32 %v127_v50  ;;  %v126_v52 = vmul.f32 0.03125, %v124_v51 }
 0x26e   :  { %v128_v53 = vadd.f32 1e-05, %v126_v52 }
 0x270   :  { %1245 = vrsqrt.f32 %v128_v53 }
 0x276   :  { %v1244_v54 = vpop.eup %1243 }
 0x277   :  { %v131_v55 = vmul.f32 %v1244_v54, %v115_v37 }
 0x279   :  { %v139_v59 = vmul.f32 %v1055_v56, %v131_v55 }
 0x27a   :  { %v1246_v57 = vpop.eup %1245 }
 0x27b   :  { %v132_v58 = vmul.f32 %v1246_v57, %v116_v41  ;;  %v147_v62 = vadd.f32 %v1056_v60, %v139_v59 }
 0x27d   :  { %v140_v61 = vmul.f32 %v1055_v56, %v132_v58 }
 0x27f   :  { %v148_v63 = vadd.f32 %v1056_v60, %v140_v61 }
 0x281   :  { %v149_v0 = vpack.c.bf16 %v148_v63, %v147_v62 }
 0x283   :  { %1129 = vmatmul.mubr.msk.bf16.vlgmr.msra.gmra.mrb[0].mxu1 %vm61_vm0, %v149_v0 }
 0x284   :  { %1134 = vmatprep.mubr.msk.bf16.mxu1 %vm1272_vm1, %v1271_v46 }
 0x356   :  { %v210_v2 = vpop.f32.mrb[0].mxu1 }
 0x357   :  { %v211_v3 = vadd.f32 %v1057_v1, %v210_v2  ;;  %v1130_v4 = vpop.f32.mrb[1].mxu1 }
 0x358   :  { %v213_v5 = vpop.f32.mrb[2].mxu1 }
 0x359   :  { %v214_v6 = vadd.f32 %v1057_v1, %v213_v5  ;;  %219 = vrot.lane.b32.xlu0 %v211_v3, %s1273_s4  ;;  %v1131_v7 = vpop.f32.mrb[3].mxu1  ;;  %v1418_v8 = vpack.c.bf16 %v211_v3, %v211_v3  ;;  %v225_v16 = vmul.f32 0.25, %v211_v3 }
 0x35b   :  { %221 = vrot.lane.b32.xlu1 %v214_v6, %s1273_s4  ;;  %v234_v9 = vpack.c.bf16 %v214_v6, %v214_v6  ;;  %v229_v18 = vpack.c.bf16 %v225_v16, %v225_v16  ;;  %v226_v20 = vmul.f32 0.25, %v214_v6 }
 0x35d   :  { %v230_v21 = vpack.c.bf16 %v226_v20, %v226_v20 }
 0x35f   :  { %238 = vrot.lane.b32.xlu1 %v1418_v8, %s1274_s5 }
 0x363   :  { %288 = vrot.lane.b32.xlu1 %v234_v9, %s1274_s5 }
 0x3cb   :  { %v220_v10 = vpop.permute.xlu0 %219 }
 0x3cc   :  { %v235_v11 = vpack.c.bf16 %v220_v10, %v220_v10  ;;  %v227_v25 = vmul.f32 0.25, %v220_v10 }
 0x3cd   :  { %v222_v12 = vpop.permute.xlu1 %221 }
 0x3ce   :  { %v236_v13 = vpack.c.bf16 %v222_v12, %v222_v12  ;;  %337 = vrot.lane.b32.xlu0 %v235_v11, %s1274_s5  ;;  %v228_v27 = vmul.f32 0.25, %v222_v12  ;;  %v231_v28 = vpack.c.bf16 %v227_v25, %v227_v25 }
 0x3d0   :  { %386 = vrot.lane.b32.xlu1 %v236_v13, %s1274_s5  ;;  %v232_v30 = vpack.c.bf16 %v228_v27, %v228_v27  ;;  %v1227_v27 = vld [vmem:[%s1578_s8] sm:$0xff]  }
 0x3d1   :  { %v239_v14 = vpop.permute.xlu1 %238 }
 0x3d2   :  { %v245_v15 = vsel %vm240_vm2, %v239_v14, 0 }
 0x3d3   :  { %1133 = vmatpush3.bf16.xpose.msra.mxu1 %v245_v15 }
 0x3d4   :  { %1138 = vmatprep.subr.bf16.mxu1 %v1271_v46 }
 0x3d5   :  { %v289_v17 = vpop.permute.xlu1 %288 }
 0x3d6   :  { %v294_v19 = vsel %vm240_vm2, %v289_v17, 0 }
 0x3da   :  { %1135 = vmatmul.mubr.msk.bf16.vlgmr.msra.gmra.mrb[4].mxu1 %vm240_vm2, %v229_v18 }
 0x3db   :  { %1139 = vmatpush3.bf16.xpose.msra.mxu1 %v294_v19  ;;  %1140 = vmatprep.mubr.msk.bf16.mxu1 %vm1272_vm1, %v1271_v46 }
 0x3dc   :  { %1144 = vmatprep.subr.bf16.mxu1 %v1271_v46 }
 0x3e2   :  { %1141 = vmatmul.mubr.msk.bf16.vlgmr.msra.gmra.mrb[8].mxu1 %vm240_vm2, %v230_v21 }
 0x3e3   :  { %1146 = vmatprep.mubr.msk.bf16.mxu1 %vm1272_vm1, %v1271_v46 }
 0x440   :  { %v338_v22 = vpop.permute.xlu0 %337 }
 0x441   :  { %v343_v23 = vsel %vm240_vm2, %v338_v22, 0 }
 0x442   :  { %v387_v24 = vpop.permute.xlu1 %386  ;;  %1145 = vmatpush3.bf16.xpose.msra.mxu1 %v343_v23 }
 0x443   :  { %v392_v26 = vsel %vm240_vm2, %v387_v24, 0  ;;  %1156 = vmatprep.subr.bf16.mxu1 %v1271_v46 }
 0x444   :  { %1151 = vmatpush3.bf16.xpose.msra.mxu0 %v392_v26 }
 0x445   :  { %1162 = vmatprep.subr.bf16.mxu0 %v1271_v46 }
 0x449   :  { %1147 = vmatmul.mubr.msk.bf16.vlgmr.msra.gmra.mrb[12].mxu1 %vm240_vm2, %v231_v28  ;;  %v1228_v28 = vld [vmem:[%s1578_s8 + $0x8] sm:$0xff]  }
 0x44a   :  { %1158 = vmatprep.mubr.msk.bf16.mxu1 %vm1272_vm1, %v1271_v46 }
 0x44b   :  { %1153 = vmatmul.mubr.msk.bf16.vlgmr.msra.gmra.mrb[0].mxu0 %vm240_vm2, %v232_v30 }
 0x44c   :  { %1164 = vmatprep.mubr.msk.bf16.mxu0 %vm1272_vm1, %v1271_v46 }
 0x4ad   :  { %v281_v34 = vpop.f32.mrb[4].mxu1 }
 0x4ae   :  { %v439_v35 = vsel %vm436_vm3, %v281_v34, -1e+30  ;;  %v1136_v36 = vpop.f32.mrb[5].mxu1 }
 0x4af   :  { %v284_v37 = vpop.f32.mrb[6].mxu1  ;;  %v444_v38 = vsel %vm443_vm4, %v439_v35, -inf }
 0x4b0   :  { %445 = vmax.xlane.f32.xlu0 %v444_v38  ;;  %v1137_v39 = vpop.f32.mrb[7].mxu1 }
 0x4b5   :  { %v330_v40 = vpop.f32.mrb[8].mxu1 }
 0x4b6   :  { %v440_v41 = vsel %vm436_vm3, %v330_v40, -1e+30  ;;  %v1142_v42 = vpop.f32.mrb[9].mxu1 }
 0x4b7   :  { %v333_v43 = vpop.f32.mrb[10].mxu1  ;;  %v447_v44 = vsel %vm443_vm4, %v440_v41, -inf }
 0x4b8   :  { %448 = vmax.xlane.f32.xlu1 %v447_v44  ;;  %v1143_v45 = vpop.f32.mrb[11].mxu1 }
 0x4c9   :  { %533 = vrot.lane.b32.xlu1 %v234_v9, %s1275_s7 }
 0x4cd   :  { %581 = vrot.lane.b32.xlu1 %v235_v11, %s1275_s7 }
 0x4d1   :  { %629 = vrot.lane.b32.xlu1 %v236_v13, %s1275_s7 }
 0x51c   :  { %v379_v47 = vpop.f32.mrb[12].mxu1 }
 0x51d   :  { %v441_v48 = vsel %vm436_vm3, %v379_v47, -1e+30  ;;  %v1148_v49 = vpop.f32.mrb[13].mxu1 }
 0x51e   :  { %v382_v50 = vpop.f32.mrb[14].mxu1  ;;  %v428_v51 = vpop.f32.mrb[0].mxu0  ;;  %v450_v52 = vsel %vm443_vm4, %v441_v48, -inf }
 0x51f   :  { %v442_v53 = vsel %vm436_vm3, %v428_v51, -1e+30  ;;  %v1154_v54 = vpop.f32.mrb[1].mxu0  ;;  %451 = vmax.xlane.f32.xlu0 %v450_v52  ;;  %v1149_v55 = vpop.f32.mrb[15].mxu1 }
 0x520   :  { %v431_v56 = vpop.f32.mrb[2].mxu0  ;;  %v453_v58 = vsel %vm443_vm4, %v442_v53, -inf }
 0x521   :  { %v1155_v57 = vpop.f32.mrb[3].mxu0 }
 0x523   :  { %454 = vmax.xlane.f32.xlu0 %v453_v58 }
 0x539   :  { %484 = vrot.lane.b32.xlu0 %v1418_v8, %s1275_s7 }
 0x53d   :  { %v446_v59 = vpop.xlane.xlu0 %445 }
 0x53e   :  { %v456_v60 = vsub.f32 %v439_v35, %v446_v59 }
 0x540   :  { %v460_v61 = vmul.f32 1.442695, %v456_v60 }
 0x542   :  { %1247 = vpow2.f32 %v460_v61 }
 0x545   :  { %v449_v62 = vpop.xlane.xlu1 %448 }
 0x546   :  { %v457_v63 = vsub.f32 %v440_v41, %v449_v62 }
 0x548   :  { %v462_v0 = vmul.f32 1.442695, %v457_v63 }
 0x549   :  { %v534_v1 = vpop.permute.xlu1 %533 }
 0x54a   :  { %1249 = vpow2.f32 %v462_v0  ;;  %v539_v2 = vsel %vm489_vm5, %v534_v1, 0 }
 0x54b   :  { %1163 = vmatpush3.bf16.msra.mxu0 %v539_v2 }
 0x54c   :  { %1174 = vmatprep.subr.bf16.mxu0 %v1271_v46  ;;  %v1248_v4 = vpop.eup %1247 }
 0x54d   :  { %v582_v3 = vpop.permute.xlu1 %581  ;;  %v468_v10 = vsel %vm443_vm4, %v1248_v4, 0.0  ;;  %v480_v19 = vpack.c.bf16 %v1248_v4, %v1248_v4 }
 0x54e   :  { %v587_v20 = vsel %vm489_vm5, %v582_v3, 0 }
 0x551   :  { %v630_v6 = vpop.permute.xlu1 %629 }
 0x552   :  { %v635_v9 = vsel %vm489_vm5, %v630_v6, 0 }
 0x554   :  { %v1250_v5 = vpop.eup %1249 }
 0x555   :  { %v471_v7 = vsel %vm443_vm4, %v1250_v5, 0.0  ;;  %v481_v8 = vpack.c.bf16 %v1250_v5, %v1250_v5 }
 0x556   :  { %472 = vadd.xlane.f32.xlu1 %v471_v7 }
 0x557   :  { %1165 = vmatmul.mubr.msk.bf16.vlgmr.msra.gmra.mrb[4].mxu0 %vm443_vm4, %v481_v8 }
 0x558   :  { %1175 = vmatpush3.bf16.msra.mxu0 %v635_v9  ;;  %469 = vadd.xlane.f32.xlu0 %v468_v10 }
 0x559   :  { %1176 = vmatprep.mubr.msk.bf16.mxu0 %vm1272_vm1, %v1271_v46  ;;  %1186 = vmatprep.subr.bf16.mxu0 %v1271_v46 }
 0x5ac   :  { %v452_v11 = vpop.xlane.xlu0 %451 }
 0x5ad   :  { %v458_v12 = vsub.f32 %v441_v48, %v452_v11  ;;  %v1073_v11 = vld [vmem:[%s1579_s9] ss:$0 sm:$0xff] }
 0x5af   :  { %v464_v13 = vmul.f32 1.442695, %v458_v12 }
 0x5b0   :  { %v455_v14 = vpop.xlane.xlu0 %454 }
 0x5b1   :  { %1251 = vpow2.f32 %v464_v13  ;;  %v459_v15 = vsub.f32 %v442_v53, %v455_v14 }
 0x5b3   :  { %v466_v16 = vmul.f32 1.442695, %v459_v15 }
 0x5b4   :  { %v485_v17 = vpop.permute.xlu0 %484 }
 0x5b5   :  { %1253 = vpow2.f32 %v466_v16  ;;  %v491_v18 = vsel %vm489_vm5, %v485_v17, 0 }
 0x5b6   :  { %1157 = vmatpush3.bf16.msra.mxu1 %v491_v18 }
 0x5b7   :  { %1168 = vmatprep.subr.bf16.mxu1 %v1271_v46 }
 0x5b9   :  { %1159 = vmatmul.mubr.msk.bf16.vlgmr.msra.gmra.mrb[16].mxu1 %vm443_vm4, %v480_v19 }
 0x5ba   :  { %1169 = vmatpush3.bf16.msra.mxu1 %v587_v20  ;;  %1170 = vmatprep.mubr.msk.bf16.mxu1 %vm1272_vm1, %v1271_v46 }
 0x5bb   :  { %v1252_v21 = vpop.eup %1251  ;;  %1180 = vmatprep.subr.bf16.mxu1 %v1271_v46 }
 0x5bc   :  { %v474_v22 = vsel %vm443_vm4, %v1252_v21, 0.0  ;;  %v482_v24 = vpack.c.bf16 %v1252_v21, %v1252_v21 }
 0x5bd   :  { %475 = vadd.xlane.f32.xlu0 %v474_v22 }
 0x5bf   :  { %v1254_v23 = vpop.eup %1253 }
 0x5c0   :  { %v477_v25 = vsel %vm443_vm4, %v1254_v23, 0.0  ;;  %v483_v26 = vpack.c.bf16 %v1254_v23, %v1254_v23 }
 0x5c1   :  { %478 = vadd.xlane.f32.xlu0 %v477_v25  ;;  %1171 = vmatmul.mubr.msk.bf16.vlgmr.msra.gmra.mrb[20].mxu1 %vm443_vm4, %v482_v24 }
 0x5c2   :  { %1177 = vmatmul.mubr.msk.bf16.vlgmr.msra.gmra.mrb[8].mxu0 %vm443_vm4, %v483_v26  ;;  %1182 = vmatprep.mubr.msk.bf16.mxu1 %vm1272_vm1, %v1271_v46 }
 0x5c3   :  { %1188 = vmatprep.mubr.msk.bf16.mxu0 %vm1272_vm1, %v1271_v46  ;;  %1181 = vmatpush3.bf16.msra.mxu1 %v1227_v27  ;;  %v1229_v27 = vld [vmem:[%s1580_s12] sm:$0xff]  }
 0x5c4   :  { %1192 = vmatprep.subr.bf16.mxu1 %v1271_v46  ;;  %1187 = vmatpush3.bf16.msra.mxu0 %v1228_v28  ;;  %v1230_v28 = vld [vmem:[%s1580_s12 + $0x8] sm:$0xff]  }
 0x5c5   :  { %1200 = vmatprep.subr.bf16.mxu0 %v1271_v46 }
 0x5e3   :  { %v473_v35 = vpop.xlane.xlu1 %472 }
 0x5e4   :  { %1255 = vrcp.f32 %v473_v35 }
 0x5e5   :  { %v470_v36 = vpop.xlane.xlu0 %469 }
 0x5e6   :  { %1257 = vrcp.f32 %v470_v36 }
 0x5ee   :  { %v1256_v39 = vpop.eup %1255 }
 0x5f0   :  { %v1258_v40 = vpop.eup %1257 }
 0x62a   :  { %v575_v30 = vpop.f32.mrb[4].mxu0 }
 0x62b   :  { %v1166_v31 = vpop.f32.mrb[5].mxu0  ;;  %v682_v42 = vmul.f32 %v1256_v39, %v575_v30  ;;  %v1231_v30 = vld [vmem:[%s1581_s14] sm:$0xff]  }
 0x62c   :  { %v578_v32 = vpop.f32.mrb[6].mxu0  ;;  %v1232_v31 = vld [vmem:[%s1581_s14 + $0x8] sm:$0xff]  }
 0x62d   :  { %v1167_v34 = vpop.f32.mrb[7].mxu0 }
 0x64a   :  { %v476_v37 = vpop.xlane.xlu0 %475 }
 0x64b   :  { %1259 = vrcp.f32 %v476_v37 }
 0x64e   :  { %v479_v38 = vpop.xlane.xlu0 %478 }
 0x64f   :  { %1261 = vrcp.f32 %v479_v38 }
 0x655   :  { %v1260_v49 = vpop.eup %1259 }
 0x659   :  { %v1262_v51 = vpop.eup %1261 }
 0x68c   :  { %v527_v41 = vpop.f32.mrb[16].mxu1 }
 0x68d   :  { %v681_v43 = vmul.f32 %v1258_v40, %v527_v41  ;;  %v1160_v44 = vpop.f32.mrb[17].mxu1  ;;  %v1074_v40 = vld [vmem:[%s1582_s10] ss:$0 sm:$0xff] }
 0x68e   :  { %v530_v45 = vpop.f32.mrb[18].mxu1 }
 0x68f   :  { %v685_v47 = vpack.c.bf16 %v682_v42, %v681_v43  ;;  %v1161_v48 = vpop.f32.mrb[19].mxu1  ;;  %v1075_v45 = vld [vmem:[%s1583_s11] ss:$0 sm:$0xff] }
 0x691   :  { %1183 = vmatmul.mubr.msk.bf16.vlgmr.msra.gmra.mrb[24].mxu1 %vm240_vm2, %v685_v47 }
 0x692   :  { %1196 = vmatprep.mubr.msk.bf16.mxu1 %vm1272_vm1, %v1271_v46  ;;  %1193 = vmatpush3.bf16.msra.mxu1 %v1229_v27 }
 0x693   :  { %1194 = vmatprep.subr.bf16.mxu1 %v1271_v46 }
 0x694   :  { %v623_v50 = vpop.f32.mrb[20].mxu1 }
 0x695   :  { %v683_v52 = vmul.f32 %v1260_v49, %v623_v50  ;;  %v1172_v53 = vpop.f32.mrb[21].mxu1  ;;  %v671_v54 = vpop.f32.mrb[8].mxu0 }
 0x696   :  { %v684_v55 = vmul.f32 %v1262_v51, %v671_v54  ;;  %v626_v56 = vpop.f32.mrb[22].mxu1  ;;  %v1178_v57 = vpop.f32.mrb[9].mxu0  ;;  %1195 = vmatpush3.bf16.msra.mxu1 %v1230_v28  ;;  %v1233_v51 = vld [vmem:[%s1581_s14 + $0x10] sm:$0xff]   ;;  %v1235_v53 = vld [vmem:[%s1581_s14 + $0x20] sm:$0xff]   ;;  %v1236_v54 = vld [vmem:[%s1581_s14 + $0x28] sm:$0xff]  }
 0x697   :  { %v1173_v58 = vpop.f32.mrb[23].mxu1  ;;  %v674_v59 = vpop.f32.mrb[10].mxu0  ;;  %v1238_v56 = vld [vmem:[%s1581_s14 + $0x38] sm:$0xff]   ;;  %v1076_v57 = vld [vmem:[%s1584_s13] ss:$0 sm:$0xff] }
 0x698   :  { %v686_v60 = vpack.c.bf16 %v684_v55, %v683_v52  ;;  %v1179_v61 = vpop.f32.mrb[11].mxu0  ;;  %v1234_v52 = vld [vmem:[%s1581_s14 + $0x18] sm:$0xff]   ;;  %v1237_v55 = vld [vmem:[%s1581_s14 + $0x30] sm:$0xff]  }
 0x69a   :  { %1189 = vmatmul.mubr.msk.bf16.vlgmr.msra.gmra.mrb[12].mxu0 %vm240_vm2, %v686_v60 }
 0x69b   :  { %1216 = vmatprep.mubr.msk.bf16.mxu0 %vm1272_vm1, %v1271_v46  ;;  %1201 = vmatpush3.bf16.msra.mxu0 %v1231_v30 }
 0x69c   :  { %1202 = vmatprep.subr.bf16.mxu0 %v1271_v46 }
 0x69f   :  { %1203 = vmatpush3.bf16.msra.mxu0 %v1232_v31 }
 0x6a0   :  { %1204 = vmatprep.subr.bf16.mxu0 %v1271_v46 }
 0x6a3   :  { %1205 = vmatpush3.bf16.msra.mxu0 %v1233_v51 }
 0x6a4   :  { %1206 = vmatprep.subr.bf16.mxu0 %v1271_v46 }
 0x6a7   :  { %1207 = vmatpush3.bf16.msra.mxu0 %v1234_v52 }
 0x6a8   :  { %1208 = vmatprep.subr.bf16.mxu0 %v1271_v46 }
 0x6ab   :  { %1209 = vmatpush3.bf16.msra.mxu0 %v1235_v53 }
 0x6ac   :  { %1210 = vmatprep.subr.bf16.mxu0 %v1271_v46 }
 0x6af   :  { %1211 = vmatpush3.bf16.msra.mxu0 %v1236_v54 }
 0x6b0   :  { %1212 = vmatprep.subr.bf16.mxu0 %v1271_v46 }
 0x6b3   :  { %1213 = vmatpush3.bf16.msra.mxu0 %v1237_v55 }
 0x6b4   :  { %1214 = vmatprep.subr.bf16.mxu0 %v1271_v46 }
 0x6b7   :  { %1215 = vmatpush3.bf16.msra.mxu0 %v1238_v56 }
 0x764   :  { %v734_v62 = vpop.f32.mrb[24].mxu1 }
 0x765   :  { %v1184_v63 = vpop.f32.mrb[25].mxu1  ;;  %v791_v3 = vsel %vm61_vm0, %v734_v62, 0.0 }
 0x766   :  { %v737_v0 = vpop.f32.mrb[26].mxu1 }
 0x767   :  { %v1185_v1 = vpop.f32.mrb[27].mxu1  ;;  %v794_v8 = vsel %vm61_vm0, %v737_v0, 0.0 }
 0x76d   :  { %v784_v2 = vpop.f32.mrb[12].mxu0 }
 0x76e   :  { %v792_v4 = vsel %vm61_vm0, %v784_v2, 0.0  ;;  %v1190_v5 = vpop.f32.mrb[13].mxu0 }
 0x76f   :  { %v793_v6 = vadd.f32 %v792_v4, %v791_v3  ;;  %v787_v7 = vpop.f32.mrb[14].mxu0 }
 0x770   :  { %v795_v9 = vsel %vm61_vm0, %v787_v7, 0.0  ;;  %v1191_v10 = vpop.f32.mrb[15].mxu0 }
 0x771   :  { %v797_v12 = vadd.f32 %v793_v6, %v1380_v29  ;;  %v796_v13 = vadd.f32 %v795_v9, %v794_v8 }
 0x773   :  { %v798_v14 = vadd.f32 %v796_v13, %v1384_v33  ;;  %v1497_v15 = vadd.f32 %v1073_v11, %v797_v12 }
 0x775   :  { %v810_v16 = vsel %vm61_vm0, %v1497_v15, 0.0  ;;  %v1501_v17 = vadd.f32 %v1073_v11, %v798_v14  ;;  %v1088_v11 = vld [vmem:[%s1585_s15] ss:$0 sm:$0xff] }
 0x776   :  { %811 = vadd.xlane.f32.xlu0 %v810_v16 }
 0x777   :  { %v813_v18 = vsel %vm61_vm0, %v1501_v17, 0.0 }
 0x778   :  { %814 = vadd.xlane.f32.xlu1 %v813_v18 }
 0x803   :  { %v812_v19 = vpop.xlane.xlu0 %811 }
 0x804   :  { %v816_v20 = vmul.f32 0.03125, %v812_v19 }
 0x805   :  { %v815_v21 = vpop.xlane.xlu1 %814 }
 0x806   :  { %v818_v29 = vsub.f32 %v1497_v15, %v816_v20  ;;  %v817_v22 = vmul.f32 0.03125, %v815_v21 }
 0x808   :  { %v819_v33 = vsub.f32 %v1501_v17, %v817_v22  ;;  %v820_v23 = vmul.f32 %v818_v29, %v818_v29 }
 0x80a   :  { %v822_v24 = vsel %vm61_vm0, %v820_v23, 0.0  ;;  %v821_v25 = vmul.f32 %v819_v33, %v819_v33 }
 0x80b   :  { %823 = vadd.xlane.f32.xlu0 %v822_v24 }
 0x80c   :  { %v825_v26 = vsel %vm61_vm0, %v821_v25, 0.0 }
 0x80d   :  { %826 = vadd.xlane.f32.xlu1 %v825_v26 }
 0x898   :  { %v824_v32 = vpop.xlane.xlu0 %823 }
 0x899   :  { %v828_v34 = vmul.f32 0.03125, %v824_v32 }
 0x89a   :  { %v827_v35 = vpop.xlane.xlu1 %826 }
 0x89b   :  { %v830_v36 = vadd.f32 1e-05, %v828_v34  ;;  %v829_v37 = vmul.f32 0.03125, %v827_v35 }
 0x89d   :  { %1263 = vrsqrt.f32 %v830_v36  ;;  %v831_v38 = vadd.f32 1e-05, %v829_v37 }
 0x89f   :  { %1265 = vrsqrt.f32 %v831_v38 }
 0x8a7   :  { %v1264_v39 = vpop.eup %1263 }
 0x8a8   :  { %v834_v41 = vmul.f32 %v1264_v39, %v818_v29 }
 0x8a9   :  { %v1266_v42 = vpop.eup %1265 }
 0x8aa   :  { %v842_v43 = vmul.f32 %v1074_v40, %v834_v41  ;;  %v835_v44 = vmul.f32 %v1266_v42, %v819_v33 }
 0x8ac   :  { %v843_v47 = vmul.f32 %v1074_v40, %v835_v44  ;;  %v850_v48 = vadd.f32 %v1075_v45, %v842_v43 }
 0x8ae   :  { %v851_v49 = vadd.f32 %v1075_v45, %v843_v47 }
 0x8b0   :  { %v852_v50 = vpack.c.bf16 %v851_v49, %v850_v48 }
 0x8b2   :  { %1197 = vmatmul.mubr.msk.bf16.vlgmr.msra.gmra.mrb[28].mxu1 %vm61_vm0, %v852_v50 }
 0x985   :  { %v913_v58 = vpop.f32.mrb[28].mxu1 }
 0x986   :  { %v914_v59 = vadd.f32 %v1076_v57, %v913_v58  ;;  %v1198_v60 = vpop.f32.mrb[29].mxu1 }
 0x987   :  { %v916_v61 = vpop.f32.mrb[30].mxu1 }
 0x988   :  { %v922_v62 = vmul.f32 0.70710677, %v914_v59  ;;  %v917_v63 = vadd.f32 %v1076_v57, %v916_v61  ;;  %v1199_v0 = vpop.f32.mrb[31].mxu1  ;;  %v920_v4 = vmul.f32 0.5, %v914_v59 }
 0x98a   :  { %1267 = verf.f32 %v922_v62  ;;  %v923_v1 = vmul.f32 0.70710677, %v917_v63  ;;  %v921_v5 = vmul.f32 0.5, %v917_v63 }
 0x98c   :  { %1269 = verf.f32 %v923_v1 }
 0x994   :  { %v1268_v46 = vpop.eup %1267 }
 0x995   :  { %v926_v2 = vadd.f32 1.0, %v1268_v46 }
 0x996   :  { %v1270_v3 = vpop.eup %1269 }
 0x997   :  { %v927_v6 = vadd.f32 1.0, %v1270_v3  ;;  %v928_v7 = vmul.f32 %v926_v2, %v920_v4 }
 0x999   :  { %v929_v8 = vmul.f32 %v927_v6, %v921_v5 }
 0x99b   :  { %v930_v9 = vpack.c.bf16 %v929_v8, %v928_v7 }
 0x99d   :  { %1217 = vmatmul.mubr.bf16.vlgmr.msra.gmra.mrb[16].mxu0 %v930_v9 }
 0xa70   :  { %v1029_v10 = vpop.f32.mrb[16].mxu0 }
 0xa71   :  { %v1036_v12 = vadd.f32 %v1029_v10, %v1497_v15  ;;  %v1218_v13 = vpop.f32.mrb[17].mxu0 }
 0xa72   :  { %v1032_v14 = vpop.f32.mrb[18].mxu0 }
 0xa73   :  { %v1045_v16 = vadd.f32 %v1088_v11, %v1036_v12  ;;  %v1037_v18 = vadd.f32 %v1032_v14, %v1501_v17  ;;  %v1219_v19 = vpop.f32.mrb[19].mxu0 }
 0xa75   :  { %1047 = vst.msk [vmem:[%s1586_s16] sm:$0xff] %vm61_vm0, %v1045_v16  ;;  %v1046_v20 = vadd.f32 %v1088_v11, %v1037_v18 }
 0xa77   :  { %1048 = vst.msk [vmem:[%s1586_s16 + $0x8] sm:$0xff] %vm61_vm0, %v1046_v20 }

// kernel: clip_forward.11
= control target key start
LH: loop header
LB: loop body
LE: loop exit
PB: predicated region body
PF: predicated region fallthrough
CT: control target
= control target key end

     0   :  { %vm49_vm0 = vcmask 261120   ;;  %v1213_v15 = vmov 0.0   ;;  %vm1214_vm1 = vmmov 0   ;;  %vm184_vm2 = vcmask 130048   ;;  %s1492_s0 = inlined_call_operand.vmem [shape: f32[2,8,32], index: 0, kind: input, shape index: {}]   ;;  %s1493_s3 = inlined_call_operand.vmem [shape: bf16[32,96], index: 3, kind: input, shape index: {}]   ;;  %s1494_s1 = inlined_call_operand.vmem [shape: f32[1,32], index: 1, kind: input, shape index: {}]   ;;  %s1495_s2 = inlined_call_operand.vmem [shape: f32[1,32], index: 2, kind: input, shape index: {}]   ;;  %s1496_s4 = inlined_call_operand.vmem [shape: f32[1,96], index: 4, kind: input, shape index: {}]   ;;  %s1497_s5 = inlined_call_operand.vmem [shape: bf16[2,16,32], index: 5, kind: input, shape index: {}]   ;;  %s1498_s6 = inlined_call_operand.vmem [shape: f32[1,32], index: 6, kind: input, shape index: {}]   ;;  %s1499_s9 = inlined_call_operand.vmem [shape: bf16[32,128], index: 9, kind: input, shape index: {}]   ;;  %s1500_s11 = inlined_call_operand.vmem [shape: bf16[128,32], index: 11, kind: input, shape index: {}]   ;;  %s1501_s7 = inlined_call_operand.vmem [shape: f32[1,32], index: 7, kind: input, shape index: {}]   ;;  %s1502_s8 = inlined_call_operand.vmem [shape: f32[1,32], index: 8, kind: input, shape index: {}]   ;;  %s1503_s10 = inlined_call_operand.vmem [shape: f32[1,128], index: 10, kind: input, shape index: {}]   ;;  %s1504_s12 = inlined_call_operand.vmem [shape: f32[1,32], index: 12, kind: input, shape index: {}]   ;;  %s1505_s13 = inlined_call_operand.vmem [shape: f32[2,8,32], index: 13, kind: output, shape index: {}]  }
   0x1   :  { %v1291_v0 = vld [vmem:[%s1492_s0] sm:$0xff]  ;;  %v1296_v1 = vld [vmem:[%s1492_s0 + $0x8] sm:$0xff]  ;;  %1070 = vmatprep.subr.bf16.mxu1 %v1213_v15  ;;  %1096 = vmatprep.subr.bf16.mxu0 %v1213_v15  ;;  %v378_v63 = vlaneseq  ;;  %vm391_vm6 = vcmask 64512   ;;  %vm437_vm7 = vcmask 1043456  }
   0x2   :  { %v50_v2 = vsel %vm49_vm0, %v1291_v0, 0.0  ;;  %v53_v3 = vsel %vm49_vm0, %v1296_v1, 0.0  ;;  %v1171_v14 = vld [vmem:[%s1493_s3] sm:$0xff]   ;;  %v1172_v16 = vld [vmem:[%s1493_s3 + $0x8] sm:$0xff]   ;;  %1074 = vmatprep.mubr.msk.bf16.mxu1 %vm1214_vm1, %v1213_v15  ;;  %1098 = vmatprep.mubr.msk.bf16.mxu0 %vm1214_vm1, %v1213_v15 }
   0x3   :  { %51 = vadd.xlane.f32.xlu0 %v50_v2  ;;  %1071 = vmatpush3.bf16.msra.mxu1 %v1171_v14  ;;  %v1001_v25 = vld [vmem:[%s1494_s1] ss:$0 sm:$0xff]  ;;  %s1215_s1 = smov 112   ;;  %v379_v2 = vand.u32 127, %v378_v63 }
   0x4   :  { %1072 = vmatprep.subr.bf16.mxu1 %v1213_v15  ;;  %v1002_v29 = vld [vmem:[%s1495_s2] ss:$0 sm:$0xff]  ;;  %s1216_s2 = smov 96  }
   0x5   :  { %v1003_v34 = vld [vmem:[%s1496_s4] ss:$0 sm:$0xff]  ;;  %vm380_vm3 = vcmp.lt.s32.totalorder %v379_v2, 8  ;;  %s1217_s4 = smov 64  }
   0x7   :  { %54 = vadd.xlane.f32.xlu0 %v53_v3  ;;  %1073 = vmatpush3.bf16.msra.mxu1 %v1172_v16  ;;  %v382_v3 = vshrl.u32 %v378_v63, 7  ;;  %v1174_v63 = vld [vmem:[%s1497_s5 + $0x8] sm:$0xff]  }
   0x8   :  { %1078 = vmatprep.subr.bf16.mxu1 %v1213_v15 }
   0x9   :  { %vm383_vm4 = vcmp.le.s32.totalorder %v379_v2, %v382_v3 }
   0xa   :  { %vm1355_vm5 = vmand %vm380_vm3, %vm383_vm4 }
  0x90   :  { %v52_v4 = vpop.xlane.xlu0 %51 }
  0x91   :  { %v57_v5 = vmul.f32 0.03125, %v52_v4 }
  0x93   :  { %v59_v6 = vsub.f32 %v1291_v0, %v57_v5 }
  0x94   :  { %v55_v7 = vpop.xlane.xlu0 %54 }
  0x95   :  { %v58_v8 = vmul.f32 0.03125, %v55_v7  ;;  %v61_v9 = vmul.f32 %v59_v6, %v59_v6 }
  0x97   :  { %v60_v10 = vsub.f32 %v1296_v1, %v58_v8  ;;  %v63_v11 = vsel %vm49_vm0, %v61_v9, 0.0 }
  0x98   :  { %64 = vadd.xlane.f32.xlu1 %v63_v11 }
  0x99   :  { %v62_v12 = vmul.f32 %v60_v10, %v60_v10 }
  0x9b   :  { %v66_v13 = vsel %vm49_vm0, %v62_v12, 0.0 }
  0x9c   :  { %67 = vadd.xlane.f32.xlu1 %v66_v13 }
 0x125   :  { %v65_v17 = vpop.xlane.xlu1 %64 }
 0x126   :  { %v69_v18 = vmul.f32 0.03125, %v65_v17 }
 0x128   :  { %v71_v19 = vadd.f32 1e-05, %v69_v18 }
 0x129   :  { %v68_v20 = vpop.xlane.xlu1 %67 }
 0x12a   :  { %1185 = vrsqrt.f32 %v71_v19  ;;  %v70_v21 = vmul.f32 0.03125, %v68_v20 }
 0x12c   :  { %v72_v22 = vadd.f32 1e-05, %v70_v21 }
 0x12e   :  { %1187 = vrsqrt.f32 %v72_v22 }
 0x134   :  { %v1186_v23 = vpop.eup %1185 }
 0x135   :  { %v75_v24 = vmul.f32 %v1186_v23, %v59_v6 }
 0x137   :  { %v83_v28 = vmul.f32 %v1001_v25, %v75_v24 }
 0x138   :  { %v1188_v26 = vpop.eup %1187 }
 0x139   :  { %v76_v27 = vmul.f32 %v1188_v26, %v60_v10  ;;  %v91_v31 = vadd.f32 %v1002_v29, %v83_v28 }
 0x13b   :  { %v84_v30 = vmul.f32 %v1001_v25, %v76_v27 }
 0x13d   :  { %v92_v32 = vadd.f32 %v1002_v29, %v84_v30 }
 0x13f   :  { %v93_v33 = vpack.c.bf16 %v92_v32, %v91_v31 }
 0x141   :  { %1075 = vmatmul.mubr.msk.bf16.vlgmr.msra.gmra.mrb[0].mxu1 %vm49_vm0, %v93_v33 }
 0x142   :  { %1080 = vmatprep.mubr.msk.bf16.mxu1 %vm1214_vm1, %v1213_v15 }
 0x214   :  { %v154_v35 = vpop.f32.mrb[0].mxu1 }
 0x215   :  { %v155_v36 = vadd.f32 %v1003_v34, %v154_v35  ;;  %v1076_v37 = vpop.f32.mrb[1].mxu1 }
 0x216   :  { %v157_v38 = vpop.f32.mrb[2].mxu1 }
 0x217   :  { %v158_v39 = vadd.f32 %v1003_v34, %v157_v38  ;;  %163 = vrot.lane.b32.xlu0 %v155_v36, %s1215_s1  ;;  %v1077_v40 = vpop.f32.mrb[3].mxu1  ;;  %v1332_v41 = vpack.c.bf16 %v155_v36, %v155_v36  ;;  %v169_v49 = vmul.f32 0.25, %v155_v36 }
 0x219   :  { %165 = vrot.lane.b32.xlu1 %v158_v39, %s1215_s1  ;;  %v178_v42 = vpack.c.bf16 %v158_v39, %v158_v39  ;;  %v173_v51 = vpack.c.bf16 %v169_v49, %v169_v49  ;;  %v170_v53 = vmul.f32 0.25, %v158_v39 }
 0x21b   :  { %v174_v54 = vpack.c.bf16 %v170_v53, %v170_v53 }
 0x21d   :  { %182 = vrot.lane.b32.xlu1 %v1332_v41, %s1216_s2 }
 0x221   :  { %232 = vrot.lane.b32.xlu1 %v178_v42, %s1216_s2 }
 0x289   :  { %v164_v43 = vpop.permute.xlu0 %163 }
 0x28a   :  { %v179_v44 = vpack.c.bf16 %v164_v43, %v164_v43  ;;  %v171_v58 = vmul.f32 0.25, %v164_v43 }
 0x28b   :  { %v166_v45 = vpop.permute.xlu1 %165 }
 0x28c   :  { %v180_v46 = vpack.c.bf16 %v166_v45, %v166_v45  ;;  %281 = vrot.lane.b32.xlu0 %v179_v44, %s1216_s2  ;;  %v172_v60 = vmul.f32 0.25, %v166_v45  ;;  %v175_v61 = vpack.c.bf16 %v171_v58, %v171_v58 }
 0x28e   :  { %330 = vrot.lane.b32.xlu1 %v180_v46, %s1216_s2  ;;  %v176_v62 = vpack.c.bf16 %v172_v60, %v172_v60 }
 0x28f   :  { %v183_v47 = vpop.permute.xlu1 %182 }
 0x290   :  { %v189_v48 = vsel %vm184_vm2, %v183_v47, 0 }
 0x291   :  { %1079 = vmatpush3.bf16.xpose.msra.mxu1 %v189_v48 }
 0x292   :  { %1084 = vmatprep.subr.bf16.mxu1 %v1213_v15 }
 0x293   :  { %v233_v50 = vpop.permute.xlu1 %232 }
 0x294   :  { %v238_v52 = vsel %vm184_vm2, %v233_v50, 0 }
 0x298   :  { %1081 = vmatmul.mubr.msk.bf16.vlgmr.msra.gmra.mrb[4].mxu1 %vm184_vm2, %v173_v51 }
 0x299   :  { %1085 = vmatpush3.bf16.xpose.msra.mxu1 %v238_v52  ;;  %1086 = vmatprep.mubr.msk.bf16.mxu1 %vm1214_vm1, %v1213_v15 }
 0x29a   :  { %1090 = vmatprep.subr.bf16.mxu1 %v1213_v15 }
 0x2a0   :  { %1087 = vmatmul.mubr.msk.bf16.vlgmr.msra.gmra.mrb[8].mxu1 %vm184_vm2, %v174_v54 }
 0x2a1   :  { %1092 = vmatprep.mubr.msk.bf16.mxu1 %vm1214_vm1, %v1213_v15 }
 0x2fe   :  { %v282_v55 = vpop.permute.xlu0 %281 }
 0x2ff   :  { %v287_v56 = vsel %vm184_vm2, %v282_v55, 0 }
 0x300   :  { %v331_v57 = vpop.permute.xlu1 %330  ;;  %1091 = vmatpush3.bf16.xpose.msra.mxu1 %v287_v56 }
 0x301   :  { %v336_v59 = vsel %vm184_vm2, %v331_v57, 0  ;;  %1102 = vmatprep.subr.bf16.mxu1 %v1213_v15 }
 0x302   :  { %1097 = vmatpush3.bf16.xpose.msra.mxu0 %v336_v59 }
 0x303   :  { %1108 = vmatprep.subr.bf16.mxu0 %v1213_v15 }
 0x307   :  { %1093 = vmatmul.mubr.msk.bf16.vlgmr.msra.gmra.mrb[12].mxu1 %vm184_vm2, %v175_v61 }
 0x308   :  { %1104 = vmatprep.mubr.msk.bf16.mxu1 %vm1214_vm1, %v1213_v15 }
 0x309   :  { %1099 = vmatmul.mubr.msk.bf16.vlgmr.msra.gmra.mrb[0].mxu0 %vm184_vm2, %v176_v62  ;;  %v1173_v62 = vld [vmem:[%s1497_s5] sm:$0xff]  }
 0x30a   :  { %1110 = vmatprep.mubr.msk.bf16.mxu0 %vm1214_vm1, %v1213_v15 }
 0x36b   :  { %v225_v5 = vpop.f32.mrb[4].mxu1 }
 0x36c   :  { %v387_v6 = vsel %vm1355_vm5, %v225_v5, -1e+30  ;;  %v1082_v7 = vpop.f32.mrb[5].mxu1 }
 0x36d   :  { %v228_v8 = vpop.f32.mrb[6].mxu1  ;;  %v392_v9 = vsel %vm391_vm6, %v387_v6, -inf }
 0x36e   :  { %393 = vmax.xlane.f32.xlu0 %v392_v9  ;;  %v1083_v10 = vpop.f32.mrb[7].mxu1 }
 0x373   :  { %v274_v11 = vpop.f32.mrb[8].mxu1 }
 0x374   :  { %v388_v12 = vsel %vm1355_vm5, %v274_v11, -1e+30  ;;  %v1088_v13 = vpop.f32.mrb[9].mxu1 }
 0x375   :  { %v277_v14 = vpop.f32.mrb[10].mxu1  ;;  %v395_v16 = vsel %vm391_vm6, %v388_v12, -inf }
 0x376   :  { %396 = vmax.xlane.f32.xlu1 %v395_v16  ;;  %v1089_v17 = vpop.f32.mrb[11].mxu1 }
 0x387   :  { %481 = vrot.lane.b32.xlu1 %v178_v42, %s1217_s4 }
 0x38b   :  { %529 = vrot.lane.b32.xlu1 %v179_v44, %s1217_s4 }
 0x38f   :  { %577 = vrot.lane.b32.xlu1 %v180_v46, %s1217_s4 }
 0x3da   :  { %v323_v18 = vpop.f32.mrb[12].mxu1 }
 0x3db   :  { %v389_v19 = vsel %vm1355_vm5, %v323_v18, -1e+30  ;;  %v1094_v20 = vpop.f32.mrb[13].mxu1 }
 0x3dc   :  { %v326_v21 = vpop.f32.mrb[14].mxu1  ;;  %v372_v22 = vpop.f32.mrb[0].mxu0  ;;  %v398_v23 = vsel %vm391_vm6, %v389_v19, -inf }
 0x3dd   :  { %v390_v24 = vsel %vm1355_vm5, %v372_v22, -1e+30  ;;  %v1100_v25 = vpop.f32.mrb[1].mxu0  ;;  %399 = vmax.xlane.f32.xlu0 %v398_v23  ;;  %v1095_v26 = vpop.f32.mrb[15].mxu1 }
 0x3de   :  { %v375_v27 = vpop.f32.mrb[2].mxu0  ;;  %v401_v29 = vsel %vm391_vm6, %v390_v24, -inf }
 0x3df   :  { %v1101_v28 = vpop.f32.mrb[3].mxu0 }
 0x3e1   :  { %402 = vmax.xlane.f32.xlu0 %v401_v29 }
 0x3f7   :  { %432 = vrot.lane.b32.xlu0 %v1332_v41, %s1217_s4 }
 0x3fb   :  { %v394_v30 = vpop.xlane.xlu0 %393 }
 0x3fc   :  { %v404_v31 = vsub.f32 %v387_v6, %v394_v30 }
 0x3fe   :  { %v408_v32 = vmul.f32 1.442695, %v404_v31 }
 0x400   :  { %1189 = vpow2.f32 %v408_v32 }
 0x403   :  { %v397_v33 = vpop.xlane.xlu1 %396 }
 0x404   :  { %v405_v34 = vsub.f32 %v388_v12, %v397_v33 }
 0x406   :  { %v410_v35 = vmul.f32 1.442695, %v405_v34 }
 0x407   :  { %v482_v36 = vpop.permute.xlu1 %481 }
 0x408   :  { %1191 = vpow2.f32 %v410_v35  ;;  %v487_v37 = vsel %vm437_vm7, %v482_v36, 0 }
 0x409   :  { %1109 = vmatpush3.bf16.msra.mxu0 %v487_v37 }
 0x40a   :  { %1120 = vmatprep.subr.bf16.mxu0 %v1213_v15  ;;  %v1190_v39 = vpop.eup %1189 }
 0x40b   :  { %v530_v38 = vpop.permute.xlu1 %529  ;;  %v416_v45 = vsel %vm391_vm6, %v1190_v39, 0.0  ;;  %v428_v54 = vpack.c.bf16 %v1190_v39, %v1190_v39 }
 0x40c   :  { %v535_v55 = vsel %vm437_vm7, %v530_v38, 0 }
 0x40f   :  { %v578_v42 = vpop.permute.xlu1 %577 }
 0x410   :  { %v583_v44 = vsel %vm437_vm7, %v578_v42, 0 }
 0x412   :  { %v1192_v40 = vpop.eup %1191 }
 0x413   :  { %v419_v41 = vsel %vm391_vm6, %v1192_v40, 0.0  ;;  %v429_v43 = vpack.c.bf16 %v1192_v40, %v1192_v40 }
 0x414   :  { %420 = vadd.xlane.f32.xlu1 %v419_v41 }
 0x415   :  { %1111 = vmatmul.mubr.msk.bf16.vlgmr.msra.gmra.mrb[4].mxu0 %vm391_vm6, %v429_v43 }
 0x416   :  { %1121 = vmatpush3.bf16.msra.mxu0 %v583_v44  ;;  %417 = vadd.xlane.f32.xlu0 %v416_v45 }
 0x417   :  { %1122 = vmatprep.mubr.msk.bf16.mxu0 %vm1214_vm1, %v1213_v15  ;;  %1132 = vmatprep.subr.bf16.mxu0 %v1213_v15 }
 0x46a   :  { %v400_v46 = vpop.xlane.xlu0 %399 }
 0x46b   :  { %v406_v47 = vsub.f32 %v389_v19, %v400_v46  ;;  %v1019_v46 = vld [vmem:[%s1498_s6] ss:$0 sm:$0xff] }
 0x46d   :  { %v412_v48 = vmul.f32 1.442695, %v406_v47 }
 0x46e   :  { %v403_v49 = vpop.xlane.xlu0 %402 }
 0x46f   :  { %1193 = vpow2.f32 %v412_v48  ;;  %v407_v50 = vsub.f32 %v390_v24, %v403_v49 }
 0x471   :  { %v414_v51 = vmul.f32 1.442695, %v407_v50 }
 0x472   :  { %v433_v52 = vpop.permute.xlu0 %432 }
 0x473   :  { %1195 = vpow2.f32 %v414_v51  ;;  %v439_v53 = vsel %vm437_vm7, %v433_v52, 0 }
 0x474   :  { %1103 = vmatpush3.bf16.msra.mxu1 %v439_v53 }
 0x475   :  { %1114 = vmatprep.subr.bf16.mxu1 %v1213_v15 }
 0x477   :  { %1105 = vmatmul.mubr.msk.bf16.vlgmr.msra.gmra.mrb[16].mxu1 %vm391_vm6, %v428_v54 }
 0x478   :  { %1115 = vmatpush3.bf16.msra.mxu1 %v535_v55  ;;  %1116 = vmatprep.mubr.msk.bf16.mxu1 %vm1214_vm1, %v1213_v15 }
 0x479   :  { %v1194_v56 = vpop.eup %1193  ;;  %1126 = vmatprep.subr.bf16.mxu1 %v1213_v15 }
 0x47a   :  { %v422_v57 = vsel %vm391_vm6, %v1194_v56, 0.0  ;;  %v430_v59 = vpack.c.bf16 %v1194_v56, %v1194_v56 }
 0x47b   :  { %423 = vadd.xlane.f32.xlu0 %v422_v57 }
 0x47d   :  { %v1196_v58 = vpop.eup %1195 }
 0x47e   :  { %v425_v60 = vsel %vm391_vm6, %v1196_v58, 0.0  ;;  %v431_v61 = vpack.c.bf16 %v1196_v58, %v1196_v58 }
 0x47f   :  { %426 = vadd.xlane.f32.xlu0 %v425_v60  ;;  %1117 = vmatmul.mubr.msk.bf16.vlgmr.msra.gmra.mrb[20].mxu1 %vm391_vm6, %v430_v59 }
 0x480   :  { %1123 = vmatmul.mubr.msk.bf16.vlgmr.msra.gmra.mrb[8].mxu0 %vm391_vm6, %v431_v61  ;;  %1128 = vmatprep.mubr.msk.bf16.mxu1 %vm1214_vm1, %v1213_v15 }
 0x481   :  { %1134 = vmatprep.mubr.msk.bf16.mxu0 %vm1214_vm1, %v1213_v15  ;;  %1127 = vmatpush3.bf16.msra.mxu1 %v1173_v62  ;;  %v1175_v62 = vld [vmem:[%s1499_s9] sm:$0xff]  }
 0x482   :  { %1138 = vmatprep.subr.bf16.mxu1 %v1213_v15  ;;  %1133 = vmatpush3.bf16.msra.mxu0 %v1174_v63  ;;  %v1176_v63 = vld [vmem:[%s1499_s9 + $0x8] sm:$0xff]  }
 0x483   :  { %1146 = vmatprep.subr.bf16.mxu0 %v1213_v15 }
 0x4a1   :  { %v421_v6 = vpop.xlane.xlu1 %420 }
 0x4a2   :  { %1197 = vrcp.f32 %v421_v6 }
 0x4a3   :  { %v418_v7 = vpop.xlane.xlu0 %417 }
 0x4a4   :  { %1199 = vrcp.f32 %v418_v7 }
 0x4ac   :  { %v1198_v10 = vpop.eup %1197 }
 0x4ae   :  { %v1200_v11 = vpop.eup %1199 }
 0x4e8   :  { %v523_v2 = vpop.f32.mrb[4].mxu0 }
 0x4e9   :  { %v1112_v3 = vpop.f32.mrb[5].mxu0  ;;  %v630_v13 = vmul.f32 %v1198_v10, %v523_v2  ;;  %v1177_v2 = vld [vmem:[%s1500_s11] sm:$0xff]  }
 0x4ea   :  { %v526_v4 = vpop.f32.mrb[6].mxu0  ;;  %v1178_v3 = vld [vmem:[%s1500_s11 + $0x8] sm:$0xff]  }
 0x4eb   :  { %v1113_v5 = vpop.f32.mrb[7].mxu0 }
 0x508   :  { %v424_v8 = vpop.xlane.xlu0 %423 }
 0x509   :  { %1201 = vrcp.f32 %v424_v8 }
 0x50c   :  { %v427_v9 = vpop.xlane.xlu0 %426 }
 0x50d   :  { %1203 = vrcp.f32 %v427_v9 }
 0x513   :  { %v1202_v20 = vpop.eup %1201 }
 0x517   :  { %v1204_v22 = vpop.eup %1203 }
 0x54a   :  { %v475_v12 = vpop.f32.mrb[16].mxu1 }
 0x54b   :  { %v629_v14 = vmul.f32 %v1200_v11, %v475_v12  ;;  %v1106_v16 = vpop.f32.mrb[17].mxu1  ;;  %v1020_v11 = vld [vmem:[%s1501_s7] ss:$0 sm:$0xff] }
 0x54c   :  { %v478_v17 = vpop.f32.mrb[18].mxu1 }
 0x54d   :  { %v633_v18 = vpack.c.bf16 %v630_v13, %v629_v14  ;;  %v1107_v19 = vpop.f32.mrb[19].mxu1  ;;  %v1021_v17 = vld [vmem:[%s1502_s8] ss:$0 sm:$0xff] }
 0x54f   :  { %1129 = vmatmul.mubr.msk.bf16.vlgmr.msra.gmra.mrb[24].mxu1 %vm184_vm2, %v633_v18 }
 0x550   :  { %1142 = vmatprep.mubr.msk.bf16.mxu1 %vm1214_vm1, %v1213_v15  ;;  %1139 = vmatpush3.bf16.msra.mxu1 %v1175_v62 }
 0x551   :  { %1140 = vmatprep.subr.bf16.mxu1 %v1213_v15 }
 0x552   :  { %v571_v21 = vpop.f32.mrb[20].mxu1 }
 0x553   :  { %v631_v23 = vmul.f32 %v1202_v20, %v571_v21  ;;  %v1118_v24 = vpop.f32.mrb[21].mxu1  ;;  %v619_v25 = vpop.f32.mrb[8].mxu0 }
 0x554   :  { %v632_v26 = vmul.f32 %v1204_v22, %v619_v25  ;;  %v574_v27 = vpop.f32.mrb[22].mxu1  ;;  %v1124_v28 = vpop.f32.mrb[9].mxu0  ;;  %1141 = vmatpush3.bf16.msra.mxu1 %v1176_v63  ;;  %v1179_v22 = vld [vmem:[%s1500_s11 + $0x10] sm:$0xff]   ;;  %v1181_v24 = vld [vmem:[%s1500_s11 + $0x20] sm:$0xff]   ;;  %v1182_v25 = vld [vmem:[%s1500_s11 + $0x28] sm:$0xff]  }
 0x555   :  { %v1119_v29 = vpop.f32.mrb[23].mxu1  ;;  %v622_v30 = vpop.f32.mrb[10].mxu0  ;;  %v1184_v27 = vld [vmem:[%s1500_s11 + $0x38] sm:$0xff]   ;;  %v1022_v28 = vld [vmem:[%s1503_s10] ss:$0 sm:$0xff] }
 0x556   :  { %v634_v31 = vpack.c.bf16 %v632_v26, %v631_v23  ;;  %v1125_v32 = vpop.f32.mrb[11].mxu0  ;;  %v1180_v23 = vld [vmem:[%s1500_s11 + $0x18] sm:$0xff]   ;;  %v1183_v26 = vld [vmem:[%s1500_s11 + $0x30] sm:$0xff]  }
 0x558   :  { %1135 = vmatmul.mubr.msk.bf16.vlgmr.msra.gmra.mrb[12].mxu0 %vm184_vm2, %v634_v31 }
 0x559   :  { %1162 = vmatprep.mubr.msk.bf16.mxu0 %vm1214_vm1, %v1213_v15  ;;  %1147 = vmatpush3.bf16.msra.mxu0 %v1177_v2 }
 0x55a   :  { %1148 = vmatprep.subr.bf16.mxu0 %v1213_v15 }
 0x55d   :  { %1149 = vmatpush3.bf16.msra.mxu0 %v1178_v3 }
 0x55e   :  { %1150 = vmatprep.subr.bf16.mxu0 %v1213_v15 }
 0x561   :  { %1151 = vmatpush3.bf16.msra.mxu0 %v1179_v22 }
 0x562   :  { %1152 = vmatprep.subr.bf16.mxu0 %v1213_v15 }
 0x565   :  { %1153 = vmatpush3.bf16.msra.mxu0 %v1180_v23 }
 0x566   :  { %1154 = vmatprep.subr.bf16.mxu0 %v1213_v15 }
 0x569   :  { %1155 = vmatpush3.bf16.msra.mxu0 %v1181_v24 }
 0x56a   :  { %1156 = vmatprep.subr.bf16.mxu0 %v1213_v15 }
 0x56d   :  { %1157 = vmatpush3.bf16.msra.mxu0 %v1182_v25 }
 0x56e   :  { %1158 = vmatprep.subr.bf16.mxu0 %v1213_v15 }
 0x571   :  { %1159 = vmatpush3.bf16.msra.mxu0 %v1183_v26 }
 0x572   :  { %1160 = vmatprep.subr.bf16.mxu0 %v1213_v15 }
 0x575   :  { %1161 = vmatpush3.bf16.msra.mxu0 %v1184_v27 }
 0x622   :  { %v682_v33 = vpop.f32.mrb[24].mxu1 }
 0x623   :  { %v1130_v34 = vpop.f32.mrb[25].mxu1  ;;  %v739_v38 = vsel %vm49_vm0, %v682_v33, 0.0 }
 0x624   :  { %v685_v35 = vpop.f32.mrb[26].mxu1 }
 0x625   :  { %v1131_v36 = vpop.f32.mrb[27].mxu1  ;;  %v742_v43 = vsel %vm49_vm0, %v685_v35, 0.0 }
 0x62b   :  { %v732_v37 = vpop.f32.mrb[12].mxu0 }
 0x62c   :  { %v740_v39 = vsel %vm49_vm0, %v732_v37, 0.0  ;;  %v1136_v40 = vpop.f32.mrb[13].mxu0 }
 0x62d   :  { %v741_v42 = vadd.f32 %v740_v39, %v739_v38  ;;  %v735_v41 = vpop.f32.mrb[14].mxu0 }
 0x62e   :  { %v743_v44 = vsel %vm49_vm0, %v735_v41, 0.0  ;;  %v1137_v45 = vpop.f32.mrb[15].mxu0 }
 0x62f   :  { %v745_v47 = vadd.f32 %v741_v42, %v1291_v0  ;;  %v744_v48 = vadd.f32 %v743_v44, %v742_v43 }
 0x631   :  { %v746_v49 = vadd.f32 %v744_v48, %v1296_v1  ;;  %v1419_v50 = vadd.f32 %v1019_v46, %v745_v47 }
 0x633   :  { %v758_v51 = vsel %vm49_vm0, %v1419_v50, 0.0  ;;  %v1423_v52 = vadd.f32 %v1019_v46, %v746_v49  ;;  %v1034_v46 = vld [vmem:[%s1504_s12] ss:$0 sm:$0xff] }
 0x634   :  { %759 = vadd.xlane.f32.xlu0 %v758_v51 }
 0x635   :  { %v761_v53 = vsel %vm49_vm0, %v1423_v52, 0.0 }
 0x636   :  { %762 = vadd.xlane.f32.xlu1 %v761_v53 }
 0x6c1   :  { %v760_v54 = vpop.xlane.xlu0 %759 }
 0x6c2   :  { %v764_v55 = vmul.f32 0.03125, %v760_v54 }
 0x6c3   :  { %v763_v56 = vpop.xlane.xlu1 %762 }
 0x6c4   :  { %v766_v0 = vsub.f32 %v1419_v50, %v764_v55  ;;  %v765_v57 = vmul.f32 0.03125, %v763_v56 }
 0x6c6   :  { %v767_v1 = vsub.f32 %v1423_v52, %v765_v57  ;;  %v768_v58 = vmul.f32 %v766_v0, %v766_v0 }
 0x6c8   :  { %v770_v59 = vsel %vm49_vm0, %v768_v58, 0.0  ;;  %v769_v60 = vmul.f32 %v767_v1, %v767_v1 }
 0x6c9   :  { %771 = vadd.xlane.f32.xlu0 %v770_v59 }
 0x6ca   :  { %v773_v61 = vsel %vm49_vm0, %v769_v60, 0.0 }
 0x6cb   :  { %774 = vadd.xlane.f32.xlu1 %v773_v61 }
 0x756   :  { %v772_v4 = vpop.xlane.xlu0 %771 }
 0x757   :  { %v776_v5 = vmul.f32 0.03125, %v772_v4 }
 0x758   :  { %v775_v6 = vpop.xlane.xlu1 %774 }
 0x759   :  { %v778_v7 = vadd.f32 1e-05, %v776_v5  ;;  %v777_v8 = vmul.f32 0.03125, %v775_v6 }
 0x75b   :  { %1205 = vrsqrt.f32 %v778_v7  ;;  %v779_v9 = vadd.f32 1e-05, %v777_v8 }
 0x75d   :  { %1207 = vrsqrt.f32 %v779_v9 }
 0x765   :  { %v1206_v10 = vpop.eup %1205 }
 0x766   :  { %v782_v12 = vmul.f32 %v1206_v10, %v766_v0 }
 0x767   :  { %v1208_v13 = vpop.eup %1207 }
 0x768   :  { %v790_v14 = vmul.f32 %v1020_v11, %v782_v12  ;;  %v783_v16 = vmul.f32 %v1208_v13, %v767_v1 }
 0x76a   :  { %v791_v18 = vmul.f32 %v1020_v11, %v783_v16  ;;  %v798_v19 = vadd.f32 %v1021_v17, %v790_v14 }
 0x76c   :  { %v799_v20 = vadd.f32 %v1021_v17, %v791_v18 }
 0x76e   :  { %v800_v21 = vpack.c.bf16 %v799_v20, %v798_v19 }
 0x770   :  { %1143 = vmatmul.mubr.msk.bf16.vlgmr.msra.gmra.mrb[28].mxu1 %vm49_vm0, %v800_v21 }
 0x843   :  { %v861_v29 = vpop.f32.mrb[28].mxu1 }
 0x844   :  { %v862_v30 = vadd.f32 %v1022_v28, %v861_v29  ;;  %v1144_v31 = vpop.f32.mrb[29].mxu1 }
 0x845   :  { %v864_v32 = vpop.f32.mrb[30].mxu1 }
 0x846   :  { %v870_v33 = vmul.f32 0.70710677, %v862_v30  ;;  %v865_v34 = vadd.f32 %v1022_v28, %v864_v32  ;;  %v1145_v35 = vpop.f32.mrb[31].mxu1  ;;  %v868_v39 = vmul.f32 0.5, %v862_v30 }
 0x848   :  { %1209 = verf.f32 %v870_v33  ;;  %v871_v36 = vmul.f32 0.70710677, %v865_v34  ;;  %v869_v40 = vmul.f32 0.5, %v865_v34 }
 0x84a   :  { %1211 = verf.f32 %v871_v36 }
 0x852   :  { %v1210_v15 = vpop.eup %1209 }
 0x853   :  { %v874_v37 = vadd.f32 1.0, %v1210_v15 }
 0x854   :  { %v1212_v38 = vpop.eup %1211 }
 0x855   :  { %v875_v42 = vadd.f32 1.0, %v1212_v38  ;;  %v876_v41 = vmul.f32 %v874_v37, %v868_v39 }
 0x857   :  { %v877_v43 = vmul.f32 %v875_v42, %v869_v40 }
 0x859   :  { %v878_v44 = vpack.c.bf16 %v877_v43, %v876_v41 }
 0x85b   :  { %1163 = vmatmul.mubr.bf16.vlgmr.msra.gmra.mrb[16].mxu0 %v878_v44 }
 0x92e   :  { %v977_v45 = vpop.f32.mrb[16].mxu0 }
 0x92f   :  { %v984_v47 = vadd.f32 %v977_v45, %v1419_v50  ;;  %v1164_v48 = vpop.f32.mrb[17].mxu0 }
 0x930   :  { %v980_v49 = vpop.f32.mrb[18].mxu0 }
 0x931   :  { %v993_v51 = vadd.f32 %v1034_v46, %v984_v47  ;;  %v985_v53 = vadd.f32 %v980_v49, %v1423_v52  ;;  %v1165_v54 = vpop.f32.mrb[19].mxu0 }
 0x933   :  { %995 = vst.msk [vmem:[%s1505_s13] sm:$0xff] %vm49_vm0, %v993_v51  ;;  %v994_v55 = vadd.f32 %v1034_v46, %v985_v53 }
 0x935   :  { %996 = vst.msk [vmem:[%s1505_s13 + $0x8] sm:$0xff] %vm49_vm0, %v994_v55 }

</bundles_post_ra>
